<compile_context>
chip_gen: v7x
topology: tpu7x:2x2x1
jax: 0.10.0
libtpu: 0.0.40
codegen_flags: <defaults>
</compile_context>

<pallas_src>
import jax
import jax.numpy as jnp
import numpy as np
from jax.experimental import pallas as pl
from jax.experimental.pallas import tpu as pltpu

LEAK = 0.01


# ----------------------------- Pallas kernels -------------------------------

def _conv1_pool_leaky_kernel(cols_ref, w_ref, b_ref, o_ref):
    """conv-as-matmul + bias + 2x2 maxpool + leaky relu, lane-dense output.

    cols_ref: (4, C*k*k, N*PH*PW) -- four pool-parity im2col column matrices.
    w_ref:    (OC, C*k*k)          b_ref: (OC, 1)
    o_ref:    (OC, N*PH*PW)
    """
    w = w_ref[...]
    m = jnp.dot(w, cols_ref[0], preferred_element_type=jnp.float32)
    for a in range(1, cols_ref.shape[0]):
        m = jnp.maximum(
            m, jnp.dot(w, cols_ref[a], preferred_element_type=jnp.float32))
    m = m + b_ref[...]                       # per-channel bias, broadcast on lanes
    o_ref[...] = jnp.where(m >= 0, m, LEAK * m)


def _conv2_fc_kernel(cols_ref, w2_ref, b2_ref, wf1_ref, bf1_ref,
                     wf2_ref, bf2_ref, wfl_ref, bfl_ref, o_ref):
    """conv2 + bias + 2x2 maxpool + leaky + fc1 + leaky + fc2 + leaky + fc_last.

    cols_ref: (4, N, C2*k*k, PH2*PW2)  per-parity, per-image im2col columns
    w2_ref:   (OC2, C2*k*k)            b2_ref: (OC2, 1)
    wf1_ref:  (OC2, PH2*PW2, F1)       (fc1 weight pre-permuted: [c, s, j])
    bf1/bf2/bfl: (1, F)                wf2_ref: (F1, F2)   wfl_ref: (F2, NC)
    o_ref:    (N, NC)
    """
    n_par, n_img = cols_ref.shape[0], cols_ref.shape[1]
    oc2 = w2_ref.shape[0]
    f1 = wf1_ref.shape[2]

    w2 = w2_ref[...]
    b2 = b2_ref[...]

    # conv2 + bias + pool(parity max) + leaky, one (OC2, 25) tile per image.
    hs = []
    for n in range(n_img):
        h = jnp.dot(w2, cols_ref[0, n], preferred_element_type=jnp.float32)
        for a in range(1, n_par):
            h = jnp.maximum(
                h, jnp.dot(w2, cols_ref[a, n],
                           preferred_element_type=jnp.float32))
        h = h + b2
        hs.append(jnp.where(h >= 0, h, LEAK * h))   # rows = channel, lanes = (ph, pw)

    # fc1: NCHW flatten folded into per-channel dots (weight loaded once per c).
    accs = [jnp.zeros((1, f1), jnp.float32) for _ in range(n_img)]
    for c in range(oc2):
        wc = wf1_ref[c]                              # (25, F1)
        for n in range(n_img):
            accs[n] = accs[n] + jnp.dot(hs[n][c:c + 1, :], wc,
                                        preferred_element_type=jnp.float32)

    bf1 = bf1_ref[...]
    wf2 = wf2_ref[...]
    bf2 = bf2_ref[...]
    wfl = wfl_ref[...]
    bfl = bfl_ref[...]
    for n in range(n_img):
        y = accs[n] + bf1
        y = jnp.where(y >= 0, y, LEAK * y)
        y = jnp.dot(y, wf2, preferred_element_type=jnp.float32) + bf2
        y = jnp.where(y >= 0, y, LEAK * y)
        o_ref[n:n + 1, :] = (
            jnp.dot(y, wfl, preferred_element_type=jnp.float32) + bfl)


# ---------------------------- pallas_call wrappers ---------------------------

def _conv1_pool_leaky(cols, w, b):
    return pl.pallas_call(
        _conv1_pool_leaky_kernel,
        out_shape=jax.ShapeDtypeStruct((w.shape[0], cols.shape[2]), jnp.float32),
        in_specs=[pl.BlockSpec(memory_space=pltpu.MemorySpace.VMEM)] * 3,
        out_specs=pl.BlockSpec(memory_space=pltpu.MemorySpace.VMEM),
    )(cols, w, b)


def _conv2_fc_head(cols2, p):
    n_img = cols2.shape[1]
    num_classes = p['bfl'].shape[-1]
    return pl.pallas_call(
        _conv2_fc_kernel,
        out_shape=jax.ShapeDtypeStruct((n_img, num_classes), jnp.float32),
        in_specs=[pl.BlockSpec(memory_space=pltpu.MemorySpace.VMEM)] * 9,
        out_specs=pl.BlockSpec(memory_space=pltpu.MemorySpace.VMEM),
    )(cols2, p['w2'], p['b2'], p['wf1p'], p['bf1'],
      p['wf2t'], p['bf2'], p['wflt'], p['bfl'])


# ------------------------------ XLA glue (thin) -------------------------------

def _pooled_patches(x_nchw, k):
    """im2col patches for a valid kxk conv, pre-split into the four 2x2-maxpool
    parities so the pool becomes an elementwise max of four matmul results.

    Returns (4, N, C*k*k, PH, PW); the C*k*k axis is ordered (c, kh, kw), which
    matches PyTorch's Conv2d weight.view(OC, -1).  Requires even conv output
    spatial dims (true for 32x32 -> 28x28 and 14x14 -> 10x10).
    """
    p = jax.lax.conv_general_dilated_patches(
        x_nchw, filter_shape=(k, k), window_strides=(1, 1), padding='VALID',
        dimension_numbers=('NCHW', 'OIHW', 'NCHW'))       # (N, C*k*k, OH, OW)
    PH, PW = p.shape[2] // 2, p.shape[3] // 2
    par = jnp.stack([p[:, :, a::2, b::2] for a in (0, 1) for b in (0, 1)],
                    axis=0)                               # (4, N, C*k*k, PH, PW)
    return par, (x_nchw.shape[0], PH, PW)


def prepare_params(params):
    """One-time weight layout prep (hoisted out of the per-forward path)."""
    w1, b1, w2, b2, wf1, bf1, wf2, bf2, wfl, bfl = params
    oc2, f1 = w2.shape[0], wf1.shape[0]
    s2 = wf1.shape[1] // oc2                              # pooled conv2 spatial (25)
    return {
        'w1': w1.reshape(w1.shape[0], -1).astype(jnp.float32),    # (6, 75)
        'b1': b1.reshape(-1, 1).astype(jnp.float32),
        'w2': w2.reshape(oc2, -1).astype(jnp.float32),            # (16, 150)
        'b2': b2.reshape(-1, 1).astype(jnp.float32),
        # fc1 weight pre-permuted so the NCHW flatten folds into per-channel
        # dots inside the kernel: wf1p[c, s, j] = Wf1[j, c*25 + s]
        'wf1p': wf1.reshape(f1, oc2, s2).transpose(1, 2, 0).astype(jnp.float32),
        'bf1': bf1.reshape(1, -1).astype(jnp.float32),
        'wf2t': wf2.T.astype(jnp.float32),                        # (256, 128)
        'bf2': bf2.reshape(1, -1).astype(jnp.float32),
        'wflt': wfl.T.astype(jnp.float32),                        # (128, NC)
        'bfl': bfl.reshape(1, -1).astype(jnp.float32),
    }


def ntknet_small_forward(x, prepared):
    """NTKNetSmall.forward -> (logits, None).  jvp branch is None after __init__."""
    x = x.reshape(-1, 3, 32, 32).astype(jnp.float32)      # x.view(-1, 3, 32, 32)

    # --- conv1 + bias + maxpool2 + leaky (kernel A, lane-dense output) ---
    par1, (N, PH1, PW1) = _pooled_patches(x, 5)           # (4, N, 75, 14, 14)
    cols1 = par1.transpose(0, 2, 1, 3, 4).reshape(4, par1.shape[2],
                                                  N * PH1 * PW1)
    h1 = _conv1_pool_leaky(cols1, prepared['w1'], prepared['b1'])   # (6, N*196)

    # --- im2col for conv2 (tiny (N,6,14,14) tensor, pure layout glue) ---
    h1_img = h1.reshape(prepared['w1'].shape[0], N, PH1, PW1)
    h1_img = h1_img.transpose(1, 0, 2, 3)                 # (N, 6, 14, 14)
    par2, (_, PH2, PW2) = _pooled_patches(h1_img, 5)      # (4, N, 150, 5, 5)
    cols2 = par2.reshape(4, N, par2.shape[2], PH2 * PW2)  # (4, N, 150, 25)

    # --- conv2 + pool + leaky + fc1 + fc2 + fc_last (kernel B) ---
    logits = _conv2_fc_head(cols2, prepared)
    # jvp branch: self.jvpconv1 is None right after __init__, so jvp == None.
    return logits, None


# -------------------------------- params --------------------------------------

def init_params(key, num_classes=10):
    """Deterministic PyTorch-shaped parameters (uniform +-1/sqrt(fan_in))."""
    shapes = [
        ("conv1.w", (6, 3, 5, 5)), ("conv1.b", (6,)),
        ("conv2.w", (16, 6, 5, 5)), ("conv2.b", (16,)),
        ("fc1.w", (256, 16 * 5 * 5)), ("fc1.b", (256,)),
        ("fc2.w", (128, 256)), ("fc2.b", (128,)),
        ("fc_last.w", (num_classes, 128)), ("fc_last.b", (num_classes,)),
    ]
    fan_ins = [3 * 25, 3 * 25, 6 * 25, 6 * 25, 400, 400, 256, 256, 128, 128]
    keys = jax.random.split(key, len(shapes))
    params = []
    for (_, shp), fin, k in zip(shapes, fan_ins, keys):
        bound = 1.0 / np.sqrt(fin)
        params.append(jax.random.uniform(k, shp, jnp.float32, -bound, bound))
    return params


# --------------------------- pure-JAX reference -------------------------------

def _ref_forward(x, params):
    w1, b1, w2, b2, wf1, bf1, wf2, bf2, wfl, bfl = params
    x = x.reshape(-1, 3, 32, 32).astype(jnp.float32)
    hi = jax.lax.Precision.HIGHEST

    def lrelu(v):
        return jnp.where(v >= 0, v, LEAK * v)

    def conv(v, w, b):
        y = jax.lax.conv_general_dilated(
            v, w, (1, 1), 'VALID',
            dimension_numbers=('NCHW', 'OIHW', 'NCHW'), precision=hi)
        return y + b.reshape(1, -1, 1, 1)

    def pool2(v):
        return jax.lax.reduce_window(v, -jnp.inf, jax.lax.max,
                                     (1, 1, 2, 2), (1, 1, 2, 2), 'VALID')

    y = lrelu(pool2(conv(x, w1, b1)))
    y = lrelu(pool2(conv(y, w2, b2)))
    y = y.reshape(y.shape[0], -1)
    y = lrelu(jnp.dot(y, wf1.T, precision=hi) + bf1)
    y = lrelu(jnp.dot(y, wf2.T, precision=hi) + bf2)
    return jnp.dot(y, wfl.T, precision=hi) + bfl


if __name__ == "__main__":
    key = jax.random.PRNGKey(0)
    kx, kp = jax.random.split(key)
    x = jax.random.normal(kx, (2, 3, 32, 32), jnp.float32)   # batch=2 CIFAR-shaped
    params = init_params(kp, num_classes=10)
    prepared = prepare_params(params)                        # one-time weight prep

    fwd = jax.jit(ntknet_small_forward)
    logits, jvp = fwd(x, prepared)
    logits = jax.block_until_ready(logits)
    assert logits.shape == (2, 10) and jvp is None

    ref = jax.block_until_ready(_ref_forward(x, params))
    np.testing.assert_allclose(np.asarray(logits), np.asarray(ref),
                               rtol=1e-4, atol=1e-4)
    print("KERNEL_OK")
</pallas_src>

<mosaic_0001>
module attributes {stable_mosaic.version = 11 : i64} {
  func.func @_conv1_pool_leaky_kernel(%arg0: memref<4x75x392xf32, #tpu.memory_space<vmem>>, %arg1: memref<6x75xf32, #tpu.memory_space<vmem>>, %arg2: memref<6x1xf32, #tpu.memory_space<vmem>>, %arg3: memref<6x392xf32, #tpu.memory_space<vmem>>) attributes {dimension_semantics = [], scalar_prefetch = 0 : i64, scratch_operands = 0 : i64, tpu.core_type = #tpu.core_type<tc>} {
    %c0 = arith.constant 0 : index
    %c0_0 = arith.constant 0 : index
    %0 = vector.load %arg1[%c0, %c0_0] : memref<6x75xf32, #tpu.memory_space<vmem>>, vector<6x75xf32>
    %c0_1 = arith.constant 0 : index
    %c0_2 = arith.constant 0 : index
    %c0_3 = arith.constant 0 : index
    %1 = vector.load %arg0[%c0_1, %c0_2, %c0_3] : memref<4x75x392xf32, #tpu.memory_space<vmem>>, vector<1x75x392xf32>
    %2 = vector.shape_cast %1 : vector<1x75x392xf32> to vector<75x392xf32>
    %cst = arith.constant dense<0.000000e+00> : vector<6x392xf32>
    %3 = tpu.matmul %0, %2, %cst {dimension_numbers = #tpu.dot_dimension_numbers<[1], [0], [0], [1], [0, 0, 1, 1], [], []>} : vector<6x75xf32>, vector<75x392xf32>, vector<6x392xf32> -> vector<6x392xf32>
    %c1 = arith.constant 1 : index
    %c0_4 = arith.constant 0 : index
    %c0_5 = arith.constant 0 : index
    %4 = vector.load %arg0[%c1, %c0_4, %c0_5] : memref<4x75x392xf32, #tpu.memory_space<vmem>>, vector<1x75x392xf32>
    %5 = vector.shape_cast %4 : vector<1x75x392xf32> to vector<75x392xf32>
    %cst_6 = arith.constant dense<0.000000e+00> : vector<6x392xf32>
    %6 = tpu.matmul %0, %5, %cst_6 {dimension_numbers = #tpu.dot_dimension_numbers<[1], [0], [0], [1], [0, 0, 1, 1], [], []>} : vector<6x75xf32>, vector<75x392xf32>, vector<6x392xf32> -> vector<6x392xf32>
    %7 = arith.maximumf %3, %6 : vector<6x392xf32>
    %c2 = arith.constant 2 : index
    %c0_7 = arith.constant 0 : index
    %c0_8 = arith.constant 0 : index
    %8 = vector.load %arg0[%c2, %c0_7, %c0_8] : memref<4x75x392xf32, #tpu.memory_space<vmem>>, vector<1x75x392xf32>
    %9 = vector.shape_cast %8 : vector<1x75x392xf32> to vector<75x392xf32>
    %cst_9 = arith.constant dense<0.000000e+00> : vector<6x392xf32>
    %10 = tpu.matmul %0, %9, %cst_9 {dimension_numbers = #tpu.dot_dimension_numbers<[1], [0], [0], [1], [0, 0, 1, 1], [], []>} : vector<6x75xf32>, vector<75x392xf32>, vector<6x392xf32> -> vector<6x392xf32>
    %11 = arith.maximumf %7, %10 : vector<6x392xf32>
    %c3 = arith.constant 3 : index
    %c0_10 = arith.constant 0 : index
    %c0_11 = arith.constant 0 : index
    %12 = vector.load %arg0[%c3, %c0_10, %c0_11] : memref<4x75x392xf32, #tpu.memory_space<vmem>>, vector<1x75x392xf32>
    %13 = vector.shape_cast %12 : vector<1x75x392xf32> to vector<75x392xf32>
    %cst_12 = arith.constant dense<0.000000e+00> : vector<6x392xf32>
    %14 = tpu.matmul %0, %13, %cst_12 {dimension_numbers = #tpu.dot_dimension_numbers<[1], [0], [0], [1], [0, 0, 1, 1], [], []>} : vector<6x75xf32>, vector<75x392xf32>, vector<6x392xf32> -> vector<6x392xf32>
    %15 = arith.maximumf %11, %14 : vector<6x392xf32>
    %c0_13 = arith.constant 0 : index
    %c0_14 = arith.constant 0 : index
    %16 = vector.load %arg2[%c0_13, %c0_14] : memref<6x1xf32, #tpu.memory_space<vmem>>, vector<6x1xf32>
    %17 = vector.broadcast %16 : vector<6x1xf32> to vector<6x392xf32>
    %18 = arith.addf %15, %17 : vector<6x392xf32>
    %cst_15 = arith.constant 0.000000e+00 : f32
    %19 = vector.broadcast %cst_15 : f32 to vector<6x392xf32>
    %20 = arith.cmpf oge, %18, %19 : vector<6x392xf32>
    %cst_16 = arith.constant 0.00999999977 : f32
    %21 = vector.broadcast %cst_16 : f32 to vector<6x392xf32>
    %22 = arith.mulf %21, %18 : vector<6x392xf32>
    %23 = arith.select %20, %18, %22 : vector<6x392xi1>, vector<6x392xf32>
    %c0_17 = arith.constant 0 : index
    %c0_18 = arith.constant 0 : index
    %24 = vector.load %arg3[%c0_17, %c0_18] : memref<6x392xf32, #tpu.memory_space<vmem>>, vector<6x392xf32>
    tpu.vector_store %arg3[%c0_17, %c0_18], %23 {strides = array<i32>} : memref<6x392xf32, #tpu.memory_space<vmem>>, vector<6x392xf32>,
    return
  }
}

module attributes {stable_mosaic.version = 11 : i64} {
  func.func @_conv2_fc_kernel(%arg0: memref<4x2x150x25xf32, #tpu.memory_space<vmem>>, %arg1: memref<16x150xf32, #tpu.memory_space<vmem>>, %arg2: memref<16x1xf32, #tpu.memory_space<vmem>>, %arg3: memref<16x25x256xf32, #tpu.memory_space<vmem>>, %arg4: memref<1x256xf32, #tpu.memory_space<vmem>>, %arg5: memref<256x128xf32, #tpu.memory_space<vmem>>, %arg6: memref<1x128xf32, #tpu.memory_space<vmem>>, %arg7: memref<128x10xf32, #tpu.memory_space<vmem>>, %arg8: memref<1x10xf32, #tpu.memory_space<vmem>>, %arg9: memref<2x10xf32, #tpu.memory_space<vmem>>) attributes {dimension_semantics = [], scalar_prefetch = 0 : i64, scratch_operands = 0 : i64, tpu.core_type = #tpu.core_type<tc>} {
    %c0 = arith.constant 0 : index
    %c0_0 = arith.constant 0 : index
    %0 = vector.load %arg1[%c0, %c0_0] : memref<16x150xf32, #tpu.memory_space<vmem>>, vector<16x150xf32>
    %c0_1 = arith.constant 0 : index
    %c0_2 = arith.constant 0 : index
    %1 = vector.load %arg2[%c0_1, %c0_2] : memref<16x1xf32, #tpu.memory_space<vmem>>, vector<16x1xf32>
    %c0_3 = arith.constant 0 : index
    %c0_4 = arith.constant 0 : index
    %c0_5 = arith.constant 0 : index
    %c0_6 = arith.constant 0 : index
    %2 = vector.load %arg0[%c0_3, %c0_4, %c0_5, %c0_6] : memref<4x2x150x25xf32, #tpu.memory_space<vmem>>, vector<1x1x150x25xf32>
    %3 = vector.shape_cast %2 : vector<1x1x150x25xf32> to vector<150x25xf32>
    %cst = arith.constant dense<0.000000e+00> : vector<16x25xf32>
    %4 = tpu.matmul %0, %3, %cst {dimension_numbers = #tpu.dot_dimension_numbers<[1], [0], [0], [1], [0, 0, 1, 1], [], []>} : vector<16x150xf32>, vector<150x25xf32>, vector<16x25xf32> -> vector<16x25xf32>
    %c1 = arith.constant 1 : index
    %c0_7 = arith.constant 0 : index
    %c0_8 = arith.constant 0 : index
    %c0_9 = arith.constant 0 : index
    %5 = vector.load %arg0[%c1, %c0_7, %c0_8, %c0_9] : memref<4x2x150x25xf32, #tpu.memory_space<vmem>>, vector<1x1x150x25xf32>
    %6 = vector.shape_cast %5 : vector<1x1x150x25xf32> to vector<150x25xf32>
    %cst_10 = arith.constant dense<0.000000e+00> : vector<16x25xf32>
    %7 = tpu.matmul %0, %6, %cst_10 {dimension_numbers = #tpu.dot_dimension_numbers<[1], [0], [0], [1], [0, 0, 1, 1], [], []>} : vector<16x150xf32>, vector<150x25xf32>, vector<16x25xf32> -> vector<16x25xf32>
    %8 = arith.maximumf %4, %7 : vector<16x25xf32>
    %c2 = arith.constant 2 : index
    %c0_11 = arith.constant 0 : index
    %c0_12 = arith.constant 0 : index
    %c0_13 = arith.constant 0 : index
    %9 = vector.load %arg0[%c2, %c0_11, %c0_12, %c0_13] : memref<4x2x150x25xf32, #tpu.memory_space<vmem>>, vector<1x1x150x25xf32>
    %10 = vector.shape_cast %9 : vector<1x1x150x25xf32> to vector<150x25xf32>
    %cst_14 = arith.constant dense<0.000000e+00> : vector<16x25xf32>
    %11 = tpu.matmul %0, %10, %cst_14 {dimension_numbers = #tpu.dot_dimension_numbers<[1], [0], [0], [1], [0, 0, 1, 1], [], []>} : vector<16x150xf32>, vector<150x25xf32>, vector<16x25xf32> -> vector<16x25xf32>
    %12 = arith.maximumf %8, %11 : vector<16x25xf32>
    %c3 = arith.constant 3 : index
    %c0_15 = arith.constant 0 : index
    %c0_16 = arith.constant 0 : index
    %c0_17 = arith.constant 0 : index
    %13 = vector.load %arg0[%c3, %c0_15, %c0_16, %c0_17] : memref<4x2x150x25xf32, #tpu.memory_space<vmem>>, vector<1x1x150x25xf32>
    %14 = vector.shape_cast %13 : vector<1x1x150x25xf32> to vector<150x25xf32>
    %cst_18 = arith.constant dense<0.000000e+00> : vector<16x25xf32>
    %15 = tpu.matmul %0, %14, %cst_18 {dimension_numbers = #tpu.dot_dimension_numbers<[1], [0], [0], [1], [0, 0, 1, 1], [], []>} : vector<16x150xf32>, vector<150x25xf32>, vector<16x25xf32> -> vector<16x25xf32>
    %16 = arith.maximumf %12, %15 : vector<16x25xf32>
    %17 = vector.broadcast %1 : vector<16x1xf32> to vector<16x25xf32>
    %18 = arith.addf %16, %17 : vector<16x25xf32>
    %cst_19 = arith.constant 0.000000e+00 : f32
    %19 = vector.broadcast %cst_19 : f32 to vector<16x25xf32>
    %20 = arith.cmpf oge, %18, %19 : vector<16x25xf32>
    %cst_20 = arith.constant 0.00999999977 : f32
    %21 = vector.broadcast %cst_20 : f32 to vector<16x25xf32>
    %22 = arith.mulf %21, %18 : vector<16x25xf32>
    %23 = arith.select %20, %18, %22 : vector<16x25xi1>, vector<16x25xf32>
    %c0_21 = arith.constant 0 : index
    %c1_22 = arith.constant 1 : index
    %c0_23 = arith.constant 0 : index
    %c0_24 = arith.constant 0 : index
    %24 = vector.load %arg0[%c0_21, %c1_22, %c0_23, %c0_24] : memref<4x2x150x25xf32, #tpu.memory_space<vmem>>, vector<1x1x150x25xf32>
    %25 = vector.shape_cast %24 : vector<1x1x150x25xf32> to vector<150x25xf32>
    %cst_25 = arith.constant dense<0.000000e+00> : vector<16x25xf32>
    %26 = tpu.matmul %0, %25, %cst_25 {dimension_numbers = #tpu.dot_dimension_numbers<[1], [0], [0], [1], [0, 0, 1, 1], [], []>} : vector<16x150xf32>, vector<150x25xf32>, vector<16x25xf32> -> vector<16x25xf32>
    %c1_26 = arith.constant 1 : index
    %c1_27 = arith.constant 1 : index
    %c0_28 = arith.constant 0 : index
    %c0_29 = arith.constant 0 : index
    %27 = vector.load %arg0[%c1_26, %c1_27, %c0_28, %c0_29] : memref<4x2x150x25xf32, #tpu.memory_space<vmem>>, vector<1x1x150x25xf32>
    %28 = vector.shape_cast %27 : vector<1x1x150x25xf32> to vector<150x25xf32>
    %cst_30 = arith.constant dense<0.000000e+00> : vector<16x25xf32>
    %29 = tpu.matmul %0, %28, %cst_30 {dimension_numbers = #tpu.dot_dimension_numbers<[1], [0], [0], [1], [0, 0, 1, 1], [], []>} : vector<16x150xf32>, vector<150x25xf32>, vector<16x25xf32> -> vector<16x25xf32>
    %30 = arith.maximumf %26, %29 : vector<16x25xf32>
    %c2_31 = arith.constant 2 : index
    %c1_32 = arith.constant 1 : index
    %c0_33 = arith.constant 0 : index
    %c0_34 = arith.constant 0 : index
    %31 = vector.load %arg0[%c2_31, %c1_32, %c0_33, %c0_34] : memref<4x2x150x25xf32, #tpu.memory_space<vmem>>, vector<1x1x150x25xf32>
    %32 = vector.shape_cast %31 : vector<1x1x150x25xf32> to vector<150x25xf32>
    %cst_35 = arith.constant dense<0.000000e+00> : vector<16x25xf32>
    %33 = tpu.matmul %0, %32, %cst_35 {dimension_numbers = #tpu.dot_dimension_numbers<[1], [0], [0], [1], [0, 0, 1, 1], [], []>} : vector<16x150xf32>, vector<150x25xf32>, vector<16x25xf32> -> vector<16x25xf32>
    %34 = arith.maximumf %30, %33 : vector<16x25xf32>
    %c3_36 = arith.constant 3 : index
    %c1_37 = arith.constant 1 : index
    %c0_38 = arith.constant 0 : index
    %c0_39 = arith.constant 0 : index
    %35 = vector.load %arg0[%c3_36, %c1_37, %c0_38, %c0_39] : memref<4x2x150x25xf32, #tpu.memory_space<vmem>>, vector<1x1x150x25xf32>
    %36 = vector.shape_cast %35 : vector<1x1x150x25xf32> to vector<150x25xf32>
    %cst_40 = arith.constant dense<0.000000e+00> : vector<16x25xf32>
    %37 = tpu.matmul %0, %36, %cst_40 {dimension_numbers = #tpu.dot_dimension_numbers<[1], [0], [0], [1], [0, 0, 1, 1], [], []>} : vector<16x150xf32>, vector<150x25xf32>, vector<16x25xf32> -> vector<16x25xf32>
    %38 = arith.maximumf %34, %37 : vector<16x25xf32>
    %39 = vector.broadcast %1 : vector<16x1xf32> to vector<16x25xf32>
    %40 = arith.addf %38, %39 : vector<16x25xf32>
    %cst_41 = arith.constant 0.000000e+00 : f32
    %41 = vector.broadcast %cst_41 : f32 to vector<16x25xf32>
    %42 = arith.cmpf oge, %40, %41 : vector<16x25xf32>
    %cst_42 = arith.constant 0.00999999977 : f32
    %43 = vector.broadcast %cst_42 : f32 to vector<16x25xf32>
    %44 = arith.mulf %43, %40 : vector<16x25xf32>
    %45 = arith.select %42, %40, %44 : vector<16x25xi1>, vector<16x25xf32>
    %cst_43 = arith.constant 0.000000e+00 : f32
    %46 = vector.broadcast %cst_43 : f32 to vector<1x256xf32>
    %cst_44 = arith.constant 0.000000e+00 : f32
    %47 = vector.broadcast %cst_44 : f32 to vector<1x256xf32>
    %c0_45 = arith.constant 0 : index
    %c0_46 = arith.constant 0 : index
    %c0_47 = arith.constant 0 : index
    %48 = vector.load %arg3[%c0_45, %c0_46, %c0_47] : memref<16x25x256xf32, #tpu.memory_space<vmem>>, vector<1x25x256xf32>
    %49 = vector.shape_cast %48 : vector<1x25x256xf32> to vector<25x256xf32>
    %50 = vector.extract_strided_slice %23 {offsets = [0, 0], sizes = [1, 25], strides = [1, 1]} : vector<16x25xf32> to vector<1x25xf32>
    %cst_48 = arith.constant dense<0.000000e+00> : vector<1x256xf32>
    %51 = tpu.matmul %50, %49, %cst_48 {dimension_numbers = #tpu.dot_dimension_numbers<[1], [0], [0], [1], [0, 0, 1, 1], [], []>} : vector<1x25xf32>, vector<25x256xf32>, vector<1x256xf32> -> vector<1x256xf32>
    %52 = arith.addf %46, %51 : vector<1x256xf32>
    %53 = vector.extract_strided_slice %45 {offsets = [0, 0], sizes = [1, 25], strides = [1, 1]} : vector<16x25xf32> to vector<1x25xf32>
    %cst_49 = arith.constant dense<0.000000e+00> : vector<1x256xf32>
    %54 = tpu.matmul %53, %49, %cst_49 {dimension_numbers = #tpu.dot_dimension_numbers<[1], [0], [0], [1], [0, 0, 1, 1], [], []>} : vector<1x25xf32>, vector<25x256xf32>, vector<1x256xf32> -> vector<1x256xf32>
    %55 = arith.addf %47, %54 : vector<1x256xf32>
    %c1_50 = arith.constant 1 : index
    %c0_51 = arith.constant 0 : index
    %c0_52 = arith.constant 0 : index
    %56 = vector.load %arg3[%c1_50, %c0_51, %c0_52] : memref<16x25x256xf32, #tpu.memory_space<vmem>>, vector<1x25x256xf32>
    %57 = vector.shape_cast %56 : vector<1x25x256xf32> to vector<25x256xf32>
    %58 = vector.extract_strided_slice %23 {offsets = [1, 0], sizes = [1, 25], strides = [1, 1]} : vector<16x25xf32> to vector<1x25xf32>
    %cst_53 = arith.constant dense<0.000000e+00> : vector<1x256xf32>
    %59 = tpu.matmul %58, %57, %cst_53 {dimension_numbers = #tpu.dot_dimension_numbers<[1], [0], [0], [1], [0, 0, 1, 1], [], []>} : vector<1x25xf32>, vector<25x256xf32>, vector<1x256xf32> -> vector<1x256xf32>
    %60 = arith.addf %52, %59 : vector<1x256xf32>
    %61 = vector.extract_strided_slice %45 {offsets = [1, 0], sizes = [1, 25], strides = [1, 1]} : vector<16x25xf32> to vector<1x25xf32>
    %cst_54 = arith.constant dense<0.000000e+00> : vector<1x256xf32>
    %62 = tpu.matmul %61, %57, %cst_54 {dimension_numbers = #tpu.dot_dimension_numbers<[1], [0], [0], [1], [0, 0, 1, 1], [], []>} : vector<1x25xf32>, vector<25x256xf32>, vector<1x256xf32> -> vector<1x256xf32>
    %63 = arith.addf %55, %62 : vector<1x256xf32>
    %c2_55 = arith.constant 2 : index
    %c0_56 = arith.constant 0 : index
    %c0_57 = arith.constant 0 : index
    %64 = vector.load %arg3[%c2_55, %c0_56, %c0_57] : memref<16x25x256xf32, #tpu.memory_space<vmem>>, vector<1x25x256xf32>
    %65 = vector.shape_cast %64 : vector<1x25x256xf32> to vector<25x256xf32>
    %66 = vector.extract_strided_slice %23 {offsets = [2, 0], sizes = [1, 25], strides = [1, 1]} : vector<16x25xf32> to vector<1x25xf32>
    %cst_58 = arith.constant dense<0.000000e+00> : vector<1x256xf32>
    %67 = tpu.matmul %66, %65, %cst_58 {dimension_numbers = #tpu.dot_dimension_numbers<[1], [0], [0], [1], [0, 0, 1, 1], [], []>} : vector<1x25xf32>, vector<25x256xf32>, vector<1x256xf32> -> vector<1x256xf32>
    %68 = arith.addf %60, %67 : vector<1x256xf32>
    %69 = vector.extract_strided_slice %45 {offsets = [2, 0], sizes = [1, 25], strides = [1, 1]} : vector<16x25xf32> to vector<1x25xf32>
    %cst_59 = arith.constant dense<0.000000e+00> : vector<1x256xf32>
    %70 = tpu.matmul %69, %65, %cst_59 {dimension_numbers = #tpu.dot_dimension_numbers<[1], [0], [0], [1], [0, 0, 1, 1], [], []>} : vector<1x25xf32>, vector<25x256xf32>, vector<1x256xf32> -> vector<1x256xf32>
    %71 = arith.addf %63, %70 : vector<1x256xf32>
    %c3_60 = arith.constant 3 : index
    %c0_61 = arith.constant 0 : index
    %c0_62 = arith.constant 0 : index
    %72 = vector.load %arg3[%c3_60, %c0_61, %c0_62] : memref<16x25x256xf32, #tpu.memory_space<vmem>>, vector<1x25x256xf32>
    %73 = vector.shape_cast %72 : vector<1x25x256xf32> to vector<25x256xf32>
    %74 = vector.extract_strided_slice %23 {offsets = [3, 0], sizes = [1, 25], strides = [1, 1]} : vector<16x25xf32> to vector<1x25xf32>
    %cst_63 = arith.constant dense<0.000000e+00> : vector<1x256xf32>
    %75 = tpu.matmul %74, %73, %cst_63 {dimension_numbers = #tpu.dot_dimension_numbers<[1], [0], [0], [1], [0, 0, 1, 1], [], []>} : vector<1x25xf32>, vector<25x256xf32>, vector<1x256xf32> -> vector<1x256xf32>
    %76 = arith.addf %68, %75 : vector<1x256xf32>
    %77 = vector.extract_strided_slice %45 {offsets = [3, 0], sizes = [1, 25], strides = [1, 1]} : vector<16x25xf32> to vector<1x25xf32>
    %cst_64 = arith.constant dense<0.000000e+00> : vector<1x256xf32>
    %78 = tpu.matmul %77, %73, %cst_64 {dimension_numbers = #tpu.dot_dimension_numbers<[1], [0], [0], [1], [0, 0, 1, 1], [], []>} : vector<1x25xf32>, vector<25x256xf32>, vector<1x256xf32> -> vector<1x256xf32>
    %79 = arith.addf %71, %78 : vector<1x256xf32>
    %c4 = arith.constant 4 : index
    %c0_65 = arith.constant 0 : index
    %c0_66 = arith.constant 0 : index
    %80 = vector.load %arg3[%c4, %c0_65, %c0_66] : memref<16x25x256xf32, #tpu.memory_space<vmem>>, vector<1x25x256xf32>
    %81 = vector.shape_cast %80 : vector<1x25x256xf32> to vector<25x256xf32>
    %82 = vector.extract_strided_slice %23 {offsets = [4, 0], sizes = [1, 25], strides = [1, 1]} : vector<16x25xf32> to vector<1x25xf32>
    %cst_67 = arith.constant dense<0.000000e+00> : vector<1x256xf32>
    %83 = tpu.matmul %82, %81, %cst_67 {dimension_numbers = #tpu.dot_dimension_numbers<[1], [0], [0], [1], [0, 0, 1, 1], [], []>} : vector<1x25xf32>, vector<25x256xf32>, vector<1x256xf32> -> vector<1x256xf32>
    %84 = arith.addf %76, %83 : vector<1x256xf32>
    %85 = vector.extract_strided_slice %45 {offsets = [4, 0], sizes = [1, 25], strides = [1, 1]} : vector<16x25xf32> to vector<1x25xf32>
    %cst_68 = arith.constant dense<0.000000e+00> : vector<1x256xf32>
    %86 = tpu.matmul %85, %81, %cst_68 {dimension_numbers = #tpu.dot_dimension_numbers<[1], [0], [0], [1], [0, 0, 1, 1], [], []>} : vector<1x25xf32>, vector<25x256xf32>, vector<1x256xf32> -> vector<1x256xf32>
    %87 = arith.addf %79, %86 : vector<1x256xf32>
    %c5 = arith.constant 5 : index
    %c0_69 = arith.constant 0 : index
    %c0_70 = arith.constant 0 : index
    %88 = vector.load %arg3[%c5, %c0_69, %c0_70] : memref<16x25x256xf32, #tpu.memory_space<vmem>>, vector<1x25x256xf32>
    %89 = vector.shape_cast %88 : vector<1x25x256xf32> to vector<25x256xf32>
    %90 = vector.extract_strided_slice %23 {offsets = [5, 0], sizes = [1, 25], strides = [1, 1]} : vector<16x25xf32> to vector<1x25xf32>
    %cst_71 = arith.constant dense<0.000000e+00> : vector<1x256xf32>
    %91 = tpu.matmul %90, %89, %cst_71 {dimension_numbers = #tpu.dot_dimension_numbers<[1], [0], [0], [1], [0, 0, 1, 1], [], []>} : vector<1x25xf32>, vector<25x256xf32>, vector<1x256xf32> -> vector<1x256xf32>
    %92 = arith.addf %84, %91 : vector<1x256xf32>
    %93 = vector.extract_strided_slice %45 {offsets = [5, 0], sizes = [1, 25], strides = [1, 1]} : vector<16x25xf32> to vector<1x25xf32>
    %cst_72 = arith.constant dense<0.000000e+00> : vector<1x256xf32>
    %94 = tpu.matmul %93, %89, %cst_72 {dimension_numbers = #tpu.dot_dimension_numbers<[1], [0], [0], [1], [0, 0, 1, 1], [], []>} : vector<1x25xf32>, vector<25x256xf32>, vector<1x256xf32> -> vector<1x256xf32>
    %95 = arith.addf %87, %94 : vector<1x256xf32>
    %c6 = arith.constant 6 : index
    %c0_73 = arith.constant 0 : index
    %c0_74 = arith.constant 0 : index
    %96 = vector.load %arg3[%c6, %c0_73, %c0_74] : memref<16x25x256xf32, #tpu.memory_space<vmem>>, vector<1x25x256xf32>
    %97 = vector.shape_cast %96 : vector<1x25x256xf32> to vector<25x256xf32>
    %98 = vector.extract_strided_slice %23 {offsets = [6, 0], sizes = [1, 25], strides = [1, 1]} : vector<16x25xf32> to vector<1x25xf32>
    %cst_75 = arith.constant dense<0.000000e+00> : vector<1x256xf32>
    %99 = tpu.matmul %98, %97, %cst_75 {dimension_numbers = #tpu.dot_dimension_numbers<[1], [0], [0], [1], [0, 0, 1, 1], [], []>} : vector<1x25xf32>, vector<25x256xf32>, vector<1x256xf32> -> vector<1x256xf32>
    %100 = arith.addf %92, %99 : vector<1x256xf32>
    %101 = vector.extract_strided_slice %45 {offsets = [6, 0], sizes = [1, 25], strides = [1, 1]} : vector<16x25xf32> to vector<1x25xf32>
    %cst_76 = arith.constant dense<0.000000e+00> : vector<1x256xf32>
    %102 = tpu.matmul %101, %97, %cst_76 {dimension_numbers = #tpu.dot_dimension_numbers<[1], [0], [0], [1], [0, 0, 1, 1], [], []>} : vector<1x25xf32>, vector<25x256xf32>, vector<1x256xf32> -> vector<1x256xf32>
    %103 = arith.addf %95, %102 : vector<1x256xf32>
    %c7 = arith.constant 7 : index
    %c0_77 = arith.constant 0 : index
    %c0_78 = arith.constant 0 : index
    %104 = vector.load %arg3[%c7, %c0_77, %c0_78] : memref<16x25x256xf32, #tpu.memory_space<vmem>>, vector<1x25x256xf32>
    %105 = vector.shape_cast %104 : vector<1x25x256xf32> to vector<25x256xf32>
    %106 = vector.extract_strided_slice %23 {offsets = [7, 0], sizes = [1, 25], strides = [1, 1]} : vector<16x25xf32> to vector<1x25xf32>
    %cst_79 = arith.constant dense<0.000000e+00> : vector<1x256xf32>
    %107 = tpu.matmul %106, %105, %cst_79 {dimension_numbers = #tpu.dot_dimension_numbers<[1], [0], [0], [1], [0, 0, 1, 1], [], []>} : vector<1x25xf32>, vector<25x256xf32>, vector<1x256xf32> -> vector<1x256xf32>
    %108 = arith.addf %100, %107 : vector<1x256xf32>
    %109 = vector.extract_strided_slice %45 {offsets = [7, 0], sizes = [1, 25], strides = [1, 1]} : vector<16x25xf32> to vector<1x25xf32>
    %cst_80 = arith.constant dense<0.000000e+00> : vector<1x256xf32>
    %110 = tpu.matmul %109, %105, %cst_80 {dimension_numbers = #tpu.dot_dimension_numbers<[1], [0], [0], [1], [0, 0, 1, 1], [], []>} : vector<1x25xf32>, vector<25x256xf32>, vector<1x256xf32> -> vector<1x256xf32>
    %111 = arith.addf %103, %110 : vector<1x256xf32>
    %c8 = arith.constant 8 : index
    %c0_81 = arith.constant 0 : index
    %c0_82 = arith.constant 0 : index
    %112 = vector.load %arg3[%c8, %c0_81, %c0_82] : memref<16x25x256xf32, #tpu.memory_space<vmem>>, vector<1x25x256xf32>
    %113 = vector.shape_cast %112 : vector<1x25x256xf32> to vector<25x256xf32>
    %114 = vector.extract_strided_slice %23 {offsets = [8, 0], sizes = [1, 25], strides = [1, 1]} : vector<16x25xf32> to vector<1x25xf32>
    %cst_83 = arith.constant dense<0.000000e+00> : vector<1x256xf32>
    %115 = tpu.matmul %114, %113, %cst_83 {dimension_numbers = #tpu.dot_dimension_numbers<[1], [0], [0], [1], [0, 0, 1, 1], [], []>} : vector<1x25xf32>, vector<25x256xf32>, vector<1x256xf32> -> vector<1x256xf32>
    %116 = arith.addf %108, %115 : vector<1x256xf32>
    %117 = vector.extract_strided_slice %45 {offsets = [8, 0], sizes = [1, 25], strides = [1, 1]} : vector<16x25xf32> to vector<1x25xf32>
    %cst_84 = arith.constant dense<0.000000e+00> : vector<1x256xf32>
    %118 = tpu.matmul %117, %113, %cst_84 {dimension_numbers = #tpu.dot_dimension_numbers<[1], [0], [0], [1], [0, 0, 1, 1], [], []>} : vector<1x25xf32>, vector<25x256xf32>, vector<1x256xf32> -> vector<1x256xf32>
    %119 = arith.addf %111, %118 : vector<1x256xf32>
    %c9 = arith.constant 9 : index
    %c0_85 = arith.constant 0 : index
    %c0_86 = arith.constant 0 : index
    %120 = vector.load %arg3[%c9, %c0_85, %c0_86] : memref<16x25x256xf32, #tpu.memory_space<vmem>>, vector<1x25x256xf32>
    %121 = vector.shape_cast %120 : vector<1x25x256xf32> to vector<25x256xf32>
    %122 = vector.extract_strided_slice %23 {offsets = [9, 0], sizes = [1, 25], strides = [1, 1]} : vector<16x25xf32> to vector<1x25xf32>
    %cst_87 = arith.constant dense<0.000000e+00> : vector<1x256xf32>
    %123 = tpu.matmul %122, %121, %cst_87 {dimension_numbers = #tpu.dot_dimension_numbers<[1], [0], [0], [1], [0, 0, 1, 1], [], []>} : vector<1x25xf32>, vector<25x256xf32>, vector<1x256xf32> -> vector<1x256xf32>
    %124 = arith.addf %116, %123 : vector<1x256xf32>
    %125 = vector.extract_strided_slice %45 {offsets = [9, 0], sizes = [1, 25], strides = [1, 1]} : vector<16x25xf32> to vector<1x25xf32>
    %cst_88 = arith.constant dense<0.000000e+00> : vector<1x256xf32>
    %126 = tpu.matmul %125, %121, %cst_88 {dimension_numbers = #tpu.dot_dimension_numbers<[1], [0], [0], [1], [0, 0, 1, 1], [], []>} : vector<1x25xf32>, vector<25x256xf32>, vector<1x256xf32> -> vector<1x256xf32>
    %127 = arith.addf %119, %126 : vector<1x256xf32>
    %c10 = arith.constant 10 : index
    %c0_89 = arith.constant 0 : index
    %c0_90 = arith.constant 0 : index
    %128 = vector.load %arg3[%c10, %c0_89, %c0_90] : memref<16x25x256xf32, #tpu.memory_space<vmem>>, vector<1x25x256xf32>
    %129 = vector.shape_cast %128 : vector<1x25x256xf32> to vector<25x256xf32>
    %130 = vector.extract_strided_slice %23 {offsets = [10, 0], sizes = [1, 25], strides = [1, 1]} : vector<16x25xf32> to vector<1x25xf32>
    %cst_91 = arith.constant dense<0.000000e+00> : vector<1x256xf32>
    %131 = tpu.matmul %130, %129, %cst_91 {dimension_numbers = #tpu.dot_dimension_numbers<[1], [0], [0], [1], [0, 0, 1, 1], [], []>} : vector<1x25xf32>, vector<25x256xf32>, vector<1x256xf32> -> vector<1x256xf32>
    %132 = arith.addf %124, %131 : vector<1x256xf32>
    %133 = vector.extract_strided_slice %45 {offsets = [10, 0], sizes = [1, 25], strides = [1, 1]} : vector<16x25xf32> to vector<1x25xf32>
    %cst_92 = arith.constant dense<0.000000e+00> : vector<1x256xf32>
    %134 = tpu.matmul %133, %129, %cst_92 {dimension_numbers = #tpu.dot_dimension_numbers<[1], [0], [0], [1], [0, 0, 1, 1], [], []>} : vector<1x25xf32>, vector<25x256xf32>, vector<1x256xf32> -> vector<1x256xf32>
    %135 = arith.addf %127, %134 : vector<1x256xf32>
    %c11 = arith.constant 11 : index
    %c0_93 = arith.constant 0 : index
    %c0_94 = arith.constant 0 : index
    %136 = vector.load %arg3[%c11, %c0_93, %c0_94] : memref<16x25x256xf32, #tpu.memory_space<vmem>>, vector<1x25x256xf32>
    %137 = vector.shape_cast %136 : vector<1x25x256xf32> to vector<25x256xf32>
    %138 = vector.extract_strided_slice %23 {offsets = [11, 0], sizes = [1, 25], strides = [1, 1]} : vector<16x25xf32> to vector<1x25xf32>
    %cst_95 = arith.constant dense<0.000000e+00> : vector<1x256xf32>
    %139 = tpu.matmul %138, %137, %cst_95 {dimension_numbers = #tpu.dot_dimension_numbers<[1], [0], [0], [1], [0, 0, 1, 1], [], []>} : vector<1x25xf32>, vector<25x256xf32>, vector<1x256xf32> -> vector<1x256xf32>
    %140 = arith.addf %132, %139 : vector<1x256xf32>
    %141 = vector.extract_strided_slice %45 {offsets = [11, 0], sizes = [1, 25], strides = [1, 1]} : vector<16x25xf32> to vector<1x25xf32>
    %cst_96 = arith.constant dense<0.000000e+00> : vector<1x256xf32>
    %142 = tpu.matmul %141, %137, %cst_96 {dimension_numbers = #tpu.dot_dimension_numbers<[1], [0], [0], [1], [0, 0, 1, 1], [], []>} : vector<1x25xf32>, vector<25x256xf32>, vector<1x256xf32> -> vector<1x256xf32>
    %143 = arith.addf %135, %142 : vector<1x256xf32>
    %c12 = arith.constant 12 : index
    %c0_97 = arith.constant 0 : index
    %c0_98 = arith.constant 0 : index
    %144 = vector.load %arg3[%c12, %c0_97, %c0_98] : memref<16x25x256xf32, #tpu.memory_space<vmem>>, vector<1x25x256xf32>
    %145 = vector.shape_cast %144 : vector<1x25x256xf32> to vector<25x256xf32>
    %146 = vector.extract_strided_slice %23 {offsets = [12, 0], sizes = [1, 25], strides = [1, 1]} : vector<16x25xf32> to vector<1x25xf32>
    %cst_99 = arith.constant dense<0.000000e+00> : vector<1x256xf32>
    %147 = tpu.matmul %146, %145, %cst_99 {dimension_numbers = #tpu.dot_dimension_numbers<[1], [0], [0], [1], [0, 0, 1, 1], [], []>} : vector<1x25xf32>, vector<25x256xf32>, vector<1x256xf32> -> vector<1x256xf32>
    %148 = arith.addf %140, %147 : vector<1x256xf32>
    %149 = vector.extract_strided_slice %45 {offsets = [12, 0], sizes = [1, 25], strides = [1, 1]} : vector<16x25xf32> to vector<1x25xf32>
    %cst_100 = arith.constant dense<0.000000e+00> : vector<1x256xf32>
    %150 = tpu.matmul %149, %145, %cst_100 {dimension_numbers = #tpu.dot_dimension_numbers<[1], [0], [0], [1], [0, 0, 1, 1], [], []>} : vector<1x25xf32>, vector<25x256xf32>, vector<1x256xf32> -> vector<1x256xf32>
    %151 = arith.addf %143, %150 : vector<1x256xf32>
    %c13 = arith.constant 13 : index
    %c0_101 = arith.constant 0 : index
    %c0_102 = arith.constant 0 : index
    %152 = vector.load %arg3[%c13, %c0_101, %c0_102] : memref<16x25x256xf32, #tpu.memory_space<vmem>>, vector<1x25x256xf32>
    %153 = vector.shape_cast %152 : vector<1x25x256xf32> to vector<25x256xf32>
    %154 = vector.extract_strided_slice %23 {offsets = [13, 0], sizes = [1, 25], strides = [1, 1]} : vector<16x25xf32> to vector<1x25xf32>
    %cst_103 = arith.constant dense<0.000000e+00> : vector<1x256xf32>
    %155 = tpu.matmul %154, %153, %cst_103 {dimension_numbers = #tpu.dot_dimension_numbers<[1], [0], [0], [1], [0, 0, 1, 1], [], []>} : vector<1x25xf32>, vector<25x256xf32>, vector<1x256xf32> -> vector<1x256xf32>
    %156 = arith.addf %148, %155 : vector<1x256xf32>
    %157 = vector.extract_strided_slice %45 {offsets = [13, 0], sizes = [1, 25], strides = [1, 1]} : vector<16x25xf32> to vector<1x25xf32>
    %cst_104 = arith.constant dense<0.000000e+00> : vector<1x256xf32>
    %158 = tpu.matmul %157, %153, %cst_104 {dimension_numbers = #tpu.dot_dimension_numbers<[1], [0], [0], [1], [0, 0, 1, 1], [], []>} : vector<1x25xf32>, vector<25x256xf32>, vector<1x256xf32> -> vector<1x256xf32>
    %159 = arith.addf %151, %158 : vector<1x256xf32>
    %c14 = arith.constant 14 : index
    %c0_105 = arith.constant 0 : index
    %c0_106 = arith.constant 0 : index
    %160 = vector.load %arg3[%c14, %c0_105, %c0_106] : memref<16x25x256xf32, #tpu.memory_space<vmem>>, vector<1x25x256xf32>
    %161 = vector.shape_cast %160 : vector<1x25x256xf32> to vector<25x256xf32>
    %162 = vector.extract_strided_slice %23 {offsets = [14, 0], sizes = [1, 25], strides = [1, 1]} : vector<16x25xf32> to vector<1x25xf32>
    %cst_107 = arith.constant dense<0.000000e+00> : vector<1x256xf32>
    %163 = tpu.matmul %162, %161, %cst_107 {dimension_numbers = #tpu.dot_dimension_numbers<[1], [0], [0], [1], [0, 0, 1, 1], [], []>} : vector<1x25xf32>, vector<25x256xf32>, vector<1x256xf32> -> vector<1x256xf32>
    %164 = arith.addf %156, %163 : vector<1x256xf32>
    %165 = vector.extract_strided_slice %45 {offsets = [14, 0], sizes = [1, 25], strides = [1, 1]} : vector<16x25xf32> to vector<1x25xf32>
    %cst_108 = arith.constant dense<0.000000e+00> : vector<1x256xf32>
    %166 = tpu.matmul %165, %161, %cst_108 {dimension_numbers = #tpu.dot_dimension_numbers<[1], [0], [0], [1], [0, 0, 1, 1], [], []>} : vector<1x25xf32>, vector<25x256xf32>, vector<1x256xf32> -> vector<1x256xf32>
    %167 = arith.addf %159, %166 : vector<1x256xf32>
    %c15 = arith.constant 15 : index
    %c0_109 = arith.constant 0 : index
    %c0_110 = arith.constant 0 : index
    %168 = vector.load %arg3[%c15, %c0_109, %c0_110] : memref<16x25x256xf32, #tpu.memory_space<vmem>>, vector<1x25x256xf32>
    %169 = vector.shape_cast %168 : vector<1x25x256xf32> to vector<25x256xf32>
    %170 = vector.extract_strided_slice %23 {offsets = [15, 0], sizes = [1, 25], strides = [1, 1]} : vector<16x25xf32> to vector<1x25xf32>
    %cst_111 = arith.constant dense<0.000000e+00> : vector<1x256xf32>
    %171 = tpu.matmul %170, %169, %cst_111 {dimension_numbers = #tpu.dot_dimension_numbers<[1], [0], [0], [1], [0, 0, 1, 1], [], []>} : vector<1x25xf32>, vector<25x256xf32>, vector<1x256xf32> -> vector<1x256xf32>
    %172 = arith.addf %164, %171 : vector<1x256xf32>
    %173 = vector.extract_strided_slice %45 {offsets = [15, 0], sizes = [1, 25], strides = [1, 1]} : vector<16x25xf32> to vector<1x25xf32>
    %cst_112 = arith.constant dense<0.000000e+00> : vector<1x256xf32>
    %174 = tpu.matmul %173, %169, %cst_112 {dimension_numbers = #tpu.dot_dimension_numbers<[1], [0], [0], [1], [0, 0, 1, 1], [], []>} : vector<1x25xf32>, vector<25x256xf32>, vector<1x256xf32> -> vector<1x256xf32>
    %175 = arith.addf %167, %174 : vector<1x256xf32>
    %c0_113 = arith.constant 0 : index
    %c0_114 = arith.constant 0 : index
    %176 = vector.load %arg4[%c0_113, %c0_114] : memref<1x256xf32, #tpu.memory_space<vmem>>, vector<1x256xf32>
    %c0_115 = arith.constant 0 : index
    %c0_116 = arith.constant 0 : index
    %177 = vector.load %arg5[%c0_115, %c0_116] : memref<256x128xf32, #tpu.memory_space<vmem>>, vector<256x128xf32>
    %c0_117 = arith.constant 0 : index
    %c0_118 = arith.constant 0 : index
    %178 = vector.load %arg6[%c0_117, %c0_118] : memref<1x128xf32, #tpu.memory_space<vmem>>, vector<1x128xf32>
    %c0_119 = arith.constant 0 : index
    %c0_120 = arith.constant 0 : index
    %179 = vector.load %arg7[%c0_119, %c0_120] : memref<128x10xf32, #tpu.memory_space<vmem>>, vector<128x10xf32>
    %c0_121 = arith.constant 0 : index
    %c0_122 = arith.constant 0 : index
    %180 = vector.load %arg8[%c0_121, %c0_122] : memref<1x10xf32, #tpu.memory_space<vmem>>, vector<1x10xf32>
    %181 = arith.addf %172, %176 : vector<1x256xf32>
    %cst_123 = arith.constant 0.000000e+00 : f32
    %182 = vector.broadcast %cst_123 : f32 to vector<1x256xf32>
    %183 = arith.cmpf oge, %181, %182 : vector<1x256xf32>
    %cst_124 = arith.constant 0.00999999977 : f32
    %184 = vector.broadcast %cst_124 : f32 to vector<1x256xf32>
    %185 = arith.mulf %184, %181 : vector<1x256xf32>
    %186 = arith.select %183, %181, %185 : vector<1x256xi1>, vector<1x256xf32>
    %cst_125 = arith.constant dense<0.000000e+00> : vector<1x128xf32>
    %187 = tpu.matmul %186, %177, %cst_125 {dimension_numbers = #tpu.dot_dimension_numbers<[1], [0], [0], [1], [0, 0, 1, 1], [], []>} : vector<1x256xf32>, vector<256x128xf32>, vector<1x128xf32> -> vector<1x128xf32>
    %188 = arith.addf %187, %178 : vector<1x128xf32>
    %cst_126 = arith.constant 0.000000e+00 : f32
    %189 = vector.broadcast %cst_126 : f32 to vector<1x128xf32>
    %190 = arith.cmpf oge, %188, %189 : vector<1x128xf32>
    %cst_127 = arith.constant 0.00999999977 : f32
    %191 = vector.broadcast %cst_127 : f32 to vector<1x128xf32>
    %192 = arith.mulf %191, %188 : vector<1x128xf32>
    %193 = arith.select %190, %188, %192 : vector<1x128xi1>, vector<1x128xf32>
    %cst_128 = arith.constant dense<0.000000e+00> : vector<1x10xf32>
    %194 = tpu.matmul %193, %179, %cst_128 {dimension_numbers = #tpu.dot_dimension_numbers<[1], [0], [0], [1], [0, 0, 1, 1], [], []>} : vector<1x128xf32>, vector<128x10xf32>, vector<1x10xf32> -> vector<1x10xf32>
    %195 = arith.addf %194, %180 : vector<1x10xf32>
    %c0_129 = arith.constant 0 : index
    %c0_130 = arith.constant 0 : index
    %196 = vector.load %arg9[%c0_129, %c0_130] : memref<2x10xf32, #tpu.memory_space<vmem>>, vector<1x10xf32>
    tpu.vector_store %arg9[%c0_129, %c0_130], %195 {strides = array<i32>} : memref<2x10xf32, #tpu.memory_space<vmem>>, vector<1x10xf32>,
    %197 = arith.addf %175, %176 : vector<1x256xf32>
    %cst_131 = arith.constant 0.000000e+00 : f32
    %198 = vector.broadcast %cst_131 : f32 to vector<1x256xf32>
    %199 = arith.cmpf oge, %197, %198 : vector<1x256xf32>
    %cst_132 = arith.constant 0.00999999977 : f32
    %200 = vector.broadcast %cst_132 : f32 to vector<1x256xf32>
    %201 = arith.mulf %200, %197 : vector<1x256xf32>
    %202 = arith.select %199, %197, %201 : vector<1x256xi1>, vector<1x256xf32>
    %cst_133 = arith.constant dense<0.000000e+00> : vector<1x128xf32>
    %203 = tpu.matmul %202, %177, %cst_133 {dimension_numbers = #tpu.dot_dimension_numbers<[1], [0], [0], [1], [0, 0, 1, 1], [], []>} : vector<1x256xf32>, vector<256x128xf32>, vector<1x128xf32> -> vector<1x128xf32>
    %204 = arith.addf %203, %178 : vector<1x128xf32>
    %cst_134 = arith.constant 0.000000e+00 : f32
    %205 = vector.broadcast %cst_134 : f32 to vector<1x128xf32>
    %206 = arith.cmpf oge, %204, %205 : vector<1x128xf32>
    %cst_135 = arith.constant 0.00999999977 : f32
    %207 = vector.broadcast %cst_135 : f32 to vector<1x128xf32>
    %208 = arith.mulf %207, %204 : vector<1x128xf32>
    %209 = arith.select %206, %204, %208 : vector<1x128xi1>, vector<1x128xf32>
    %cst_136 = arith.constant dense<0.000000e+00> : vector<1x10xf32>
    %210 = tpu.matmul %209, %179, %cst_136 {dimension_numbers = #tpu.dot_dimension_numbers<[1], [0], [0], [1], [0, 0, 1, 1], [], []>} : vector<1x128xf32>, vector<128x10xf32>, vector<1x10xf32> -> vector<1x10xf32>
    %211 = arith.addf %210, %180 : vector<1x10xf32>
    %c1_137 = arith.constant 1 : index
    %c0_138 = arith.constant 0 : index
    %212 = vector.load %arg9[%c1_137, %c0_138] : memref<2x10xf32, #tpu.memory_space<vmem>>, vector<1x10xf32>
    tpu.vector_store %arg9[%c1_137, %c0_138], %211 {strides = array<i32>} : memref<2x10xf32, #tpu.memory_space<vmem>>, vector<1x10xf32>,
    return
  }
}

</mosaic_0001>

<bundles_post_ra>
// kernel: ntknet_small_forward.2
= control target key start
LH: loop header
LB: loop body
LE: loop exit
PB: predicated region body
PF: predicated region fallthrough
CT: control target
= control target key end

     0   :  { %v1166_v3 = vmov 0.0   ;;  %v1167_v8 = vmov 0   ;;  %vm59_vm0 = vcmask 1042432   ;;  %vm1168_vm1 = vmmov 1   ;;  %s1749_s0 = inlined_call_operand.vmem [shape: f32[4,75,392], index: 0, kind: input, shape index: {}]   ;;  %s1750_s1 = inlined_call_operand.vmem [shape: f32[6,75], index: 1, kind: input, shape index: {}]   ;;  %s1751_s2 = inlined_call_operand.vmem [shape: f32[6,1], index: 2, kind: input, shape index: {}]   ;;  %s1752_s3 = inlined_call_operand.vmem [shape: f32[6,392], index: 3, kind: output, shape index: {}]  }
   0x1   :  { %v16_v0 = vld [vmem:[%s1749_s0 + $0x8] sm:$0xff]  ;;  %v18_v2 = vld [vmem:[%s1749_s0 + $0x18] sm:$0xff]  ;;  %136 = vmatprep.mubr.f32.mxu0 %v1166_v3  ;;  %207 = vmatprep.mubr.f32.mxu1 %v1166_v3  ;;  %v15_v6 = vld [vmem:[%s1749_s0] sm:$0xff]  ;;  %vm55_vm3 = vcmask 613376   ;;  %vm836_vm7 = vcmask 62464  }
   0x2   :  { %v20_v1 = vld [vmem:[%s1749_s0 + $0x28] sm:$0xff]  ;;  %v22_v5 = vld [vmem:[%s1749_s0 + $0x38] sm:$0xff]  ;;  %v19_v7 = vld [vmem:[%s1749_s0 + $0x20] sm:$0xff]  ;;  %1165 = vset.pattern.permute.xlu0 %v1167_v8 }
   0x3   :  { %v986_v4 = vpack.c.bf16 %v20_v1, %v16_v0  ;;  %v1008_v9 = vpack.c.bf16 %v22_v5, %v18_v2  ;;  %v988_v10 = vpack.c.bf16 %v19_v7, %v15_v6  ;;  %v17_v11 = vld [vmem:[%s1749_s0 + $0x10] sm:$0xff]  ;;  %v24_v13 = vld [vmem:[%s1749_s0 + $0x48] sm:$0xff]  ;;  %v26_v16 = vld [vmem:[%s1749_s0 + $0x58] sm:$0xff] }
   0x4   :  { %v21_v12 = vld [vmem:[%s1749_s0 + $0x30] sm:$0xff]  ;;  %v28_v15 = vld [vmem:[%s1749_s0 + $0x68] sm:$0xff]  ;;  %v30_v17 = vld [vmem:[%s1749_s0 + $0x78] sm:$0xff] }
   0x5   :  { %987 = vmatprep.subr.bf16.mxu0 %v986_v4  ;;  %v1010_v14 = vpack.c.bf16 %v21_v12, %v17_v11  ;;  %1009 = vmatprep.subr.bf16.mxu1 %v1008_v9  ;;  %v990_v18 = vpack.c.bf16 %v28_v15, %v24_v13  ;;  %v1012_v19 = vpack.c.bf16 %v30_v17, %v26_v16  ;;  %v23_v20 = vld [vmem:[%s1749_s0 + $0x40] sm:$0xff]  ;;  %v25_v22 = vld [vmem:[%s1749_s0 + $0x50] sm:$0xff]  ;;  %v32_v25 = vld [vmem:[%s1749_s0 + $0x88] sm:$0xff] }
   0x6   :  { %989 = vmatpush1.bf16.msra.mxu0 %v988_v10  ;;  %v27_v21 = vld [vmem:[%s1749_s0 + $0x60] sm:$0xff]  ;;  %v29_v24 = vld [vmem:[%s1749_s0 + $0x70] sm:$0xff]  ;;  %v36_v26 = vld [vmem:[%s1749_s0 + $0xa8] sm:$0xff] }
   0x7   :  { %1011 = vmatpush1.bf16.msra.mxu1 %v1010_v14  ;;  %v992_v23 = vpack.c.bf16 %v27_v21, %v23_v20  ;;  %991 = vmatprep.subr.bf16.mxu0 %v990_v18  ;;  %v1014_v27 = vpack.c.bf16 %v29_v24, %v25_v22  ;;  %v994_v28 = vpack.c.bf16 %v36_v26, %v32_v25  ;;  %v34_v29 = vld [vmem:[%s1749_s0 + $0x98] sm:$0xff]  ;;  %v31_v31 = vld [vmem:[%s1749_s0 + $0x80] sm:$0xff]  ;;  %v33_v34 = vld [vmem:[%s1749_s0 + $0x90] sm:$0xff] }
   0x8   :  { %1013 = vmatprep.subr.bf16.mxu1 %v1012_v19  ;;  %v38_v30 = vld [vmem:[%s1749_s0 + $0xb8] sm:$0xff]  ;;  %v35_v33 = vld [vmem:[%s1749_s0 + $0xa0] sm:$0xff]  ;;  %v37_v35 = vld [vmem:[%s1749_s0 + $0xb0] sm:$0xff] }
   0x9   :  { %v1016_v32 = vpack.c.bf16 %v38_v30, %v34_v29  ;;  %v996_v36 = vpack.c.bf16 %v35_v33, %v31_v31  ;;  %v40_v37 = vld [vmem:[%s1749_s0 + $0xc8] sm:$0xff]  ;;  %v42_v39 = vld [vmem:[%s1749_s0 + $0xd8] sm:$0xff]  ;;  %v1018_v40 = vpack.c.bf16 %v37_v35, %v33_v34  ;;  %v39_v43 = vld [vmem:[%s1749_s0 + $0xc0] sm:$0xff] }
   0xa   :  { %993 = vmatpush1.bf16.msra.mxu0 %v992_v23  ;;  %v44_v38 = vld [vmem:[%s1749_s0 + $0xe8] sm:$0xff]  ;;  %v46_v42 = vld [vmem:[%s1749_s0 + $0xf8] sm:$0xff]  ;;  %v43_v44 = vld [vmem:[%s1749_s0 + $0xe0] sm:$0xff] }
   0xb   :  { %1015 = vmatpush1.bf16.msra.mxu1 %v1014_v27  ;;  %995 = vmatprep.subr.bf16.mxu0 %v994_v28  ;;  %v998_v41 = vpack.c.bf16 %v44_v38, %v40_v37  ;;  %v1020_v45 = vpack.c.bf16 %v46_v42, %v42_v39  ;;  %v41_v46 = vld [vmem:[%s1749_s0 + $0xd0] sm:$0xff]  ;;  %v48_v48 = vld [vmem:[%s1749_s0 + $0x108] sm:$0xff]  ;;  %v50_v50 = vld [vmem:[%s1749_s0 + $0x118] sm:$0xff]  ;;  %v1000_v51 = vpack.c.bf16 %v43_v44, %v39_v43 }
   0xc   :  { %1017 = vmatprep.subr.bf16.mxu1 %v1016_v32  ;;  %v45_v47 = vld [vmem:[%s1749_s0 + $0xf0] sm:$0xff]  ;;  %v52_v49 = vld [vmem:[%s1749_s0 + $0x128] sm:$0x7]  ;;  %vm1296_vm2 = vmpackc.low %vm59_vm0, %vm1168_vm1 }
   0xd   :  { %v54_v53 = vld [vmem:[%s1749_s0 + $0x138] sm:$0x7]  ;;  %v1022_v54 = vpack.c.bf16 %v45_v47, %v41_v46  ;;  %v1002_v55 = vpack.c.bf16 %v52_v49, %v48_v48  ;;  %v47_v56 = vld [vmem:[%s1749_s0 + $0x100] sm:$0xff]  ;;  %v49_v58 = vld [vmem:[%s1749_s0 + $0x110] sm:$0xff] }
   0xe   :  { %997 = vmatpush1.bf16.msra.mxu0 %v996_v36  ;;  %v51_v57 = vld [vmem:[%s1749_s0 + $0x120] sm:$0x7]  ;;  %v1024_v59 = vpack.c.bf16 %v54_v53, %v50_v50  ;;  %v53_v60 = vld [vmem:[%s1749_s0 + $0x130] sm:$0x7]  ;;  %v849_v61 = vld [vmem:[%s1749_s0 + $0x148] sm:$0xff] }
   0xf   :  { %1019 = vmatpush1.bf16.msra.mxu1 %v1018_v40  ;;  %999 = vmatprep.subr.bf16.mxu0 %v998_v41  ;;  %v853_v62 = vld [vmem:[%s1749_s0 + $0x168] sm:$0xff]  ;;  %v851_v63 = vld [vmem:[%s1749_s0 + $0x158] sm:$0xff]  ;;  %v1005_v1 = vpack.c.bf16 %v51_v57, %v47_v56  ;;  %v1027_v2 = vpack.c.bf16 %v53_v60, %v49_v58  ;;  %v848_v5 = vld [vmem:[%s1749_s0 + $0x140] sm:$0xff] }
  0x10   :  { %1021 = vmatprep.subr.bf16.mxu1 %v1020_v45  ;;  %v855_v0 = vld [vmem:[%s1749_s0 + $0x178] sm:$0xff]  ;;  %v1030_v4 = vpack.c.bf16 %v853_v62, %v849_v61  ;;  %v852_v6 = vld [vmem:[%s1749_s0 + $0x160] sm:$0xff]  ;;  %v850_v7 = vld [vmem:[%s1749_s0 + $0x150] sm:$0xff] }
  0x11   :  { %v1052_v8 = vpack.c.bf16 %v855_v0, %v851_v63  ;;  %v854_v9 = vld [vmem:[%s1749_s0 + $0x170] sm:$0xff]  ;;  %v857_v10 = vld [vmem:[%s1749_s0 + $0x188] sm:$0xff]  ;;  %v859_v12 = vld [vmem:[%s1749_s0 + $0x198] sm:$0xff]  ;;  %v1032_v15 = vpack.c.bf16 %v852_v6, %v848_v5 }
  0x12   :  { %1001 = vmatpush1.bf16.msra.mxu0 %v1000_v51  ;;  %v861_v11 = vld [vmem:[%s1749_s0 + $0x1a8] sm:$0xff]  ;;  %v863_v13 = vld [vmem:[%s1749_s0 + $0x1b8] sm:$0xff]  ;;  %v1360_v14 = vld [vmem:[%s1750_s1] sm:$0x3f]  ;;  %v1054_v16 = vpack.c.bf16 %v854_v9, %v850_v7 }
  0x13   :  { %1023 = vmatpush1.bf16.msra.mxu1 %v1022_v54  ;;  %1004 = vmatprep.subr.msk.bf16.mxu0 %vm1296_vm2, %v1002_v55  ;;  %v1034_v17 = vpack.c.bf16 %v861_v11, %v857_v10  ;;  %v856_v18 = vld [vmem:[%s1749_s0 + $0x180] sm:$0xff]  ;;  %v858_v20 = vld [vmem:[%s1749_s0 + $0x190] sm:$0xff]  ;;  %v1056_v21 = vpack.c.bf16 %v863_v13, %v859_v12  ;;  %v865_v23 = vld [vmem:[%s1749_s0 + $0x1c8] sm:$0xff] }
  0x14   :  { %1026 = vmatprep.subr.msk.bf16.mxu1 %vm1296_vm2, %v1024_v59  ;;  %v860_v19 = vld [vmem:[%s1749_s0 + $0x1a0] sm:$0xff]  ;;  %v862_v22 = vld [vmem:[%s1749_s0 + $0x1b0] sm:$0xff]  ;;  %v869_v24 = vld [vmem:[%s1749_s0 + $0x1e8] sm:$0xff] }
  0x15   :  { %v867_v25 = vld [vmem:[%s1749_s0 + $0x1d8] sm:$0xff]  ;;  %v1036_v27 = vpack.c.bf16 %v860_v19, %v856_v18  ;;  %v1058_v28 = vpack.c.bf16 %v862_v22, %v858_v20  ;;  %v1038_v29 = vpack.c.bf16 %v869_v24, %v865_v23  ;;  %v864_v30 = vld [vmem:[%s1749_s0 + $0x1c0] sm:$0xff]  ;;  %v866_v32 = vld [vmem:[%s1749_s0 + $0x1d0] sm:$0xff] }
  0x16   :  { %1007 = vmatpush1.bf16.msk.msra.mxu0 %vm1296_vm2, %v1005_v1  ;;  %v871_v26 = vld [vmem:[%s1749_s0 + $0x1f8] sm:$0xff]  ;;  %v868_v31 = vld [vmem:[%s1749_s0 + $0x1e0] sm:$0xff]  ;;  %v870_v34 = vld [vmem:[%s1749_s0 + $0x1f0] sm:$0xff] }
  0x17   :  { %1029 = vmatpush1.bf16.msk.msra.mxu1 %vm1296_vm2, %v1027_v2  ;;  %1031 = vmatprep.subr.bf16.mxu0 %v1030_v4  ;;  %v1060_v33 = vpack.c.bf16 %v871_v26, %v867_v25  ;;  %v873_v35 = vld [vmem:[%s1749_s0 + $0x208] sm:$0xff]  ;;  %v875_v37 = vld [vmem:[%s1749_s0 + $0x218] sm:$0xff]  ;;  %v1040_v39 = vpack.c.bf16 %v868_v31, %v864_v30  ;;  %v1062_v40 = vpack.c.bf16 %v870_v34, %v866_v32  ;;  %v872_v42 = vld [vmem:[%s1749_s0 + $0x200] sm:$0xff] }
  0x18   :  { %1053 = vmatprep.subr.bf16.mxu1 %v1052_v8  ;;  %v877_v36 = vld [vmem:[%s1749_s0 + $0x228] sm:$0xff]  ;;  %v879_v38 = vld [vmem:[%s1749_s0 + $0x238] sm:$0xff]  ;;  %v876_v43 = vld [vmem:[%s1749_s0 + $0x220] sm:$0xff] }
  0x19   :  { %844 = vmatmul.mubr.msk.f32.vlgmr.msra.gmra.mrb[0].mxu0 %vm55_vm3, %v1360_v14  ;;  %v1042_v41 = vpack.c.bf16 %v877_v36, %v873_v35  ;;  %v874_v44 = vld [vmem:[%s1749_s0 + $0x210] sm:$0xff]  ;;  %v1064_v45 = vpack.c.bf16 %v879_v38, %v875_v37  ;;  %v881_v47 = vld [vmem:[%s1749_s0 + $0x248] sm:$0xff]  ;;  %v883_v49 = vld [vmem:[%s1749_s0 + $0x258] sm:$0xff]  ;;  %v1044_v51 = vpack.c.bf16 %v876_v43, %v872_v42 }
  0x1a   :  { %847 = vmatmul.mubr.msk.f32.vlgmr.msra.gmra.mrb[0].mxu1 %vm55_vm3, %v1360_v14  ;;  %1033 = vmatpush1.bf16.msra.mxu0 %v1032_v15  ;;  %v878_v46 = vld [vmem:[%s1749_s0 + $0x230] sm:$0xff]  ;;  %v885_v48 = vld [vmem:[%s1749_s0 + $0x268] sm:$0x7]  ;;  %v887_v50 = vld [vmem:[%s1749_s0 + $0x278] sm:$0x7] }
  0x1b   :  { %1055 = vmatpush1.bf16.msra.mxu1 %v1054_v16  ;;  %1035 = vmatprep.subr.bf16.mxu0 %v1034_v17  ;;  %v1066_v53 = vpack.c.bf16 %v878_v46, %v874_v44  ;;  %v1046_v54 = vpack.c.bf16 %v885_v48, %v881_v47  ;;  %v880_v55 = vld [vmem:[%s1749_s0 + $0x240] sm:$0xff]  ;;  %v882_v57 = vld [vmem:[%s1749_s0 + $0x250] sm:$0xff]  ;;  %v1068_v58 = vpack.c.bf16 %v887_v50, %v883_v49  ;;  %v895_v60 = vld [vmem:[%s1749_s0 + $0x288] sm:$0xff] }
  0x1c   :  { %1057 = vmatprep.subr.bf16.mxu1 %v1056_v21  ;;  %331 = vmatprep.mubr.f32.mxu0 %v1166_v3  ;;  %v884_v56 = vld [vmem:[%s1749_s0 + $0x260] sm:$0x7]  ;;  %v886_v59 = vld [vmem:[%s1749_s0 + $0x270] sm:$0x7]  ;;  %v899_v61 = vld [vmem:[%s1749_s0 + $0x2a8] sm:$0xff] }
  0x1d   :  { %402 = vmatprep.mubr.f32.mxu1 %v1166_v3  ;;  %v897_v62 = vld [vmem:[%s1749_s0 + $0x298] sm:$0xff]  ;;  %v1049_v0 = vpack.c.bf16 %v884_v56, %v880_v55  ;;  %v1071_v1 = vpack.c.bf16 %v886_v59, %v882_v57  ;;  %v1074_v2 = vpack.c.bf16 %v899_v61, %v895_v60  ;;  %v894_v4 = vld [vmem:[%s1749_s0 + $0x280] sm:$0xff]  ;;  %v896_v6 = vld [vmem:[%s1749_s0 + $0x290] sm:$0xff] }
  0x1e   :  { %1037 = vmatpush1.bf16.msra.mxu0 %v1036_v27  ;;  %v901_v63 = vld [vmem:[%s1749_s0 + $0x2b8] sm:$0xff]  ;;  %v898_v5 = vld [vmem:[%s1749_s0 + $0x2a0] sm:$0xff]  ;;  %v900_v8 = vld [vmem:[%s1749_s0 + $0x2b0] sm:$0xff] }
  0x1f   :  { %1059 = vmatpush1.bf16.msra.mxu1 %v1058_v28  ;;  %1039 = vmatprep.subr.bf16.mxu0 %v1038_v29  ;;  %v1096_v7 = vpack.c.bf16 %v901_v63, %v897_v62  ;;  %v903_v9 = vld [vmem:[%s1749_s0 + $0x2c8] sm:$0xff]  ;;  %v905_v11 = vld [vmem:[%s1749_s0 + $0x2d8] sm:$0xff]  ;;  %v1076_v13 = vpack.c.bf16 %v898_v5, %v894_v4  ;;  %v1098_v15 = vpack.c.bf16 %v900_v8, %v896_v6  ;;  %v902_v17 = vld [vmem:[%s1749_s0 + $0x2c0] sm:$0xff] }
  0x20   :  { %1061 = vmatprep.subr.bf16.mxu1 %v1060_v33  ;;  %v907_v10 = vld [vmem:[%s1749_s0 + $0x2e8] sm:$0xff]  ;;  %v909_v12 = vld [vmem:[%s1749_s0 + $0x2f8] sm:$0xff]  ;;  %v906_v18 = vld [vmem:[%s1749_s0 + $0x2e0] sm:$0xff] }
  0x21   :  { %v1078_v16 = vpack.c.bf16 %v907_v10, %v903_v9  ;;  %v904_v19 = vld [vmem:[%s1749_s0 + $0x2d0] sm:$0xff]  ;;  %v1100_v20 = vpack.c.bf16 %v909_v12, %v905_v11  ;;  %v911_v22 = vld [vmem:[%s1749_s0 + $0x308] sm:$0xff]  ;;  %v913_v24 = vld [vmem:[%s1749_s0 + $0x318] sm:$0xff]  ;;  %v1080_v26 = vpack.c.bf16 %v906_v18, %v902_v17 }
  0x22   :  { %1041 = vmatpush1.bf16.msra.mxu0 %v1040_v39  ;;  %v908_v21 = vld [vmem:[%s1749_s0 + $0x2f0] sm:$0xff]  ;;  %v915_v23 = vld [vmem:[%s1749_s0 + $0x328] sm:$0xff]  ;;  %v917_v25 = vld [vmem:[%s1749_s0 + $0x338] sm:$0xff] }
  0x23   :  { %1063 = vmatpush1.bf16.msra.mxu1 %v1062_v40  ;;  %1043 = vmatprep.subr.bf16.mxu0 %v1042_v41  ;;  %v1102_v27 = vpack.c.bf16 %v908_v21, %v904_v19  ;;  %v1082_v28 = vpack.c.bf16 %v915_v23, %v911_v22  ;;  %v910_v29 = vld [vmem:[%s1749_s0 + $0x300] sm:$0xff]  ;;  %v912_v31 = vld [vmem:[%s1749_s0 + $0x310] sm:$0xff]  ;;  %v1104_v32 = vpack.c.bf16 %v917_v25, %v913_v24  ;;  %v919_v34 = vld [vmem:[%s1749_s0 + $0x348] sm:$0xff] }
  0x24   :  { %1065 = vmatprep.subr.bf16.mxu1 %v1064_v45  ;;  %v914_v30 = vld [vmem:[%s1749_s0 + $0x320] sm:$0xff]  ;;  %v916_v33 = vld [vmem:[%s1749_s0 + $0x330] sm:$0xff]  ;;  %v923_v35 = vld [vmem:[%s1749_s0 + $0x368] sm:$0xff] }
  0x25   :  { %v921_v36 = vld [vmem:[%s1749_s0 + $0x358] sm:$0xff]  ;;  %v1084_v38 = vpack.c.bf16 %v914_v30, %v910_v29  ;;  %v1106_v39 = vpack.c.bf16 %v916_v33, %v912_v31  ;;  %v1086_v40 = vpack.c.bf16 %v923_v35, %v919_v34  ;;  %v918_v41 = vld [vmem:[%s1749_s0 + $0x340] sm:$0xff]  ;;  %v920_v43 = vld [vmem:[%s1749_s0 + $0x350] sm:$0xff] }
  0x26   :  { %1045 = vmatpush1.bf16.msra.mxu0 %v1044_v51  ;;  %v925_v37 = vld [vmem:[%s1749_s0 + $0x378] sm:$0xff]  ;;  %v922_v42 = vld [vmem:[%s1749_s0 + $0x360] sm:$0xff]  ;;  %v924_v45 = vld [vmem:[%s1749_s0 + $0x370] sm:$0xff] }
  0x27   :  { %1067 = vmatpush1.bf16.msra.mxu1 %v1066_v53  ;;  %1048 = vmatprep.subr.msk.bf16.mxu0 %vm1296_vm2, %v1046_v54  ;;  %v1108_v44 = vpack.c.bf16 %v925_v37, %v921_v36  ;;  %v927_v46 = vld [vmem:[%s1749_s0 + $0x388] sm:$0xff]  ;;  %v929_v48 = vld [vmem:[%s1749_s0 + $0x398] sm:$0xff]  ;;  %v1088_v50 = vpack.c.bf16 %v922_v42, %v918_v41  ;;  %v926_v51 = vld [vmem:[%s1749_s0 + $0x380] sm:$0xff]  ;;  %v1110_v53 = vpack.c.bf16 %v924_v45, %v920_v43 }
  0x28   :  { %1070 = vmatprep.subr.msk.bf16.mxu1 %vm1296_vm2, %v1068_v58  ;;  %v931_v47 = vld [vmem:[%s1749_s0 + $0x3a8] sm:$0x7]  ;;  %v933_v49 = vld [vmem:[%s1749_s0 + $0x3b8] sm:$0x7]  ;;  %v930_v55 = vld [vmem:[%s1749_s0 + $0x3a0] sm:$0x7] }
  0x29   :  { %v1090_v54 = vpack.c.bf16 %v931_v47, %v927_v46  ;;  %v928_v56 = vld [vmem:[%s1749_s0 + $0x390] sm:$0xff]  ;;  %v1112_v58 = vpack.c.bf16 %v933_v49, %v929_v48  ;;  %v941_v59 = vld [vmem:[%s1749_s0 + $0x3c8] sm:$0xff]  ;;  %v811_v61 = vld [vmem:[%s1751_s2] sm:$0x3f] }
  0x2a   :  { %1051 = vmatpush1.bf16.msk.msra.mxu0 %vm1296_vm2, %v1049_v0  ;;  %v932_v57 = vld [vmem:[%s1749_s0 + $0x3b0] sm:$0x7]  ;;  %v945_v60 = vld [vmem:[%s1749_s0 + $0x3e8] sm:$0xff]  ;;  %v943_v62 = vld [vmem:[%s1749_s0 + $0x3d8] sm:$0xff]  ;;  %814 = vperm.xlu0 %1165, %v811_v61   ;;  %v1093_v0 = vpack.c.bf16 %v930_v55, %v926_v51 }
  0x2b   :  { %1073 = vmatpush1.bf16.msk.msra.mxu1 %vm1296_vm2, %v1071_v1  ;;  %1075 = vmatprep.subr.bf16.mxu0 %v1074_v2  ;;  %v947_v63 = vld [vmem:[%s1749_s0 + $0x3f8] sm:$0xff]  ;;  %v1115_v1 = vpack.c.bf16 %v932_v57, %v928_v56  ;;  %v1118_v2 = vpack.c.bf16 %v945_v60, %v941_v59  ;;  %v940_v4 = vld [vmem:[%s1749_s0 + $0x3c0] sm:$0xff]  ;;  %v942_v6 = vld [vmem:[%s1749_s0 + $0x3d0] sm:$0xff] }
  0x2c   :  { %1097 = vmatprep.subr.bf16.mxu1 %v1096_v7  ;;  %v944_v5 = vld [vmem:[%s1749_s0 + $0x3e0] sm:$0xff]  ;;  %v1140_v7 = vpack.c.bf16 %v947_v63, %v943_v62  ;;  %v946_v8 = vld [vmem:[%s1749_s0 + $0x3f0] sm:$0xff]  ;;  %v949_v9 = vld [vmem:[%s1749_s0 + $0x408] sm:$0xff] }
  0x2d   :  { %890 = vmatmul.mubr.msk.f32.vlgmr.msra.gmra.mrb[2].mxu0 %vm55_vm3, %v1360_v14  ;;  %v953_v10 = vld [vmem:[%s1749_s0 + $0x428] sm:$0xff]  ;;  %v951_v11 = vld [vmem:[%s1749_s0 + $0x418] sm:$0xff]  ;;  %v948_v17 = vld [vmem:[%s1749_s0 + $0x400] sm:$0xff] }
  0x2e   :  { %893 = vmatmul.mubr.msk.f32.vlgmr.msra.gmra.mrb[2].mxu1 %vm55_vm3, %v1360_v14  ;;  %1077 = vmatpush1.bf16.msra.mxu0 %v1076_v13  ;;  %v955_v12 = vld [vmem:[%s1749_s0 + $0x438] sm:$0xff]  ;;  %v1120_v13 = vpack.c.bf16 %v944_v5, %v940_v4  ;;  %v952_v18 = vld [vmem:[%s1749_s0 + $0x420] sm:$0xff]  ;;  %v950_v19 = vld [vmem:[%s1749_s0 + $0x410] sm:$0xff] }
  0x2f   :  { %1099 = vmatpush1.bf16.msra.mxu1 %v1098_v15  ;;  %1079 = vmatprep.subr.bf16.mxu0 %v1078_v16  ;;  %v1142_v15 = vpack.c.bf16 %v946_v8, %v942_v6  ;;  %v1122_v16 = vpack.c.bf16 %v953_v10, %v949_v9  ;;  %v954_v21 = vld [vmem:[%s1749_s0 + $0x430] sm:$0xff]  ;;  %v957_v22 = vld [vmem:[%s1749_s0 + $0x448] sm:$0xff]  ;;  %v959_v24 = vld [vmem:[%s1749_s0 + $0x458] sm:$0xff] }
  0x30   :  { %1101 = vmatprep.subr.bf16.mxu1 %v1100_v20  ;;  %530 = vmatprep.mubr.f32.mxu0 %v1166_v3  ;;  %v1144_v20 = vpack.c.bf16 %v955_v12, %v951_v11  ;;  %v961_v23 = vld [vmem:[%s1749_s0 + $0x468] sm:$0xff]  ;;  %v963_v25 = vld [vmem:[%s1749_s0 + $0x478] sm:$0xff]  ;;  %v956_v29 = vld [vmem:[%s1749_s0 + $0x440] sm:$0xff] }
  0x31   :  { %601 = vmatprep.mubr.f32.mxu1 %v1166_v3  ;;  %v960_v30 = vld [vmem:[%s1749_s0 + $0x460] sm:$0xff]  ;;  %v958_v31 = vld [vmem:[%s1749_s0 + $0x450] sm:$0xff]  ;;  %v965_v34 = vld [vmem:[%s1749_s0 + $0x488] sm:$0xff] }
  0x32   :  { %1081 = vmatpush1.bf16.msra.mxu0 %v1080_v26  ;;  %v1124_v26 = vpack.c.bf16 %v952_v18, %v948_v17  ;;  %v962_v33 = vld [vmem:[%s1749_s0 + $0x470] sm:$0xff]  ;;  %v969_v35 = vld [vmem:[%s1749_s0 + $0x4a8] sm:$0xff]  ;;  %v967_v36 = vld [vmem:[%s1749_s0 + $0x498] sm:$0xff] }
  0x33   :  { %1103 = vmatpush1.bf16.msra.mxu1 %v1102_v27  ;;  %1083 = vmatprep.subr.bf16.mxu0 %v1082_v28  ;;  %v1146_v27 = vpack.c.bf16 %v954_v21, %v950_v19  ;;  %v1126_v28 = vpack.c.bf16 %v961_v23, %v957_v22  ;;  %v971_v37 = vld [vmem:[%s1749_s0 + $0x4b8] sm:$0xff]  ;;  %v964_v41 = vld [vmem:[%s1749_s0 + $0x480] sm:$0xff]  ;;  %v966_v43 = vld [vmem:[%s1749_s0 + $0x490] sm:$0xff] }
  0x34   :  { %1105 = vmatprep.subr.bf16.mxu1 %v1104_v32  ;;  %v1148_v32 = vpack.c.bf16 %v963_v25, %v959_v24  ;;  %v968_v42 = vld [vmem:[%s1749_s0 + $0x4a0] sm:$0xff]  ;;  %v973_v45 = vld [vmem:[%s1749_s0 + $0x4c8] sm:$0xff]  ;;  %v975_v47 = vld [vmem:[%s1749_s0 + $0x4d8] sm:$0xff] }
  0x35   :  { %v977_v46 = vld [vmem:[%s1749_s0 + $0x4e8] sm:$0x7]  ;;  %v979_v48 = vld [vmem:[%s1749_s0 + $0x4f8] sm:$0x7]  ;;  %v1132_v49 = vpack.c.bf16 %v968_v42, %v964_v41  ;;  %v974_v56 = vld [vmem:[%s1749_s0 + $0x4d0] sm:$0xff] }
  0x36   :  { %1085 = vmatpush1.bf16.msra.mxu0 %v1084_v38  ;;  %v1128_v38 = vpack.c.bf16 %v960_v30, %v956_v29  ;;  %v1134_v51 = vpack.c.bf16 %v977_v46, %v973_v45  ;;  %v1156_v55 = vpack.c.bf16 %v979_v48, %v975_v47  ;;  %v978_v57 = vld [vmem:[%s1749_s0 + $0x4f0] sm:$0x7] }
  0x37   :  { %1107 = vmatpush1.bf16.msra.mxu1 %v1106_v39  ;;  %1087 = vmatprep.subr.bf16.mxu0 %v1086_v40  ;;  %v1150_v39 = vpack.c.bf16 %v962_v33, %v958_v31  ;;  %v1130_v40 = vpack.c.bf16 %v969_v35, %v965_v34  ;;  %v1159_v59 = vpack.c.bf16 %v978_v57, %v974_v56 }
  0x38   :  { %1109 = vmatprep.subr.bf16.mxu1 %v1108_v44  ;;  %v970_v44 = vld [vmem:[%s1749_s0 + $0x4b0] sm:$0xff] }
  0x3a   :  { %1089 = vmatpush1.bf16.msra.mxu0 %v1088_v50  ;;  %v1154_v50 = vpack.c.bf16 %v970_v44, %v966_v43 }
  0x3b   :  { %1111 = vmatpush1.bf16.msra.mxu1 %v1110_v53  ;;  %1092 = vmatprep.subr.msk.bf16.mxu0 %vm1296_vm2, %v1090_v54  ;;  %v972_v53 = vld [vmem:[%s1749_s0 + $0x4c0] sm:$0xff] }
  0x3c   :  { %1114 = vmatprep.subr.msk.bf16.mxu1 %vm1296_vm2, %v1112_v58  ;;  %v976_v54 = vld [vmem:[%s1749_s0 + $0x4e0] sm:$0x7] }
  0x3d   :  { %v1137_v58 = vpack.c.bf16 %v976_v54, %v972_v53 }
  0x3e   :  { %1095 = vmatpush1.bf16.msk.msra.mxu0 %vm1296_vm2, %v1093_v0 }
  0x3f   :  { %1117 = vmatpush1.bf16.msk.msra.mxu1 %vm1296_vm2, %v1115_v1  ;;  %1119 = vmatprep.subr.bf16.mxu0 %v1118_v2 }
  0x40   :  { %1141 = vmatprep.subr.bf16.mxu1 %v1140_v7 }
  0x41   :  { %936 = vmatmul.mubr.msk.f32.vlgmr.msra.gmra.mrb[4].mxu0 %vm55_vm3, %v1360_v14 }
  0x42   :  { %939 = vmatmul.mubr.msk.f32.vlgmr.msra.gmra.mrb[4].mxu1 %vm55_vm3, %v1360_v14  ;;  %1121 = vmatpush1.bf16.msra.mxu0 %v1120_v13 }
  0x43   :  { %1143 = vmatpush1.bf16.msra.mxu1 %v1142_v15  ;;  %1123 = vmatprep.subr.bf16.mxu0 %v1122_v16 }
  0x44   :  { %1145 = vmatprep.subr.bf16.mxu1 %v1144_v20  ;;  %729 = vmatprep.mubr.f32.mxu0 %v1166_v3 }
  0x45   :  { %800 = vmatprep.mubr.f32.mxu1 %v1166_v3  ;;  %v1152_v3 = vpack.c.bf16 %v971_v37, %v967_v36 }
  0x46   :  { %1125 = vmatpush1.bf16.msra.mxu0 %v1124_v26 }
  0x47   :  { %1147 = vmatpush1.bf16.msra.mxu1 %v1146_v27  ;;  %1127 = vmatprep.subr.bf16.mxu0 %v1126_v28 }
  0x48   :  { %1149 = vmatprep.subr.bf16.mxu1 %v1148_v32 }
  0x4a   :  { %1129 = vmatpush1.bf16.msra.mxu0 %v1128_v38 }
  0x4b   :  { %1151 = vmatpush1.bf16.msra.mxu1 %v1150_v39  ;;  %1131 = vmatprep.subr.bf16.mxu0 %v1130_v40 }
  0x4c   :  { %1153 = vmatprep.subr.bf16.mxu1 %v1152_v3 }
  0x4e   :  { %1133 = vmatpush1.bf16.msra.mxu0 %v1132_v49 }
  0x4f   :  { %1155 = vmatpush1.bf16.msra.mxu1 %v1154_v50  ;;  %1136 = vmatprep.subr.msk.bf16.mxu0 %vm1296_vm2, %v1134_v51 }
  0x50   :  { %1158 = vmatprep.subr.msk.bf16.mxu1 %vm1296_vm2, %v1156_v55 }
  0x52   :  { %1139 = vmatpush1.bf16.msk.msra.mxu0 %vm1296_vm2, %v1137_v58 }
  0x53   :  { %1161 = vmatpush1.bf16.msk.msra.mxu1 %vm1296_vm2, %v1159_v59 }
  0x55   :  { %982 = vmatmul.mubr.msk.f32.vlgmr.msra.gmra.mrb[6].mxu0 %vm55_vm3, %v1360_v14 }
  0x56   :  { %985 = vmatmul.mubr.msk.f32.vlgmr.msra.gmra.mrb[6].mxu1 %vm55_vm3, %v1360_v14 }
  0xa9   :  { %v815_v17 = vpop.permute.xlu0 %814 }
  0xec   :  { %v138_v60 = vpop.f32.mrb[0].mxu0 }
  0xed   :  { %v209_v61 = vpop.f32.mrb[0].mxu1  ;;  %v140_v62 = vpop.f32.mrb[1].mxu0 }
  0xee   :  { %v211_v63 = vpop.f32.mrb[1].mxu1 }
 0x100   :  { %v333_v0 = vpop.f32.mrb[2].mxu0 }
 0x101   :  { %v409_v1 = vmax.f32 %v138_v60, %v333_v0  ;;  %v404_v2 = vpop.f32.mrb[2].mxu1  ;;  %v335_v4 = vpop.f32.mrb[3].mxu0 }
 0x102   :  { %v411_v5 = vmax.f32 %v209_v61, %v404_v2  ;;  %v410_v6 = vmax.f32 %v140_v62, %v335_v4  ;;  %v406_v7 = vpop.f32.mrb[3].mxu1 }
 0x103   :  { %v412_v8 = vmax.f32 %v211_v63, %v406_v7 }
 0x114   :  { %v532_v52 = vpop.f32.mrb[4].mxu0 }
 0x115   :  { %v608_v9 = vmax.f32 %v409_v1, %v532_v52  ;;  %v603_v10 = vpop.f32.mrb[4].mxu1  ;;  %v534_v11 = vpop.f32.mrb[5].mxu0 }
 0x116   :  { %v610_v12 = vmax.f32 %v411_v5, %v603_v10  ;;  %v609_v13 = vmax.f32 %v410_v6, %v534_v11  ;;  %v605_v15 = vpop.f32.mrb[5].mxu1 }
 0x117   :  { %v611_v14 = vmax.f32 %v412_v8, %v605_v15 }
 0x128   :  { %v731_v16 = vpop.f32.mrb[6].mxu0 }
 0x129   :  { %v807_v18 = vmax.f32 %v608_v9, %v731_v16  ;;  %v802_v19 = vpop.f32.mrb[6].mxu1  ;;  %v733_v20 = vpop.f32.mrb[7].mxu0 }
 0x12a   :  { %v809_v21 = vmax.f32 %v610_v12, %v802_v19  ;;  %v808_v22 = vmax.f32 %v609_v13, %v733_v20  ;;  %v804_v23 = vpop.f32.mrb[7].mxu1 }
 0x12b   :  { %v810_v24 = vmax.f32 %v611_v14, %v804_v23  ;;  %v817_v25 = vadd.f32 %v815_v17, %v807_v18 }
 0x12c   :  { %v818_v26 = vadd.f32 %v815_v17, %v808_v22  ;;  %v819_v27 = vadd.f32 %v815_v17, %v809_v21 }
 0x12d   :  { %v820_v28 = vadd.f32 %v815_v17, %v810_v24  ;;  %vm821_vm4 = vcmp.ge.f32.partialorder %v817_v25, 0.0  ;;  %v825_v29 = vmul.f32 0.01, %v817_v25 }
 0x12e   :  { %vm822_vm5 = vcmp.ge.f32.partialorder %v818_v26, 0.0  ;;  %vm823_vm6 = vcmp.ge.f32.partialorder %v819_v27, 0.0  ;;  %v826_v30 = vmul.f32 0.01, %v818_v26  ;;  %v827_v31 = vmul.f32 0.01, %v819_v27 }
 0x12f   :  { %vm824_vm8 = vcmp.ge.f32.partialorder %v820_v28, 0.0  ;;  %v828_v32 = vmul.f32 0.01, %v820_v28  ;;  %v829_v33 = vsel %vm821_vm4, %v817_v25, %v825_v29 }
 0x130   :  { %v830_v34 = vsel %vm822_vm5, %v818_v26, %v826_v30  ;;  %v831_v35 = vsel %vm823_vm6, %v819_v27, %v827_v31  ;;  %833 = vst [vmem:[%s1752_s3] sm:$0x3f] %v829_v33 }
 0x131   :  { %v832_v36 = vsel %vm824_vm8, %v820_v28, %v828_v32  ;;  %834 = vst [vmem:[%s1752_s3 + $0x8] sm:$0x3f] %v830_v34  ;;  %835 = vst [vmem:[%s1752_s3 + $0x10] sm:$0x3f] %v831_v35 }
 0x132   :  { %837 = vst.msk [vmem:[%s1752_s3 + $0x18] sm:$0x3f] %vm836_vm7, %v832_v36 }

// kernel: ntknet_small_forward.3
= control target key start
LH: loop header
LB: loop body
LE: loop exit
PB: predicated region body
PF: predicated region fallthrough
CT: control target
= control target key end

     0   :  { %v5200_v3 = vmov 0.0|0.0   ;;  %vm58_vm0 = vcmask 179200   ;;  %v5201_v58 = vmov 0   ;;  %v5202_v59 = vmov 0.0   ;;  %s7035_s0 = inlined_call_operand.vmem [shape: f32[4,2,150,25], index: 0, kind: input, shape index: {}]   ;;  %s7036_s1 = inlined_call_operand.vmem [shape: f32[16,150], index: 1, kind: input, shape index: {}]   ;;  %s7037_s2 = inlined_call_operand.vmem [shape: f32[16,1], index: 2, kind: input, shape index: {}]   ;;  %s7038_s3 = inlined_call_operand.vmem [shape: f32[16,25,256], index: 3, kind: input, shape index: {}]   ;;  %s7039_s4 = inlined_call_operand.vmem [shape: f32[1,256], index: 4, kind: input, shape index: {}]   ;;  %s7040_s5 = inlined_call_operand.vmem [shape: f32[256,128], index: 5, kind: input, shape index: {}]   ;;  %s7041_s6 = inlined_call_operand.vmem [shape: f32[1,128], index: 6, kind: input, shape index: {}]   ;;  %s7042_s7 = inlined_call_operand.vmem [shape: f32[128,10], index: 7, kind: input, shape index: {}]   ;;  %s7043_s8 = inlined_call_operand.vmem [shape: f32[1,10], index: 8, kind: input, shape index: {}]   ;;  %s7044_s9 = inlined_call_operand.hbm [shape: f32[2,10], index: 9, kind: output, shape index: {}]  }
   0x1   :  { %v39_v0 = vld [vmem:[%s7035_s0] sm:$0xff]  ;;  %v40_v1 = vld [vmem:[%s7035_s0 + $0x8] sm:$0xff]  ;;  %v3917_v2 = vld [vmem:[%s7035_s0 + $0x130] sm:$0xff]  ;;  %4461 = vmatprep.subr.bf16.mxu0 %v5200_v3  ;;  %4488 = vmatprep.subr.bf16.mxu1 %v5200_v3  ;;  %vm65_vm1 = vcmask 1045504  }
   0x2   :  { %v4462_v4 = vpack.c.bf16 %v40_v1, %v39_v0  ;;  %v3918_v5 = vld [vmem:[%s7035_s0 + $0x138] sm:$0xff]  ;;  %v41_v6 = vld [vmem:[%s7035_s0 + $0x10] sm:$0xff]  ;;  %v3919_v9 = vld [vmem:[%s7035_s0 + $0x140] sm:$0xff]  ;;  %5175 = vset.pattern.permute.xlu0 %v5201_v58 }
   0x3   :  { %v42_v7 = vld [vmem:[%s7035_s0 + $0x18] sm:$0xff]  ;;  %v4489_v8 = vpack.c.bf16 %v3918_v5, %v3917_v2  ;;  %v3920_v10 = vld [vmem:[%s7035_s0 + $0x148] sm:$0xff]  ;;  %v43_v13 = vld [vmem:[%s7035_s0 + $0x20] sm:$0xff] }
   0x4   :  { %4463 = vmatpush1.bf16.msra.mxu0 %v4462_v4  ;;  %v4465_v11 = vpack.c.bf16 %v42_v7, %v41_v6  ;;  %v4492_v12 = vpack.c.bf16 %v3920_v10, %v3919_v9  ;;  %v44_v14 = vld [vmem:[%s7035_s0 + $0x28] sm:$0xff]  ;;  %v3921_v15 = vld [vmem:[%s7035_s0 + $0x150] sm:$0xff]  ;;  %v3922_v16 = vld [vmem:[%s7035_s0 + $0x158] sm:$0xff] }
   0x5   :  { %4490 = vmatpush1.bf16.msra.mxu1 %v4489_v8  ;;  %4464 = vmatprep.subr.bf16.mxu0 %v5200_v3  ;;  %v4468_v17 = vpack.c.bf16 %v44_v14, %v43_v13  ;;  %v4495_v18 = vpack.c.bf16 %v3922_v16, %v3921_v15  ;;  %v45_v19 = vld [vmem:[%s7035_s0 + $0x30] sm:$0xff]  ;;  %v46_v20 = vld [vmem:[%s7035_s0 + $0x38] sm:$0xff]  ;;  %v3923_v21 = vld [vmem:[%s7035_s0 + $0x160] sm:$0xff] }
   0x6   :  { %4491 = vmatprep.subr.bf16.mxu1 %v5200_v3  ;;  %v3924_v22 = vld [vmem:[%s7035_s0 + $0x168] sm:$0xff]  ;;  %v4471_v23 = vpack.c.bf16 %v46_v20, %v45_v19  ;;  %v47_v25 = vld [vmem:[%s7035_s0 + $0x40] sm:$0xff]  ;;  %v3925_v28 = vld [vmem:[%s7035_s0 + $0x170] sm:$0xff] }
   0x7   :  { %v4498_v24 = vpack.c.bf16 %v3924_v22, %v3923_v21  ;;  %v48_v26 = vld [vmem:[%s7035_s0 + $0x48] sm:$0xff]  ;;  %v3926_v29 = vld [vmem:[%s7035_s0 + $0x178] sm:$0xff]  ;;  %v49_v32 = vld [vmem:[%s7035_s0 + $0x50] sm:$0xff] }
   0x8   :  { %4466 = vmatpush1.bf16.msra.mxu0 %v4465_v11  ;;  %v5320_v27 = vld [vmem:[%s7036_s1 + $0x8] sm:$0xff]  ;;  %v4474_v30 = vpack.c.bf16 %v48_v26, %v47_v25  ;;  %v4501_v31 = vpack.c.bf16 %v3926_v29, %v3925_v28  ;;  %v50_v33 = vld [vmem:[%s7035_s0 + $0x58] sm:$0xff]  ;;  %v3927_v34 = vld [vmem:[%s7035_s0 + $0x180] sm:$0xff] }
   0x9   :  { %4493 = vmatpush1.bf16.msra.mxu1 %v4492_v12  ;;  %4467 = vmatprep.subr.bf16.mxu0 %v5200_v3  ;;  %v3928_v35 = vld [vmem:[%s7035_s0 + $0x188] sm:$0xff]  ;;  %v4477_v36 = vpack.c.bf16 %v50_v33, %v49_v32  ;;  %v51_v38 = vld [vmem:[%s7035_s0 + $0x60] sm:$0xff]  ;;  %v3929_v40 = vld [vmem:[%s7035_s0 + $0x190] sm:$0xff] }
   0xa   :  { %4494 = vmatprep.subr.bf16.mxu1 %v5200_v3  ;;  %3915 = vmatprep.mubr.msk.f32.mxu0 %vm58_vm0, %v5320_v27  ;;  %v4504_v37 = vpack.c.bf16 %v3928_v35, %v3927_v34  ;;  %v52_v39 = vld [vmem:[%s7035_s0 + $0x68] sm:$0xff]  ;;  %v3930_v41 = vld [vmem:[%s7035_s0 + $0x198] sm:$0xff]  ;;  %v53_v44 = vld [vmem:[%s7035_s0 + $0x70] sm:$0xff] }
   0xb   :  { %3937 = vmatprep.mubr.msk.f32.mxu1 %vm58_vm0, %v5320_v27  ;;  %v4480_v42 = vpack.c.bf16 %v52_v39, %v51_v38  ;;  %v4507_v43 = vpack.c.bf16 %v3930_v41, %v3929_v40  ;;  %v54_v45 = vld [vmem:[%s7035_s0 + $0x78] sm:$0xff]  ;;  %v3931_v46 = vld [vmem:[%s7035_s0 + $0x1a0] sm:$0xff]  ;;  %v3932_v47 = vld [vmem:[%s7035_s0 + $0x1a8] sm:$0xff] }
   0xc   :  { %4469 = vmatpush1.bf16.msra.mxu0 %v4468_v17  ;;  %v4483_v48 = vpack.c.bf16 %v54_v45, %v53_v44  ;;  %v4510_v49 = vpack.c.bf16 %v3932_v47, %v3931_v46  ;;  %v55_v50 = vld [vmem:[%s7035_s0 + $0x80] sm:$0xff]  ;;  %v56_v51 = vld [vmem:[%s7035_s0 + $0x88] sm:$0xff]  ;;  %v3933_v52 = vld [vmem:[%s7035_s0 + $0x1b0] sm:$0xff] }
   0xd   :  { %4496 = vmatpush1.bf16.msra.mxu1 %v4495_v18  ;;  %4470 = vmatprep.subr.bf16.mxu0 %v5200_v3  ;;  %v3934_v53 = vld [vmem:[%s7035_s0 + $0x1b8] sm:$0xff]  ;;  %v4486_v54 = vpack.c.bf16 %v56_v51, %v55_v50  ;;  %v3939_v56 = vld [vmem:[%s7035_s0 + $0x260] sm:$0xff]  ;;  %v3940_v57 = vld [vmem:[%s7035_s0 + $0x268] sm:$0xff] }
   0xe   :  { %4497 = vmatprep.subr.bf16.mxu1 %v5200_v3  ;;  %v4513_v55 = vpack.c.bf16 %v3934_v53, %v3933_v52  ;;  %v57_v60 = vld [vmem:[%s7035_s0 + $0x90] sm:$0x3f]  ;;  %v3962_v62 = vld [vmem:[%s7035_s0 + $0x398] sm:$0xff]  ;;  %v5411_v63 = vld [vmem:[%s7036_s1] sm:$0xff]  ;;  %v4516_v1 = vpack.c.bf16 %v3940_v57, %v3939_v56 }
   0xf   :  { %v3961_v61 = vld [vmem:[%s7035_s0 + $0x390] sm:$0xff]  ;;  %v3935_v0 = vld [vmem:[%s7035_s0 + $0x1c0] sm:$0x3f]  ;;  %v3942_v5 = vld [vmem:[%s7035_s0 + $0x278] sm:$0xff] }
  0x10   :  { %4472 = vmatpush1.bf16.msra.mxu0 %v4471_v23  ;;  %v4543_v2 = vpack.c.bf16 %v3962_v62, %v3961_v61  ;;  %v3941_v4 = vld [vmem:[%s7035_s0 + $0x270] sm:$0xff]  ;;  %v3963_v6 = vld [vmem:[%s7035_s0 + $0x3a0] sm:$0xff]  ;;  %v3964_v7 = vld [vmem:[%s7035_s0 + $0x3a8] sm:$0xff] }
  0x11   :  { %4499 = vmatpush1.bf16.msra.mxu1 %v4498_v24  ;;  %4473 = vmatprep.subr.bf16.mxu0 %v5200_v3  ;;  %v5436_v8 = vld [vmem:[%s7036_s1 + $0x18] sm:$0xff]  ;;  %v4519_v9 = vpack.c.bf16 %v3942_v5, %v3941_v4  ;;  %v5442_v10 = vld [vmem:[%s7036_s1 + $0x10] sm:$0xff]  ;;  %v4546_v11 = vpack.c.bf16 %v3964_v7, %v3963_v6  ;;  %v3943_v12 = vld [vmem:[%s7035_s0 + $0x280] sm:$0xff] }
  0x12   :  { %4500 = vmatprep.subr.bf16.mxu1 %v5200_v3  ;;  %v3944_v13 = vld [vmem:[%s7035_s0 + $0x288] sm:$0xff]  ;;  %v3965_v14 = vld [vmem:[%s7035_s0 + $0x3b0] sm:$0xff]  ;;  %v3966_v15 = vld [vmem:[%s7035_s0 + $0x3b8] sm:$0xff] }
  0x13   :  { %v4522_v16 = vpack.c.bf16 %v3944_v13, %v3943_v12  ;;  %v4549_v17 = vpack.c.bf16 %v3966_v15, %v3965_v14  ;;  %v3945_v18 = vld [vmem:[%s7035_s0 + $0x290] sm:$0xff]  ;;  %v3946_v19 = vld [vmem:[%s7035_s0 + $0x298] sm:$0xff]  ;;  %v3967_v20 = vld [vmem:[%s7035_s0 + $0x3c0] sm:$0xff] }
  0x14   :  { %4475 = vmatpush1.bf16.msra.mxu0 %v4474_v30  ;;  %v3968_v21 = vld [vmem:[%s7035_s0 + $0x3c8] sm:$0xff]  ;;  %v4525_v22 = vpack.c.bf16 %v3946_v19, %v3945_v18  ;;  %v3947_v24 = vld [vmem:[%s7035_s0 + $0x2a0] sm:$0xff]  ;;  %v3969_v26 = vld [vmem:[%s7035_s0 + $0x3d0] sm:$0xff] }
  0x15   :  { %4502 = vmatpush1.bf16.msra.mxu1 %v4501_v31  ;;  %4476 = vmatprep.subr.bf16.mxu0 %v5200_v3  ;;  %v4552_v23 = vpack.c.bf16 %v3968_v21, %v3967_v20  ;;  %v3948_v25 = vld [vmem:[%s7035_s0 + $0x2a8] sm:$0xff]  ;;  %v3970_v28 = vld [vmem:[%s7035_s0 + $0x3d8] sm:$0xff]  ;;  %v37_v29 = vld [vmem:[%s7037_s2] sm:$0xff] }
  0x16   :  { %4503 = vmatprep.subr.bf16.mxu1 %v5200_v3 }
  0x18   :  { %4478 = vmatpush1.bf16.msra.mxu0 %v4477_v36 }
  0x19   :  { %4505 = vmatpush1.bf16.msra.mxu1 %v4504_v37  ;;  %4479 = vmatprep.subr.bf16.mxu0 %v5200_v3 }
  0x1a   :  { %4506 = vmatprep.subr.bf16.mxu1 %v5200_v3 }
  0x1c   :  { %4481 = vmatpush1.bf16.msra.mxu0 %v4480_v42 }
  0x1d   :  { %4508 = vmatpush1.bf16.msra.mxu1 %v4507_v43  ;;  %4482 = vmatprep.subr.bf16.mxu0 %v5200_v3 }
  0x1e   :  { %4509 = vmatprep.subr.bf16.mxu1 %v5200_v3 }
  0x20   :  { %4484 = vmatpush1.bf16.msra.mxu0 %v4483_v48 }
  0x21   :  { %4511 = vmatpush1.bf16.msra.mxu1 %v4510_v49  ;;  %4485 = vmatprep.subr.bf16.mxu0 %v5200_v3 }
  0x22   :  { %4512 = vmatprep.subr.bf16.mxu1 %v5200_v3 }
  0x24   :  { %4487 = vmatpush1.bf16.msra.mxu0 %v4486_v54 }
  0x25   :  { %4514 = vmatpush1.bf16.msra.mxu1 %v4513_v55  ;;  %105 = vmatprep.subr.mxu0 %v5202_v59 }
  0x26   :  { %203 = vmatprep.subr.mxu1 %v5202_v59 }
  0x28   :  { %3914 = vmatpush1.msk.msra.mxu0 %vm65_vm1, %v57_v60 }
  0x29   :  { %134 = vmatmul.mubr.f32.vlgmr.msra.gmra.mrb[0].mxu0 %v5411_v63  ;;  %3936 = vmatpush1.msk.msra.mxu1 %vm65_vm1, %v3935_v0 }
  0x2a   :  { %4515 = vmatprep.subr.bf16.mxu0 %v5200_v3  ;;  %232 = vmatmul.mubr.f32.vlgmr.msra.gmra.mrb[0].mxu1 %v5411_v63 }
  0x2b   :  { %4517 = vmatpush1.bf16.msra.mxu0 %v4516_v1  ;;  %4542 = vmatprep.subr.bf16.mxu1 %v5200_v3 }
  0x2c   :  { %4544 = vmatpush1.bf16.msra.mxu1 %v4543_v2  ;;  %4518 = vmatprep.subr.bf16.mxu0 %v5200_v3 }
  0x2d   :  { %4545 = vmatprep.subr.bf16.mxu1 %v5200_v3  ;;  %3916 = vmatprep.mubr.msk.f32.mxu0 %vm58_vm0, %v5436_v8 }
  0x2e   :  { %139 = vmatmul.mubr.f32.gmra.mrb[2].mxu0 %v5442_v10  ;;  %3938 = vmatprep.mubr.msk.f32.mxu1 %vm58_vm0, %v5436_v8 }
  0x2f   :  { %4520 = vmatpush1.bf16.msra.mxu0 %v4519_v9  ;;  %237 = vmatmul.mubr.f32.gmra.mrb[2].mxu1 %v5442_v10 }
  0x30   :  { %4547 = vmatpush1.bf16.msra.mxu1 %v4546_v11  ;;  %4521 = vmatprep.subr.bf16.mxu0 %v5200_v3 }
  0x31   :  { %4548 = vmatprep.subr.bf16.mxu1 %v5200_v3  ;;  %3959 = vmatprep.mubr.msk.f32.mxu0 %vm58_vm0, %v5320_v27 }
  0x32   :  { %3981 = vmatprep.mubr.msk.f32.mxu1 %vm58_vm0, %v5320_v27 }
  0x33   :  { %4523 = vmatpush1.bf16.msra.mxu0 %v4522_v16 }
  0x34   :  { %4550 = vmatpush1.bf16.msra.mxu1 %v4549_v17  ;;  %4524 = vmatprep.subr.bf16.mxu0 %v5200_v3 }
  0x35   :  { %4551 = vmatprep.subr.bf16.mxu1 %v5200_v3 }
  0x36   :  { %14 = vsyncpa [#allocation3], 0  ;;  %446 = vperm.xlu0 %5175, %v37_v29   ;;  %v4528_v30 = vpack.c.bf16 %v3948_v25, %v3947_v24  ;;  %v38_v31 = vld [vmem:[%s7037_s2 + $0x8] sm:$0xff]  ;;  %v4555_v32 = vpack.c.bf16 %v3970_v28, %v3969_v26  ;;  %v3949_v33 = vld [vmem:[%s7035_s0 + $0x2b0] sm:$0xff]  ;;  %vm890_vm2 = vcmask 1040384   ;;  %vm5203_vm3 = vmmov 1  }
  0x37   :  { %4526 = vmatpush1.bf16.msra.mxu0 %v4525_v22  ;;  %v3950_v34 = vld [vmem:[%s7035_s0 + $0x2b8] sm:$0xff]  ;;  %v3971_v35 = vld [vmem:[%s7035_s0 + $0x3e0] sm:$0xff]  ;;  %v3972_v36 = vld [vmem:[%s7035_s0 + $0x3e8] sm:$0xff]  ;;  %vm887_vm6 = vcmask 203776   ;;  %vm5204_vm14 = vmmov 0   ;;  %s5205_s24 = smov [#allocation2]  }
  0x38   :  { %4553 = vmatpush1.bf16.msra.mxu1 %v4552_v23  ;;  %4527 = vmatprep.subr.bf16.mxu0 %v5200_v3  ;;  %v4531_v37 = vpack.c.bf16 %v3950_v34, %v3949_v33  ;;  %v4558_v38 = vpack.c.bf16 %v3972_v36, %v3971_v35  ;;  %v3951_v39 = vld [vmem:[%s7035_s0 + $0x2c0] sm:$0xff]  ;;  %v3952_v40 = vld [vmem:[%s7035_s0 + $0x2c8] sm:$0xff]  ;;  %v3973_v41 = vld [vmem:[%s7035_s0 + $0x3f0] sm:$0xff]  ;;  %s3906_s25 = sshll.u32 %s5205_s24, 4  ;;  %s3907_s25 = int_to_ptr.vmem [resolvable:$true] %s3906_s25 }
  0x39   :  { %4554 = vmatprep.subr.bf16.mxu1 %v5200_v3  ;;  %v3974_v42 = vld [vmem:[%s7035_s0 + $0x3f8] sm:$0xff]  ;;  %v4534_v43 = vpack.c.bf16 %v3952_v40, %v3951_v39  ;;  %v3953_v45 = vld [vmem:[%s7035_s0 + $0x2d0] sm:$0xff]  ;;  %v3975_v47 = vld [vmem:[%s7035_s0 + $0x400] sm:$0xff]  ;;  %s5176_s26 = scalar_lea.vmem %s3907_s25, 32  ;;  %p5181_p1 = scmp.lt.s32.totalorder %s3907_s25, %s3907_s25 }
  0x3a   :  { %451 = vperm.xlu0 %5175, %v38_v31   ;;  %v4561_v44 = vpack.c.bf16 %v3974_v42, %v3973_v41  ;;  %v3954_v46 = vld [vmem:[%s7035_s0 + $0x2d8] sm:$0xff]  ;;  %v3976_v48 = vld [vmem:[%s7035_s0 + $0x408] sm:$0xff]  ;;  %v3955_v51 = vld [vmem:[%s7035_s0 + $0x2e0] sm:$0xff]  ;;  %p5177_p0 = scmp.ne.s32.totalorder %s3907_s25, %s5176_s26  ;;  %p5182_p2 = scmp.lt.s32.totalorder %s5176_s26, %s5176_s26 }
  0x3b   :  { %4529 = vmatpush1.bf16.msra.mxu0 %v4528_v30  ;;  %v4537_v49 = vpack.c.bf16 %v3954_v46, %v3953_v45  ;;  %v4564_v50 = vpack.c.bf16 %v3976_v48, %v3975_v47  ;;  %v3956_v52 = vld [vmem:[%s7035_s0 + $0x2e8] sm:$0xff]  ;;  %v3977_v53 = vld [vmem:[%s7035_s0 + $0x410] sm:$0xff]  ;;  %v3978_v54 = vld [vmem:[%s7035_s0 + $0x418] sm:$0xff] }
  0x3c   :  { %4556 = vmatpush1.bf16.msra.mxu1 %v4555_v32  ;;  %4530 = vmatprep.subr.bf16.mxu0 %v5200_v3  ;;  %v4540_v55 = vpack.c.bf16 %v3956_v52, %v3955_v51  ;;  %v4567_v56 = vpack.c.bf16 %v3978_v54, %v3977_v53  ;;  %v3983_v57 = vld [vmem:[%s7035_s0 + $0x98] sm:$0xff]  ;;  %v3984_v58 = vld [vmem:[%s7035_s0 + $0xa0] sm:$0xff]  ;;  %v3957_v60 = vld [vmem:[%s7035_s0 + $0x2f0] sm:$0x3f]  ;;  %p5183_p3 = por %p5182_p2, %p5181_p1 }
  0x3d   :  { %4557 = vmatprep.subr.bf16.mxu1 %v5200_v3  ;;  %v4005_v61 = vld [vmem:[%s7035_s0 + $0x1c8] sm:$0xff]  ;;  %v4006_v62 = vld [vmem:[%s7035_s0 + $0x1d0] sm:$0xff]  ;;  %v3979_v0 = vld [vmem:[%s7035_s0 + $0x420] sm:$0x3f]  ;;  %v4570_v1 = vpack.c.bf16 %v3984_v58, %v3983_v57 }
  0x3e   :  { %v4597_v2 = vpack.c.bf16 %v4006_v62, %v4005_v61  ;;  %v3985_v4 = vld [vmem:[%s7035_s0 + $0xa8] sm:$0xff]  ;;  %v3986_v5 = vld [vmem:[%s7035_s0 + $0xb0] sm:$0xff]  ;;  %v4007_v6 = vld [vmem:[%s7035_s0 + $0x1d8] sm:$0xff]  ;;  %p5184_p4 = pnand %p5183_p3, %p5177_p0 }
  0x3f   :  { %4532 = vmatpush1.bf16.msra.mxu0 %v4531_v37  ;;  %v4008_v7 = vld [vmem:[%s7035_s0 + $0x1e0] sm:$0xff]  ;;  %v4573_v9 = vpack.c.bf16 %v3986_v5, %v3985_v4  ;;  %v3987_v12 = vld [vmem:[%s7035_s0 + $0xb8] sm:$0xff]  ;;  %v4009_v14 = vld [vmem:[%s7035_s0 + $0x1e8] sm:$0xff] }
  0x40   :  { %4559 = vmatpush1.bf16.msra.mxu1 %v4558_v38  ;;  %4533 = vmatprep.subr.bf16.mxu0 %v5200_v3  ;;  %v4600_v11 = vpack.c.bf16 %v4008_v7, %v4007_v6  ;;  %v3988_v13 = vld [vmem:[%s7035_s0 + $0xc0] sm:$0xff]  ;;  %v4010_v15 = vld [vmem:[%s7035_s0 + $0x1f0] sm:$0xff]  ;;  %v3989_v18 = vld [vmem:[%s7035_s0 + $0xc8] sm:$0xff] }
  0x41   :  { %4560 = vmatprep.subr.bf16.mxu1 %v5200_v3  ;;  %v4576_v16 = vpack.c.bf16 %v3988_v13, %v3987_v12  ;;  %v4603_v17 = vpack.c.bf16 %v4010_v15, %v4009_v14  ;;  %v3990_v19 = vld [vmem:[%s7035_s0 + $0xd0] sm:$0xff]  ;;  %v4011_v20 = vld [vmem:[%s7035_s0 + $0x1f8] sm:$0xff]  ;;  %v4012_v21 = vld [vmem:[%s7035_s0 + $0x200] sm:$0xff] }
  0x42   :  { %v4579_v22 = vpack.c.bf16 %v3990_v19, %v3989_v18  ;;  %v4606_v23 = vpack.c.bf16 %v4012_v21, %v4011_v20  ;;  %v3991_v24 = vld [vmem:[%s7035_s0 + $0xd8] sm:$0xff]  ;;  %v3992_v25 = vld [vmem:[%s7035_s0 + $0xe0] sm:$0xff]  ;;  %v4013_v26 = vld [vmem:[%s7035_s0 + $0x208] sm:$0xff] }
  0x43   :  { %4535 = vmatpush1.bf16.msra.mxu0 %v4534_v43  ;;  %v4014_v28 = vld [vmem:[%s7035_s0 + $0x210] sm:$0xff]  ;;  %v4582_v29 = vpack.c.bf16 %v3992_v25, %v3991_v24  ;;  %v3993_v31 = vld [vmem:[%s7035_s0 + $0xe8] sm:$0xff]  ;;  %v4015_v33 = vld [vmem:[%s7035_s0 + $0x218] sm:$0xff] }
  0x44   :  { %4562 = vmatpush1.bf16.msra.mxu1 %v4561_v44  ;;  %4536 = vmatprep.subr.bf16.mxu0 %v5200_v3  ;;  %v4609_v30 = vpack.c.bf16 %v4014_v28, %v4013_v26  ;;  %v3994_v32 = vld [vmem:[%s7035_s0 + $0xf0] sm:$0xff]  ;;  %v4016_v34 = vld [vmem:[%s7035_s0 + $0x220] sm:$0xff]  ;;  %v3995_v37 = vld [vmem:[%s7035_s0 + $0xf8] sm:$0xff] }
  0x45   :  { %4563 = vmatprep.subr.bf16.mxu1 %v5200_v3  ;;  %v4585_v35 = vpack.c.bf16 %v3994_v32, %v3993_v31  ;;  %v4612_v36 = vpack.c.bf16 %v4016_v34, %v4015_v33  ;;  %v3996_v38 = vld [vmem:[%s7035_s0 + $0x100] sm:$0xff]  ;;  %v4017_v39 = vld [vmem:[%s7035_s0 + $0x228] sm:$0xff]  ;;  %v4018_v40 = vld [vmem:[%s7035_s0 + $0x230] sm:$0xff] }
  0x46   :  { %v4588_v41 = vpack.c.bf16 %v3996_v38, %v3995_v37  ;;  %v4615_v42 = vpack.c.bf16 %v4018_v40, %v4017_v39  ;;  %v3997_v43 = vld [vmem:[%s7035_s0 + $0x108] sm:$0xff]  ;;  %v3998_v44 = vld [vmem:[%s7035_s0 + $0x110] sm:$0xff]  ;;  %v4019_v45 = vld [vmem:[%s7035_s0 + $0x238] sm:$0xff] }
  0x47   :  { %4538 = vmatpush1.bf16.msra.mxu0 %v4537_v49  ;;  %v4020_v46 = vld [vmem:[%s7035_s0 + $0x240] sm:$0xff]  ;;  %v4591_v47 = vpack.c.bf16 %v3998_v44, %v3997_v43  ;;  %v3999_v49 = vld [vmem:[%s7035_s0 + $0x118] sm:$0xff]  ;;  %v4021_v51 = vld [vmem:[%s7035_s0 + $0x248] sm:$0xff] }
  0x48   :  { %4565 = vmatpush1.bf16.msra.mxu1 %v4564_v50  ;;  %4539 = vmatprep.subr.bf16.mxu0 %v5200_v3  ;;  %v4618_v48 = vpack.c.bf16 %v4020_v46, %v4019_v45  ;;  %v4000_v50 = vld [vmem:[%s7035_s0 + $0x120] sm:$0xff]  ;;  %v4022_v52 = vld [vmem:[%s7035_s0 + $0x250] sm:$0xff]  ;;  %v4001_v57 = vld [vmem:[%s7035_s0 + $0x128] sm:$0x3f] }
  0x49   :  { %4566 = vmatprep.subr.bf16.mxu1 %v5200_v3  ;;  %v4594_v53 = vpack.c.bf16 %v4000_v50, %v3999_v49  ;;  %v4621_v54 = vpack.c.bf16 %v4022_v52, %v4021_v51  ;;  %v4049_v58 = vld [vmem:[%s7035_s0 + $0x428] sm:$0xff]  ;;  %v4023_v61 = vld [vmem:[%s7035_s0 + $0x258] sm:$0x3f]  ;;  %v4052_v5 = vld [vmem:[%s7035_s0 + $0x440] sm:$0xff] }
  0x4a   :  { %v4051_v4 = vld [vmem:[%s7035_s0 + $0x438] sm:$0xff]  ;;  %v4053_v12 = vld [vmem:[%s7035_s0 + $0x448] sm:$0xff]  ;;  %v4054_v13 = vld [vmem:[%s7035_s0 + $0x450] sm:$0xff] }
  0x4b   :  { %4541 = vmatpush1.bf16.msra.mxu0 %v4540_v55  ;;  %v4027_v55 = vld [vmem:[%s7035_s0 + $0x2f8] sm:$0xff]  ;;  %v4654_v7 = vpack.c.bf16 %v4052_v5, %v4051_v4  ;;  %v4657_v15 = vpack.c.bf16 %v4054_v13, %v4053_v12  ;;  %v4056_v19 = vld [vmem:[%s7035_s0 + $0x460] sm:$0xff]  ;;  %v4058_v24 = vld [vmem:[%s7035_s0 + $0x470] sm:$0xff] }
  0x4c   :  { %4568 = vmatpush1.bf16.msra.mxu1 %v4567_v56  ;;  %303 = vmatprep.subr.mxu0 %v5202_v59  ;;  %v4028_v56 = vld [vmem:[%s7035_s0 + $0x300] sm:$0xff]  ;;  %v4055_v18 = vld [vmem:[%s7035_s0 + $0x458] sm:$0xff]  ;;  %v4037_v28 = vld [vmem:[%s7035_s0 + $0x348] sm:$0xff] }
  0x4d   :  { %403 = vmatprep.subr.mxu1 %v5202_v59  ;;  %v4624_v62 = vpack.c.bf16 %v4028_v56, %v4027_v55  ;;  %v4660_v21 = vpack.c.bf16 %v4056_v19, %v4055_v18  ;;  %v4060_v31 = vld [vmem:[%s7035_s0 + $0x480] sm:$0xff]  ;;  %v4039_v34 = vld [vmem:[%s7035_s0 + $0x358] sm:$0xff]  ;;  %v4062_v37 = vld [vmem:[%s7035_s0 + $0x490] sm:$0xff] }
  0x4e   :  { %v4041_v40 = vld [vmem:[%s7035_s0 + $0x368] sm:$0xff]  ;;  %v4064_v43 = vld [vmem:[%s7035_s0 + $0x4a0] sm:$0xff]  ;;  %v4043_v46 = vld [vmem:[%s7035_s0 + $0x378] sm:$0xff] }
  0x4f   :  { %3958 = vmatpush1.msk.msra.mxu0 %vm65_vm1, %v3957_v60  ;;  %v4050_v60 = vld [vmem:[%s7035_s0 + $0x430] sm:$0xff]  ;;  %v4045_v52 = vld [vmem:[%s7035_s0 + $0x388] sm:$0x3f]  ;;  %vm5900_vm4 = vmpackc.low %vm890_vm2, %vm5203_vm3 }
  0x50   :  { %332 = vmatmul.mubr.f32.vlgmr.msra.gmra.mrb[4].mxu0 %v5411_v63  ;;  %3980 = vmatpush1.msk.msra.mxu1 %vm65_vm1, %v3979_v0  ;;  %v4651_v0 = vpack.c.bf16 %v4050_v60, %v4049_v58  ;;  %v4066_v49 = vld [vmem:[%s7035_s0 + $0x4b0] sm:$0xff]  ;;  %v4078_v58 = vld [vmem:[%s7038_s3 + $0x78] sm:$0x1] }
  0x51   :  { %4569 = vmatprep.subr.bf16.mxu0 %v5200_v3  ;;  %4596 = vmatprep.subr.bf16.mxu1 %v5200_v3  ;;  %v871_v4 = vld [vmem:[%s7038_s3 + $0x18] sm:$0xff] }
  0x52   :  { %4571 = vmatpush1.bf16.msra.mxu0 %v4570_v1  ;;  %432 = vmatmul.mubr.f32.vlgmr.msra.gmra.mrb[4].mxu1 %v5411_v63  ;;  %v4029_v1 = vld [vmem:[%s7035_s0 + $0x308] sm:$0xff] }
  0x53   :  { %4598 = vmatpush1.bf16.msra.mxu1 %v4597_v2  ;;  %3960 = vmatprep.mubr.msk.f32.mxu0 %vm58_vm0, %v5436_v8  ;;  %v4030_v2 = vld [vmem:[%s7035_s0 + $0x310] sm:$0xff] }
  0x54   :  { %337 = vmatmul.mubr.f32.gmra.mrb[6].mxu0 %v5442_v10  ;;  %4572 = vmatprep.subr.bf16.mxu0 %v5200_v3  ;;  %v4627_v6 = vpack.c.bf16 %v4030_v2, %v4029_v1  ;;  %v869_v2 = vld [vmem:[%s7038_s3 + $0x8] sm:$0xff] }
  0x55   :  { %3982 = vmatprep.mubr.msk.f32.mxu1 %vm58_vm0, %v5436_v8  ;;  %4599 = vmatprep.subr.bf16.mxu1 %v5200_v3  ;;  %v4687_v5 = vpack.c.bf16 %v871_v4, %v869_v2  ;;  %v4109_v2 = vld [vmem:[%s7038_s3 + $0xe0] sm:$0xff]  ;;  %v4111_v4 = vld [vmem:[%s7038_s3 + $0xf0] sm:$0x1] }
  0x56   :  { %4574 = vmatpush1.bf16.msra.mxu0 %v4573_v9  ;;  %437 = vmatmul.mubr.f32.gmra.mrb[6].mxu1 %v5442_v10  ;;  %v4031_v9 = vld [vmem:[%s7035_s0 + $0x318] sm:$0xff] }
  0x57   :  { %4601 = vmatpush1.bf16.msra.mxu1 %v4600_v11  ;;  %4575 = vmatprep.subr.bf16.mxu0 %v5200_v3  ;;  %v4032_v11 = vld [vmem:[%s7035_s0 + $0x320] sm:$0xff] }
  0x58   :  { %4602 = vmatprep.subr.bf16.mxu1 %v5200_v3  ;;  %4003 = vmatprep.mubr.msk.f32.mxu0 %vm58_vm0, %v5320_v27  ;;  %v4630_v14 = vpack.c.bf16 %v4032_v11, %v4031_v9 }
  0x59   :  { %4025 = vmatprep.mubr.msk.f32.mxu1 %vm58_vm0, %v5320_v27 }
  0x5a   :  { %4577 = vmatpush1.bf16.msra.mxu0 %v4576_v16  ;;  %v4033_v16 = vld [vmem:[%s7035_s0 + $0x328] sm:$0xff] }
  0x5b   :  { %4604 = vmatpush1.bf16.msra.mxu1 %v4603_v17  ;;  %4578 = vmatprep.subr.bf16.mxu0 %v5200_v3  ;;  %v4034_v17 = vld [vmem:[%s7035_s0 + $0x330] sm:$0xff] }
  0x5c   :  { %4605 = vmatprep.subr.bf16.mxu1 %v5200_v3  ;;  %v4633_v20 = vpack.c.bf16 %v4034_v17, %v4033_v16 }
  0x5e   :  { %4580 = vmatpush1.bf16.msra.mxu0 %v4579_v22  ;;  %v4035_v22 = vld [vmem:[%s7035_s0 + $0x338] sm:$0xff] }
  0x5f   :  { %4607 = vmatpush1.bf16.msra.mxu1 %v4606_v23  ;;  %4581 = vmatprep.subr.bf16.mxu0 %v5200_v3  ;;  %v4036_v23 = vld [vmem:[%s7035_s0 + $0x340] sm:$0xff] }
  0x60   :  { %4608 = vmatprep.subr.bf16.mxu1 %v5200_v3  ;;  %v4636_v25 = vpack.c.bf16 %v4036_v23, %v4035_v22 }
  0x62   :  { %4583 = vmatpush1.bf16.msra.mxu0 %v4582_v29  ;;  %v4038_v29 = vld [vmem:[%s7035_s0 + $0x350] sm:$0xff] }
  0x63   :  { %4610 = vmatpush1.bf16.msra.mxu1 %v4609_v30  ;;  %4584 = vmatprep.subr.bf16.mxu0 %v5200_v3  ;;  %v4059_v30 = vld [vmem:[%s7035_s0 + $0x478] sm:$0xff]  ;;  %v4639_v32 = vpack.c.bf16 %v4038_v29, %v4037_v28 }
  0x64   :  { %4611 = vmatprep.subr.bf16.mxu1 %v5200_v3  ;;  %v4666_v33 = vpack.c.bf16 %v4060_v31, %v4059_v30  ;;  %v868_v30 = vld [vmem:[%s7038_s3] sm:$0xff]  ;;  %v870_v31 = vld [vmem:[%s7038_s3 + $0x10] sm:$0xff] }
  0x66   :  { %4586 = vmatpush1.bf16.msra.mxu0 %v4585_v35  ;;  %v4040_v35 = vld [vmem:[%s7035_s0 + $0x360] sm:$0xff] }
  0x67   :  { %4613 = vmatpush1.bf16.msra.mxu1 %v4612_v36  ;;  %4587 = vmatprep.subr.bf16.mxu0 %v5200_v3  ;;  %v4061_v36 = vld [vmem:[%s7035_s0 + $0x488] sm:$0xff]  ;;  %v4642_v38 = vpack.c.bf16 %v4040_v35, %v4039_v34  ;;  %v875_v35 = vld [vmem:[%s7038_s3 + $0x38] sm:$0x1] }
  0x68   :  { %4614 = vmatprep.subr.bf16.mxu1 %v5200_v3  ;;  %v4669_v39 = vpack.c.bf16 %v4062_v37, %v4061_v36 }
  0x6a   :  { %4589 = vmatpush1.bf16.msra.mxu0 %v4588_v41  ;;  %v4042_v41 = vld [vmem:[%s7035_s0 + $0x370] sm:$0xff] }
  0x6b   :  { %4616 = vmatpush1.bf16.msra.mxu1 %v4615_v42  ;;  %4590 = vmatprep.subr.bf16.mxu0 %v5200_v3  ;;  %v4063_v42 = vld [vmem:[%s7035_s0 + $0x498] sm:$0xff]  ;;  %v4645_v44 = vpack.c.bf16 %v4042_v41, %v4041_v40  ;;  %v872_v41 = vld [vmem:[%s7038_s3 + $0x20] sm:$0xff] }
  0x6c   :  { %4617 = vmatprep.subr.bf16.mxu1 %v5200_v3  ;;  %v4672_v45 = vpack.c.bf16 %v4064_v43, %v4063_v42  ;;  %v874_v42 = vld [vmem:[%s7038_s3 + $0x30] sm:$0x1]  ;;  %v4092_v43 = vld [vmem:[%s7038_s3 + $0x88] sm:$0xff] }
  0x6e   :  { %4592 = vmatpush1.bf16.msra.mxu0 %v4591_v47  ;;  %v4044_v47 = vld [vmem:[%s7035_s0 + $0x380] sm:$0xff] }
  0x6f   :  { %4619 = vmatpush1.bf16.msra.mxu1 %v4618_v48  ;;  %4593 = vmatprep.subr.bf16.mxu0 %v5200_v3  ;;  %v4065_v48 = vld [vmem:[%s7035_s0 + $0x4a8] sm:$0xff]  ;;  %v4648_v50 = vpack.c.bf16 %v4044_v47, %v4043_v46  ;;  %v4091_v47 = vld [vmem:[%s7038_s3 + $0x80] sm:$0xff] }
  0x70   :  { %4620 = vmatprep.subr.bf16.mxu1 %v5200_v3  ;;  %v4675_v51 = vpack.c.bf16 %v4066_v49, %v4065_v48  ;;  %v4093_v48 = vld [vmem:[%s7038_s3 + $0x90] sm:$0xff]  ;;  %v4096_v49 = vld [vmem:[%s7038_s3 + $0xa8] sm:$0xff] }
  0x72   :  { %4595 = vmatpush1.bf16.msra.mxu0 %v4594_v53  ;;  %v4067_v53 = vld [vmem:[%s7035_s0 + $0x4b8] sm:$0x3f] }
  0x73   :  { %4622 = vmatpush1.bf16.msra.mxu1 %v4621_v54  ;;  %521 = vmatprep.subr.mxu0 %v5202_v59  ;;  %v4072_v54 = vld [vmem:[%s7038_s3 + $0x48] sm:$0xff] }
  0x74   :  { %619 = vmatprep.subr.mxu1 %v5202_v59 }
  0x76   :  { %4002 = vmatpush1.msk.msra.mxu0 %vm65_vm1, %v4001_v57  ;;  %v4076_v57 = vld [vmem:[%s7038_s3 + $0x68] sm:$0xff] }
  0x77   :  { %550 = vmatmul.mubr.f32.vlgmr.msra.gmra.mrb[8].mxu0 %v5411_v63  ;;  %4024 = vmatpush1.msk.msra.mxu1 %vm65_vm1, %v4023_v61  ;;  %v4681_v60 = vpack.c.bf16 %v4078_v58, %v4076_v57  ;;  %v4075_v61 = vld [vmem:[%s7038_s3 + $0x60] sm:$0xff]  ;;  %v4107_v57 = vld [vmem:[%s7038_s3 + $0xd0] sm:$0xff]  ;;  %v4110_v58 = vld [vmem:[%s7038_s3 + $0xe8] sm:$0xff] }
  0x78   :  { %4623 = vmatprep.subr.bf16.mxu0 %v5200_v3  ;;  %648 = vmatmul.mubr.f32.vlgmr.msra.gmra.mrb[8].mxu1 %v5411_v63 }
  0x79   :  { %4625 = vmatpush1.bf16.msra.mxu0 %v4624_v62  ;;  %4650 = vmatprep.subr.bf16.mxu1 %v5200_v3  ;;  %v4077_v62 = vld [vmem:[%s7038_s3 + $0x70] sm:$0x1] }
  0x7a   :  { %4652 = vmatpush1.bf16.msra.mxu1 %v4651_v0  ;;  %4626 = vmatprep.subr.bf16.mxu0 %v5200_v3  ;;  %v4684_v1 = vpack.c.bf16 %v4077_v62, %v4075_v61  ;;  %v3546_v0 = vld [vmem:[%s7040_s5 + $0x60] sm:$0xff] }
  0x7b   :  { %4653 = vmatprep.subr.bf16.mxu1 %v5200_v3  ;;  %4004 = vmatprep.mubr.msk.f32.mxu0 %vm58_vm0, %v5436_v8 }
  0x7c   :  { %555 = vmatmul.mubr.f32.gmra.mrb[10].mxu0 %v5442_v10  ;;  %4026 = vmatprep.mubr.msk.f32.mxu1 %vm58_vm0, %v5436_v8 }
  0x7d   :  { %4628 = vmatpush1.bf16.msra.mxu0 %v4627_v6  ;;  %653 = vmatmul.mubr.f32.gmra.mrb[10].mxu1 %v5442_v10 }
  0x7e   :  { %4655 = vmatpush1.bf16.msra.mxu1 %v4654_v7  ;;  %4629 = vmatprep.subr.bf16.mxu0 %v5200_v3 }
  0x7f   :  { %4656 = vmatprep.subr.bf16.mxu1 %v5200_v3  ;;  %4047 = vmatprep.mubr.msk.f32.mxu0 %vm58_vm0, %v5320_v27 }
  0x80   :  { %4069 = vmatprep.mubr.msk.f32.mxu1 %vm58_vm0, %v5320_v27  ;;  %v4057_v27 = vld [vmem:[%s7035_s0 + $0x468] sm:$0xff] }
  0x81   :  { %4631 = vmatpush1.bf16.msra.mxu0 %v4630_v14  ;;  %v4663_v26 = vpack.c.bf16 %v4058_v24, %v4057_v27 }
  0x82   :  { %4658 = vmatpush1.bf16.msra.mxu1 %v4657_v15  ;;  %4632 = vmatprep.subr.bf16.mxu0 %v5200_v3 }
  0x83   :  { %4659 = vmatprep.subr.bf16.mxu1 %v5200_v3 }
  0x85   :  { %4634 = vmatpush1.bf16.msra.mxu0 %v4633_v20 }
  0x86   :  { %4661 = vmatpush1.bf16.msra.mxu1 %v4660_v21  ;;  %4635 = vmatprep.subr.bf16.mxu0 %v5200_v3 }
  0x87   :  { %4662 = vmatprep.subr.bf16.mxu1 %v5200_v3 }
  0x89   :  { %4637 = vmatpush1.bf16.msra.mxu0 %v4636_v25 }
  0x8a   :  { %4664 = vmatpush1.bf16.msra.mxu1 %v4663_v26  ;;  %4638 = vmatprep.subr.bf16.mxu0 %v5200_v3 }
  0x8b   :  { %4665 = vmatprep.subr.bf16.mxu1 %v5200_v3 }
  0x8d   :  { %4640 = vmatpush1.bf16.msra.mxu0 %v4639_v32  ;;  %v873_v32 = vld [vmem:[%s7038_s3 + $0x28] sm:$0xff] }
  0x8e   :  { %4667 = vmatpush1.bf16.msra.mxu1 %v4666_v33  ;;  %4641 = vmatprep.subr.bf16.mxu0 %v5200_v3  ;;  %v5944_v40 = vpack.c.bf16 %v875_v35, %v873_v32 }
  0x8f   :  { %4668 = vmatprep.subr.bf16.mxu1 %v5200_v3 }
  0x91   :  { %4643 = vmatpush1.bf16.msra.mxu0 %v4642_v38  ;;  %v5941_v38 = vpack.c.bf16 %v870_v31, %v868_v30  ;;  %v4138_v30 = vld [vmem:[%s7038_s3 + $0x168] sm:$0xff]  ;;  %v4140_v31 = vld [vmem:[%s7038_s3 + $0x178] sm:$0x1] }
  0x92   :  { %4670 = vmatpush1.bf16.msra.mxu1 %v4669_v39  ;;  %4644 = vmatprep.subr.bf16.mxu0 %v5200_v3 }
  0x93   :  { %4671 = vmatprep.subr.bf16.mxu1 %v5200_v3 }
  0x95   :  { %4646 = vmatpush1.bf16.msra.mxu0 %v4645_v44  ;;  %v4094_v44 = vld [vmem:[%s7038_s3 + $0x98] sm:$0xff] }
  0x96   :  { %4673 = vmatpush1.bf16.msra.mxu1 %v4672_v45  ;;  %4647 = vmatprep.subr.bf16.mxu0 %v5200_v3  ;;  %v5960_v45 = vpack.c.bf16 %v874_v42, %v872_v41  ;;  %v5966_v46 = vpack.c.bf16 %v4094_v44, %v4092_v43  ;;  %v6122_v42 = vpack.c.bf16 %v4140_v31, %v4138_v30  ;;  %v4137_v43 = vld [vmem:[%s7038_s3 + $0x160] sm:$0xff]  ;;  %v4139_v44 = vld [vmem:[%s7038_s3 + $0x170] sm:$0x1] }
  0x97   :  { %4674 = vmatprep.subr.bf16.mxu1 %v5200_v3  ;;  %v4165_v31 = vld [vmem:[%s7038_s3 + $0x1e0] sm:$0xff] }
  0x99   :  { %4649 = vmatpush1.bf16.msra.mxu0 %v4648_v50  ;;  %v4098_v50 = vld [vmem:[%s7038_s3 + $0xb8] sm:$0x1] }
  0x9a   :  { %4676 = vmatpush1.bf16.msra.mxu1 %v4675_v51  ;;  %719 = vmatprep.subr.mxu0 %v5202_v59  ;;  %v5983_v51 = vpack.c.bf16 %v4093_v48, %v4091_v47  ;;  %v4148_v47 = vld [vmem:[%s7038_s3 + $0x188] sm:$0xff]  ;;  %v4150_v48 = vld [vmem:[%s7038_s3 + $0x198] sm:$0xff] }
  0x9b   :  { %819 = vmatprep.subr.mxu1 %v5202_v59 }
  0x9d   :  { %4046 = vmatpush1.msk.msra.mxu0 %vm65_vm1, %v4045_v52  ;;  %v5986_v52 = vpack.c.bf16 %v4098_v50, %v4096_v49  ;;  %v6140_v50 = vpack.c.bf16 %v4139_v44, %v4137_v43 }
  0x9e   :  { %748 = vmatmul.mubr.f32.vlgmr.msra.gmra.mrb[12].mxu0 %v5411_v63  ;;  %4068 = vmatpush1.msk.msra.mxu1 %vm65_vm1, %v4067_v53  ;;  %v4095_v53 = vld [vmem:[%s7038_s3 + $0xa0] sm:$0xff]  ;;  %vm3746_vm1 = vcmask 73728  }
  0x9f   :  { %848 = vmatmul.mubr.f32.vlgmr.msra.gmra.mrb[12].mxu1 %v5411_v63  ;;  %4048 = vmatprep.mubr.msk.f32.mxu0 %vm58_vm0, %v5436_v8  ;;  %v4074_v63 = vld [vmem:[%s7038_s3 + $0x58] sm:$0xff] }
  0xa0   :  { %4070 = vmatprep.mubr.msk.f32.mxu1 %vm58_vm0, %v5436_v8  ;;  %v4677_v55 = vpack.c.bf16 %v4074_v63, %v4072_v54  ;;  %v4071_v8 = vld [vmem:[%s7038_s3 + $0x40] sm:$0xff]  ;;  %v4097_v54 = vld [vmem:[%s7038_s3 + $0xb0] sm:$0x1]  ;;  %v4106_v63 = vld [vmem:[%s7038_s3 + $0xc8] sm:$0xff] }
  0xa2   :  { %753 = vmatmul.mubr.f32.gmra.mrb[14].mxu0 %v5442_v10  ;;  %4678 = vmatprep.subr.bf16.mxu0 %v4677_v55 }
  0xa3   :  { %853 = vmatmul.mubr.f32.gmra.mrb[14].mxu1 %v5442_v10  ;;  %961 = vmatprep.mubr.f32.mxu0 %v5202_v59  ;;  %v4073_v10 = vld [vmem:[%s7038_s3 + $0x50] sm:$0xff] }
  0xa4   :  { %1115 = vmatprep.mubr.f32.mxu1 %v5202_v59  ;;  %v4679_v56 = vpack.c.bf16 %v4073_v10, %v4071_v8  ;;  %4698 = vmatprep.subr.bf16.mxu1 %v4677_v55  ;;  %v4108_v55 = vld [vmem:[%s7038_s3 + $0xd8] sm:$0xff]  ;;  %v6003_v8 = vpack.c.bf16 %v4097_v54, %v4095_v53 }
  0xa5   :  { %v6009_v10 = vpack.c.bf16 %v4108_v55, %v4106_v63  ;;  %v6148_v63 = vpack.c.bf16 %v4150_v48, %v4148_v47  ;;  %v4147_v55 = vld [vmem:[%s7038_s3 + $0x180] sm:$0xff]  ;;  %v4177_v48 = vld [vmem:[%s7038_s3 + $0x210] sm:$0xff] }
  0xa6   :  { %4680 = vmatpush1.bf16.msra.mxu0 %v4679_v56  ;;  %4700 = vmatpush1.bf16.msra.mxu1 %v4679_v56  ;;  %v4105_v56 = vld [vmem:[%s7038_s3 + $0xc0] sm:$0xff] }
  0xa7   :  { %4683 = vmatprep.subr.msk.bf16.mxu0 %vm5900_vm4, %v4681_v60  ;;  %4703 = vmatprep.subr.msk.bf16.mxu1 %vm5900_vm4, %v4681_v60  ;;  %v4112_v60 = vld [vmem:[%s7038_s3 + $0xf8] sm:$0x1]  ;;  %v6026_v61 = vpack.c.bf16 %v4107_v57, %v4105_v56  ;;  %v4149_v56 = vld [vmem:[%s7038_s3 + $0x190] sm:$0xff]  ;;  %v4175_v47 = vld [vmem:[%s7038_s3 + $0x200] sm:$0xff] }
  0xaa   :  { %4686 = vmatpush1.bf16.msk.msra.mxu0 %vm5900_vm4, %v4684_v1  ;;  %4706 = vmatpush1.bf16.msk.msra.mxu1 %vm5900_vm4, %v4684_v1  ;;  %v6030_v1 = vpack.c.bf16 %v4112_v60, %v4110_v58  ;;  %v4152_v60 = vld [vmem:[%s7038_s3 + $0x1a8] sm:$0xff] }
  0xab   :  { %4688 = vmatprep.subr.bf16.mxu0 %v4687_v5  ;;  %4708 = vmatprep.subr.bf16.mxu1 %v4687_v5  ;;  %v4120_v5 = vld [vmem:[%s7038_s3 + $0x108] sm:$0xff] }
  0xb5   :  { %v5918_v22 = vpop.permute.xlu0 %446 }
  0xfc   :  { %v135_v6 = vpop.f32.mrb[0].mxu0 }
  0xfd   :  { %v137_v7 = vpop.f32.mrb[1].mxu0  ;;  %v233_v9 = vpop.f32.mrb[0].mxu1 }
  0xfe   :  { %v242_v11 = vmax.f32 %v135_v6, %v233_v9  ;;  %v235_v12 = vpop.f32.mrb[1].mxu1  ;;  %v4122_v6 = vld [vmem:[%s7038_s3 + $0x118] sm:$0xff]  ;;  %v6046_v7 = vpack.c.bf16 %v4111_v4, %v4109_v2  ;;  %v6167_v2 = vpack.c.bf16 %v4149_v56, %v4147_v55  ;;  %v6250_v56 = vpop.permute.xlu0 %451 }
  0xff   :  { %v6052_v9 = vpack.c.bf16 %v4122_v6, %v4120_v5  ;;  %v4121_v12 = vld [vmem:[%s7038_s3 + $0x110] sm:$0xff]  ;;  %v4151_v6 = vld [vmem:[%s7038_s3 + $0x1a0] sm:$0xff]  ;;  %v4182_v55 = vld [vmem:[%s7038_s3 + $0x238] sm:$0x1] }
 0x101   :  { %v140_v13 = vpop.f32.mrb[2].mxu0 }
 0x102   :  { %v142_v14 = vpop.f32.mrb[3].mxu0  ;;  %v238_v15 = vpop.f32.mrb[2].mxu1 }
 0x103   :  { %v243_v16 = vmax.f32 %v140_v13, %v238_v15  ;;  %v240_v17 = vpop.f32.mrb[3].mxu1  ;;  %v4124_v13 = vld [vmem:[%s7038_s3 + $0x128] sm:$0xff]  ;;  %v4126_v14 = vld [vmem:[%s7038_s3 + $0x138] sm:$0x1] }
 0x104   :  { %v6073_v17 = vpack.c.bf16 %v4126_v14, %v4124_v13  ;;  %v4164_v13 = vld [vmem:[%s7038_s3 + $0x1d8] sm:$0xff] }
 0x123   :  { %v333_v18 = vpop.f32.mrb[4].mxu0 }
 0x124   :  { %v342_v19 = vmax.f32 %v242_v11, %v333_v18  ;;  %v335_v20 = vpop.f32.mrb[5].mxu0  ;;  %v4119_v11 = vld [vmem:[%s7038_s3 + $0x100] sm:$0xff] }
 0x125   :  { %v433_v21 = vpop.f32.mrb[4].mxu1  ;;  %v6069_v15 = vpack.c.bf16 %v4121_v12, %v4119_v11  ;;  %v4123_v18 = vld [vmem:[%s7038_s3 + $0x120] sm:$0xff]  ;;  %v4134_v20 = vld [vmem:[%s7038_s3 + $0x148] sm:$0xff]  ;;  %v4153_v11 = vld [vmem:[%s7038_s3 + $0x1b0] sm:$0x1] }
 0x126   :  { %v442_v23 = vmax.f32 %v342_v19, %v433_v21  ;;  %v435_v27 = vpop.f32.mrb[5].mxu1  ;;  %v4125_v19 = vld [vmem:[%s7038_s3 + $0x130] sm:$0x1]  ;;  %v4136_v21 = vld [vmem:[%s7038_s3 + $0x158] sm:$0xff]  ;;  %v4162_v12 = vld [vmem:[%s7038_s3 + $0x1c8] sm:$0xff]  ;;  %v6187_v14 = vpack.c.bf16 %v4153_v11, %v4151_v6 }
 0x127   :  { %v338_v24 = vpop.f32.mrb[6].mxu0  ;;  %v6095_v27 = vpack.c.bf16 %v4136_v21, %v4134_v20  ;;  %v4166_v20 = vld [vmem:[%s7038_s3 + $0x1e8] sm:$0xff]  ;;  %v4168_v21 = vld [vmem:[%s7038_s3 + $0x1f8] sm:$0x1]  ;;  %v4181_v6 = vld [vmem:[%s7038_s3 + $0x230] sm:$0x1] }
 0x128   :  { %v454_v25 = vadd.f32 %v5918_v22, %v442_v23  ;;  %v5921_v26 = vmax.f32 %v243_v16, %v338_v24  ;;  %v340_v28 = vpop.f32.mrb[7].mxu0  ;;  %v6089_v23 = vpack.c.bf16 %v4125_v19, %v4123_v18  ;;  %v4133_v24 = vld [vmem:[%s7038_s3 + $0x140] sm:$0xff]  ;;  %v4163_v19 = vld [vmem:[%s7038_s3 + $0x1d0] sm:$0xff]  ;;  %v6214_v30 = vpack.c.bf16 %v4168_v21, %v4166_v20  ;;  %v4196_v20 = vld [vmem:[%s7038_s3 + $0x278] sm:$0x1] }
 0x129   :  { %v5923_v29 = vpop.f32.mrb[6].mxu1  ;;  %v4161_v18 = vld [vmem:[%s7038_s3 + $0x1c0] sm:$0xff] }
 0x12a   :  { %vm456_vm5 = vcmp.ge.f32.partialorder %v454_v25, 0.0  ;;  %v458_v33 = vmul.f32 0.01, %v454_v25  ;;  %v443_v34 = vmax.f32 %v5921_v26, %v5923_v29  ;;  %v440_v36 = vpop.f32.mrb[7].mxu1  ;;  %v4189_v29 = vld [vmem:[%s7038_s3 + $0x240] sm:$0xff] }
 0x12c   :  { %v5939_v37 = vsel %vm456_vm5, %v454_v25, %v458_v33  ;;  %v4135_v25 = vld [vmem:[%s7038_s3 + $0x150] sm:$0xff]  ;;  %v455_v11 = vadd.f32 %v6250_v56, %v443_v34 }
 0x12d   :  { %v886_v39 = vrot.slane %v5939_v37, 1  ;;  %v1204_v62 = vrot.slane %v5939_v37, 2  ;;  %v1371_v16 = vrot.slane %v5939_v37, 3  ;;  %v1538_v41 = vrot.slane %v5939_v37, 4  ;;  %v4191_v34 = vld [vmem:[%s7038_s3 + $0x250] sm:$0xff] }
 0x12e   :  { %v1705_v4 = vrot.slane %v5939_v37, 5  ;;  %vm457_vm7 = vcmp.ge.f32.partialorder %v455_v11, 0.0  ;;  %v6302_v21 = vpack.c.bf16 %v4191_v34, %v4189_v29  ;;  %v4210_v29 = vld [vmem:[%s7038_s3 + $0x2b8] sm:$0x1] }
 0x12f   :  { %4081 = vmatmul.mubr.msk.f32.vlgmr.msra.gmra.mrb[16].mxu0 %vm887_vm6, %v886_v39  ;;  %v6118_v39 = vpack.c.bf16 %v4135_v25, %v4133_v24  ;;  %v6210_v24 = vpack.c.bf16 %v4163_v19, %v4161_v18  ;;  %v1872_v25 = vrot.slane %v5939_v37, 6  ;;  %v459_v18 = vmul.f32 0.01, %v455_v11  ;;  %v4194_v19 = vld [vmem:[%s7038_s3 + $0x268] sm:$0xff] }
 0x130   :  { %4690 = vmatpush1.bf16.msra.mxu0 %v5941_v38  ;;  %1040 = vmatprep.mubr.f32.mxu0 %v5202_v59 }
 0x131   :  { %4693 = vmatprep.subr.msk.bf16.mxu0 %vm5900_vm4, %v5944_v40 }
 0x134   :  { %4696 = vmatpush1.bf16.msk.msra.mxu0 %vm5900_vm4, %v5960_v45 }
 0x135   :  { %4718 = vmatprep.subr.bf16.mxu0 %v5966_v46 }
 0x137   :  { %4084 = vmatmul.mubr.msk.f32.vlgmr.msra.gmra.mrb[16].mxu0 %vm887_vm6, %v5939_v37 }
 0x138   :  { %4720 = vmatpush1.bf16.msra.mxu0 %v5983_v51  ;;  %1277 = vmatprep.mubr.f32.mxu0 %v5202_v59 }
 0x139   :  { %4723 = vmatprep.subr.msk.bf16.mxu0 %vm5900_vm4, %v5986_v52 }
 0x13c   :  { %4726 = vmatpush1.bf16.msk.msra.mxu0 %vm5900_vm4, %v6003_v8 }
 0x13d   :  { %4738 = vmatprep.subr.bf16.mxu0 %v6009_v10 }
 0x13f   :  { %4101 = vmatmul.mubr.msk.f32.vlgmr.msra.gmra.mrb[16].mxu0 %vm887_vm6, %v1204_v62  ;;  %v4154_v62 = vld [vmem:[%s7038_s3 + $0x1b8] sm:$0x1] }
 0x140   :  { %4740 = vmatpush1.bf16.msra.mxu0 %v6026_v61  ;;  %1444 = vmatprep.mubr.f32.mxu0 %v5202_v59  ;;  %v6171_v5 = vpack.c.bf16 %v4154_v62, %v4152_v60  ;;  %v2039_v60 = vrot.slane %v5939_v37, 7  ;;  %v4190_v37 = vld [vmem:[%s7038_s3 + $0x248] sm:$0xff] }
 0x141   :  { %4743 = vmatprep.subr.msk.bf16.mxu0 %vm5900_vm4, %v6030_v1 }
 0x144   :  { %4746 = vmatpush1.bf16.msk.msra.mxu0 %vm5900_vm4, %v6046_v7 }
 0x145   :  { %4758 = vmatprep.subr.bf16.mxu0 %v6052_v9 }
 0x147   :  { %4115 = vmatmul.mubr.msk.f32.vlgmr.msra.gmra.mrb[16].mxu0 %vm887_vm6, %v1371_v16  ;;  %v6193_v16 = vpack.c.bf16 %v4164_v13, %v4162_v12  ;;  %v4192_v12 = vld [vmem:[%s7038_s3 + $0x258] sm:$0xff] }
 0x148   :  { %4760 = vmatpush1.bf16.msra.mxu0 %v6069_v15  ;;  %1611 = vmatprep.mubr.f32.mxu0 %v5202_v59  ;;  %v6285_v26 = vpack.c.bf16 %v4192_v12, %v4190_v37  ;;  %v4208_v12 = vld [vmem:[%s7038_s3 + $0x2a8] sm:$0xff] }
 0x149   :  { %4763 = vmatprep.subr.msk.bf16.mxu0 %vm5900_vm4, %v6073_v17 }
 0x14a   :  { %v6103_v28 = vpop.f32.mrb[8].mxu0 }
 0x14b   :  { %v553_v32 = vpop.f32.mrb[9].mxu0  ;;  %v6111_v33 = vpop.f32.mrb[8].mxu1 }
 0x14c   :  { %v658_v35 = vmax.f32 %v6103_v28, %v6111_v33  ;;  %v651_v36 = vpop.f32.mrb[9].mxu1  ;;  %4766 = vmatpush1.bf16.msk.msra.mxu0 %vm5900_vm4, %v6089_v23  ;;  %v4167_v32 = vld [vmem:[%s7038_s3 + $0x1f0] sm:$0x1] }
 0x14d   :  { %4778 = vmatprep.subr.bf16.mxu0 %v6095_v27  ;;  %v4176_v36 = vld [vmem:[%s7038_s3 + $0x208] sm:$0xff]  ;;  %v6230_v43 = vpack.c.bf16 %v4167_v32, %v4165_v31  ;;  %v4193_v31 = vld [vmem:[%s7038_s3 + $0x260] sm:$0xff]  ;;  %v4195_v32 = vld [vmem:[%s7038_s3 + $0x270] sm:$0x1] }
 0x14f   :  { %4129 = vmatmul.mubr.msk.f32.vlgmr.msra.gmra.mrb[16].mxu0 %vm887_vm6, %v1538_v41  ;;  %v6137_v49 = vpop.f32.mrb[10].mxu0  ;;  %v4178_v41 = vld [vmem:[%s7038_s3 + $0x218] sm:$0xff] }
 0x150   :  { %4780 = vmatpush1.bf16.msra.mxu0 %v6118_v39  ;;  %1778 = vmatprep.mubr.f32.mxu0 %v5202_v59  ;;  %v558_v53 = vpop.f32.mrb[11].mxu0  ;;  %v6143_v54 = vpop.f32.mrb[10].mxu1  ;;  %v6236_v44 = vpack.c.bf16 %v4178_v41, %v4176_v36  ;;  %v6313_v36 = vsel %vm457_vm7, %v455_v11, %v459_v18  ;;  %v4204_v41 = vld [vmem:[%s7038_s3 + $0x288] sm:$0xff] }
 0x151   :  { %4783 = vmatprep.subr.msk.bf16.mxu0 %vm5900_vm4, %v6122_v42  ;;  %v659_v57 = vmax.f32 %v6137_v49, %v6143_v54  ;;  %v656_v58 = vpop.f32.mrb[11].mxu1  ;;  %v4180_v53 = vld [vmem:[%s7038_s3 + $0x228] sm:$0xff]  ;;  %v2373_v33 = vrot.slane %v6313_v36, 1 }
 0x152   :  { %v6255_v58 = vpack.c.bf16 %v4177_v48, %v4175_v47  ;;  %v6259_v62 = vpack.c.bf16 %v4182_v55, %v4180_v53  ;;  %v4206_v47 = vld [vmem:[%s7038_s3 + $0x298] sm:$0xff]  ;;  %v6324_v48 = vpack.c.bf16 %v4195_v32, %v4193_v31  ;;  %v4209_v31 = vld [vmem:[%s7038_s3 + $0x2b0] sm:$0x1] }
 0x153   :  { %v6330_v55 = vpack.c.bf16 %v4206_v47, %v4204_v41 }
 0x154   :  { %4786 = vmatpush1.bf16.msk.msra.mxu0 %vm5900_vm4, %v6140_v50 }
 0x155   :  { %4798 = vmatprep.subr.bf16.mxu0 %v6148_v63 }
 0x157   :  { %4143 = vmatmul.mubr.msk.f32.vlgmr.msra.gmra.mrb[16].mxu0 %vm887_vm6, %v1705_v4  ;;  %v4179_v4 = vld [vmem:[%s7038_s3 + $0x220] sm:$0xff] }
 0x158   :  { %4800 = vmatpush1.bf16.msra.mxu0 %v6167_v2  ;;  %1945 = vmatprep.mubr.f32.mxu0 %v5202_v59  ;;  %v6279_v13 = vpack.c.bf16 %v4181_v6, %v4179_v4  ;;  %v4205_v4 = vld [vmem:[%s7038_s3 + $0x290] sm:$0xff] }
 0x159   :  { %4803 = vmatprep.subr.msk.bf16.mxu0 %vm5900_vm4, %v6171_v5 }
 0x15c   :  { %4806 = vmatpush1.bf16.msk.msra.mxu0 %vm5900_vm4, %v6187_v14 }
 0x15d   :  { %4818 = vmatprep.subr.bf16.mxu0 %v6193_v16 }
 0x15f   :  { %4157 = vmatmul.mubr.msk.f32.vlgmr.msra.gmra.mrb[16].mxu0 %vm887_vm6, %v1872_v25  ;;  %v6305_v25 = vpack.c.bf16 %v4196_v20, %v4194_v19  ;;  %v4207_v20 = vld [vmem:[%s7038_s3 + $0x2a0] sm:$0xff] }
 0x160   :  { %4820 = vmatpush1.bf16.msra.mxu0 %v6210_v24  ;;  %2112 = vmatprep.mubr.f32.mxu0 %v5202_v59  ;;  %v6380_v54 = vpack.c.bf16 %v4209_v31, %v4207_v20  ;;  %v4221_v31 = vld [vmem:[%s7038_s3 + $0x2e0] sm:$0xff] }
 0x161   :  { %4823 = vmatprep.subr.msk.bf16.mxu0 %vm5900_vm4, %v6214_v30 }
 0x164   :  { %4826 = vmatpush1.bf16.msk.msra.mxu0 %vm5900_vm4, %v6230_v43 }
 0x165   :  { %4838 = vmatprep.subr.bf16.mxu0 %v6236_v44 }
 0x167   :  { %4171 = vmatmul.mubr.msk.f32.vlgmr.msra.gmra.mrb[16].mxu0 %vm887_vm6, %v2039_v60  ;;  %v4203_v60 = vld [vmem:[%s7038_s3 + $0x280] sm:$0xff] }
 0x168   :  { %4840 = vmatpush1.bf16.msra.mxu0 %v6255_v58  ;;  %2279 = vmatprep.mubr.f32.mxu0 %v5202_v59  ;;  %v6350_v19 = vpack.c.bf16 %v4205_v4, %v4203_v60  ;;  %v4220_v60 = vld [vmem:[%s7038_s3 + $0x2d8] sm:$0xff] }
 0x169   :  { %4843 = vmatprep.subr.msk.bf16.mxu0 %vm5900_vm4, %v6259_v62 }
 0x16c   :  { %4846 = vmatpush1.bf16.msk.msra.mxu0 %vm5900_vm4, %v6279_v13 }
 0x16d   :  { %4858 = vmatprep.subr.bf16.mxu0 %v6285_v26 }
 0x16f   :  { %4185 = vmatmul.mubr.msk.f32.vlgmr.msra.gmra.mrb[16].mxu0 %vm887_vm6, %v6313_v36 }
 0x170   :  { %4860 = vmatpush1.bf16.msra.mxu0 %v6302_v21  ;;  %2446 = vmatprep.mubr.f32.mxu0 %v5202_v59 }
 0x171   :  { %v749_v53 = vpop.f32.mrb[12].mxu0  ;;  %4863 = vmatprep.subr.msk.bf16.mxu0 %vm5900_vm4, %v6305_v25 }
 0x172   :  { %v758_v6 = vmax.f32 %v658_v35, %v749_v53  ;;  %v751_v11 = vpop.f32.mrb[13].mxu0  ;;  %v849_v37 = vpop.f32.mrb[12].mxu1  ;;  %v6354_v35 = vpack.c.bf16 %v4210_v29, %v4208_v12  ;;  %v4218_v53 = vld [vmem:[%s7038_s3 + $0x2c8] sm:$0xff] }
 0x173   :  { %v851_v34 = vpop.f32.mrb[13].mxu1  ;;  %v4217_v11 = vld [vmem:[%s7038_s3 + $0x2c0] sm:$0xff]  ;;  %v4222_v29 = vld [vmem:[%s7038_s3 + $0x2e8] sm:$0xff] }
 0x174   :  { %v858_v18 = vmax.f32 %v758_v6, %v849_v37  ;;  %4866 = vmatpush1.bf16.msk.msra.mxu0 %vm5900_vm4, %v6324_v48  ;;  %v4219_v37 = vld [vmem:[%s7038_s3 + $0x2d0] sm:$0xff]  ;;  %v4224_v34 = vld [vmem:[%s7038_s3 + $0x2f8] sm:$0x1] }
 0x175   :  { %v754_v28 = vpop.f32.mrb[14].mxu0  ;;  %4878 = vmatprep.subr.bf16.mxu0 %v6330_v55  ;;  %v6411_v20 = vpack.c.bf16 %v4224_v34, %v4222_v29  ;;  %v4235_v34 = vld [vmem:[%s7038_s3 + $0x320] sm:$0xff] }
 0x176   :  { %v860_v32 = vadd.f32 %v858_v18, %v5918_v22  ;;  %v6366_v41 = vmax.f32 %v659_v57, %v754_v28  ;;  %v6368_v47 = vpop.f32.mrb[14].mxu1  ;;  %v756_v4 = vpop.f32.mrb[15].mxu0  ;;  %v6386_v57 = vpack.c.bf16 %v4220_v60, %v4218_v53  ;;  %v6406_v28 = vpack.c.bf16 %v4219_v37, %v4217_v11  ;;  %v4232_v53 = vld [vmem:[%s7038_s3 + $0x308] sm:$0xff]  ;;  %v4234_v60 = vld [vmem:[%s7038_s3 + $0x318] sm:$0xff] }
 0x177   :  { %4199 = vmatmul.mubr.msk.f32.vlgmr.msra.gmra.mrb[16].mxu0 %vm887_vm6, %v2373_v33  ;;  %v856_v6 = vpop.f32.mrb[15].mxu1  ;;  %v2540_v33 = vrot.slane %v6313_v36, 2  ;;  %v4238_v11 = vld [vmem:[%s7038_s3 + $0x338] sm:$0x1] }
 0x178   :  { %vm862_vm8 = vcmp.ge.f32.partialorder %v860_v32, 0.0  ;;  %v864_v22 = vmul.f32 0.01, %v860_v32  ;;  %v859_v49 = vmax.f32 %v6366_v41, %v6368_v47  ;;  %4880 = vmatpush1.bf16.msra.mxu0 %v6350_v19  ;;  %2613 = vmatprep.mubr.f32.mxu0 %v5202_v59  ;;  %v4231_v6 = vld [vmem:[%s7038_s3 + $0x300] sm:$0xff] }
 0x179   :  { %4883 = vmatprep.subr.msk.bf16.mxu0 %vm5900_vm4, %v6354_v35 }
 0x17a   :  { %v6394_v12 = vsel %vm862_vm8, %v860_v32, %v864_v22  ;;  %v4223_v32 = vld [vmem:[%s7038_s3 + $0x2f0] sm:$0x1]  ;;  %v4236_v22 = vld [vmem:[%s7038_s3 + $0x328] sm:$0xff] }
 0x17b   :  { %v1048_v18 = vrot.slane %v6394_v12, 1  ;;  %v6432_v4 = vpack.c.bf16 %v4223_v32, %v4221_v31  ;;  %v6465_v29 = vpack.c.bf16 %v4238_v11, %v4236_v22  ;;  %v4245_v32 = vld [vmem:[%s7038_s3 + $0x340] sm:$0xff]  ;;  %v4251_v11 = vld [vmem:[%s7038_s3 + $0x370] sm:$0x1] }
 0x17c   :  { %4886 = vmatpush1.bf16.msk.msra.mxu0 %vm5900_vm4, %v6380_v54 }
 0x17d   :  { %4087 = vmatmul.mubr.msk.f32.vlgmr.msra.gmra.mrb[16].mxu1 %vm887_vm6, %v1048_v18  ;;  %4898 = vmatprep.subr.bf16.mxu0 %v6386_v57  ;;  %v4246_v18 = vld [vmem:[%s7038_s3 + $0x348] sm:$0xff] }
 0x17e   :  { %4710 = vmatpush1.bf16.msra.mxu1 %v5941_v38  ;;  %1188 = vmatprep.mubr.f32.mxu1 %v5202_v59  ;;  %v6438_v38 = vpack.c.bf16 %v4234_v60, %v4232_v53  ;;  %v4250_v53 = vld [vmem:[%s7038_s3 + $0x368] sm:$0xff]  ;;  %v4252_v60 = vld [vmem:[%s7038_s3 + $0x378] sm:$0x1] }
 0x17f   :  { %4713 = vmatprep.subr.msk.bf16.mxu1 %vm5900_vm4, %v5944_v40  ;;  %4213 = vmatmul.mubr.msk.f32.vlgmr.msra.gmra.mrb[16].mxu0 %vm887_vm6, %v2540_v33  ;;  %v4233_v40 = vld [vmem:[%s7038_s3 + $0x310] sm:$0xff]  ;;  %v4248_v33 = vld [vmem:[%s7038_s3 + $0x358] sm:$0xff]  ;;  %v6519_v22 = vpack.c.bf16 %v4252_v60, %v4250_v53 }
 0x180   :  { %4900 = vmatpush1.bf16.msra.mxu0 %v6406_v28  ;;  %2780 = vmatprep.mubr.f32.mxu0 %v5202_v59  ;;  %v6459_v37 = vpack.c.bf16 %v4233_v40, %v4231_v6  ;;  %v1286_v6 = vrot.slane %v6394_v12, 2 }
 0x181   :  { %4903 = vmatprep.subr.msk.bf16.mxu0 %vm5900_vm4, %v6411_v20 }
 0x182   :  { %4716 = vmatpush1.bf16.msk.msra.mxu1 %vm5900_vm4, %v5960_v45  ;;  %v2707_v45 = vrot.slane %v6313_v36, 3 }
 0x183   :  { %4728 = vmatprep.subr.bf16.mxu1 %v5966_v46  ;;  %v4237_v46 = vld [vmem:[%s7038_s3 + $0x330] sm:$0x1] }
 0x184   :  { %4906 = vmatpush1.bf16.msk.msra.mxu0 %vm5900_vm4, %v6432_v4  ;;  %v6486_v31 = vpack.c.bf16 %v4237_v46, %v4235_v34  ;;  %v4262_v34 = vld [vmem:[%s7038_s3 + $0x398] sm:$0xff] }
 0x185   :  { %4090 = vmatmul.mubr.msk.f32.vlgmr.msra.gmra.mrb[16].mxu1 %vm887_vm6, %v6394_v12  ;;  %4918 = vmatprep.subr.bf16.mxu0 %v6438_v38 }
 0x186   :  { %4730 = vmatpush1.bf16.msra.mxu1 %v5983_v51  ;;  %1353 = vmatprep.mubr.f32.mxu1 %v5202_v59  ;;  %v6492_v51 = vpack.c.bf16 %v4248_v33, %v4246_v18  ;;  %v4259_v18 = vld [vmem:[%s7038_s3 + $0x380] sm:$0xff]  ;;  %v4264_v33 = vld [vmem:[%s7038_s3 + $0x3a8] sm:$0xff] }
 0x187   :  { %4733 = vmatprep.subr.msk.bf16.mxu1 %vm5900_vm4, %v5986_v52  ;;  %4227 = vmatmul.mubr.msk.f32.vlgmr.msra.gmra.mrb[16].mxu0 %vm887_vm6, %v2707_v45  ;;  %v4247_v52 = vld [vmem:[%s7038_s3 + $0x350] sm:$0xff]  ;;  %v4260_v45 = vld [vmem:[%s7038_s3 + $0x388] sm:$0xff] }
 0x188   :  { %4920 = vmatpush1.bf16.msra.mxu0 %v6459_v37  ;;  %2947 = vmatprep.mubr.f32.mxu0 %v5202_v59  ;;  %v6514_v40 = vpack.c.bf16 %v4247_v52, %v4245_v32  ;;  %v4266_v32 = vld [vmem:[%s7038_s3 + $0x3b8] sm:$0x1]  ;;  %v1453_v52 = vrot.slane %v6394_v12, 3 }
 0x189   :  { %4923 = vmatprep.subr.msk.bf16.mxu0 %vm5900_vm4, %v6465_v29  ;;  %v6573_v60 = vpack.c.bf16 %v4266_v32, %v4264_v33 }
 0x18a   :  { %4736 = vmatpush1.bf16.msk.msra.mxu1 %vm5900_vm4, %v6003_v8  ;;  %v2874_v8 = vrot.slane %v6313_v36, 4 }
 0x18b   :  { %4748 = vmatprep.subr.bf16.mxu1 %v6009_v10  ;;  %v4249_v10 = vld [vmem:[%s7038_s3 + $0x360] sm:$0xff] }
 0x18c   :  { %4926 = vmatpush1.bf16.msk.msra.mxu0 %vm5900_vm4, %v6486_v31  ;;  %v6540_v46 = vpack.c.bf16 %v4251_v11, %v4249_v10  ;;  %v4276_v10 = vld [vmem:[%s7038_s3 + $0x3d8] sm:$0xff] }
 0x18d   :  { %4104 = vmatmul.mubr.msk.f32.vlgmr.msra.gmra.mrb[16].mxu1 %vm887_vm6, %v1286_v6  ;;  %4938 = vmatprep.subr.bf16.mxu0 %v6492_v51  ;;  %v4265_v6 = vld [vmem:[%s7038_s3 + $0x3b0] sm:$0x1] }
 0x18e   :  { %4750 = vmatpush1.bf16.msra.mxu1 %v6026_v61  ;;  %1520 = vmatprep.mubr.f32.mxu1 %v5202_v59  ;;  %v6546_v61 = vpack.c.bf16 %v4262_v34, %v4260_v45  ;;  %v4273_v45 = vld [vmem:[%s7038_s3 + $0x3c0] sm:$0xff]  ;;  %v4278_v34 = vld [vmem:[%s7038_s3 + $0x3e8] sm:$0xff] }
 0x18f   :  { %4753 = vmatprep.subr.msk.bf16.mxu1 %vm5900_vm4, %v6030_v1  ;;  %4241 = vmatmul.mubr.msk.f32.vlgmr.msra.gmra.mrb[16].mxu0 %vm887_vm6, %v2874_v8  ;;  %v4261_v1 = vld [vmem:[%s7038_s3 + $0x390] sm:$0xff]  ;;  %v4274_v8 = vld [vmem:[%s7038_s3 + $0x3c8] sm:$0xff] }
 0x190   :  { %4940 = vmatpush1.bf16.msra.mxu0 %v6514_v40  ;;  %3114 = vmatprep.mubr.f32.mxu0 %v5202_v59  ;;  %v6568_v53 = vpack.c.bf16 %v4261_v1, %v4259_v18  ;;  %v4280_v18 = vld [vmem:[%s7038_s3 + $0x3f8] sm:$0x1]  ;;  %v1620_v1 = vrot.slane %v6394_v12, 4 }
 0x191   :  { %4943 = vmatprep.subr.msk.bf16.mxu0 %vm5900_vm4, %v6519_v22  ;;  %v6627_v32 = vpack.c.bf16 %v4280_v18, %v4278_v34 }
 0x192   :  { %4756 = vmatpush1.bf16.msk.msra.mxu1 %vm5900_vm4, %v6046_v7  ;;  %v3041_v7 = vrot.slane %v6313_v36, 5 }
 0x193   :  { %4768 = vmatprep.subr.bf16.mxu1 %v6052_v9  ;;  %v4263_v9 = vld [vmem:[%s7038_s3 + $0x3a0] sm:$0xff] }
 0x194   :  { %4946 = vmatpush1.bf16.msk.msra.mxu0 %vm5900_vm4, %v6540_v46  ;;  %v6594_v11 = vpack.c.bf16 %v4265_v6, %v4263_v9  ;;  %v3551_v9 = vld [vmem:[%s7040_s5 + $0x88] sm:$0xff] }
 0x195   :  { %4118 = vmatmul.mubr.msk.f32.vlgmr.msra.gmra.mrb[16].mxu1 %vm887_vm6, %v1453_v52  ;;  %4958 = vmatprep.subr.bf16.mxu0 %v6546_v61  ;;  %v4279_v52 = vld [vmem:[%s7038_s3 + $0x3f0] sm:$0x1] }
 0x196   :  { %4770 = vmatpush1.bf16.msra.mxu1 %v6069_v15  ;;  %1687 = vmatprep.mubr.f32.mxu1 %v5202_v59  ;;  %v6600_v15 = vpack.c.bf16 %v4276_v10, %v4274_v8  ;;  %v3534_v8 = vld [vmem:[%s7040_s5] sm:$0xff]  ;;  %v3552_v10 = vld [vmem:[%s7040_s5 + $0x90] sm:$0xff] }
 0x197   :  { %4773 = vmatprep.subr.msk.bf16.mxu1 %vm5900_vm4, %v6073_v17  ;;  %4255 = vmatmul.mubr.msk.f32.vlgmr.msra.gmra.mrb[16].mxu0 %vm887_vm6, %v3041_v7  ;;  %v4275_v17 = vld [vmem:[%s7038_s3 + $0x3d0] sm:$0xff]  ;;  %v3550_v7 = vld [vmem:[%s7040_s5 + $0x80] sm:$0xff] }
 0x198   :  { %4960 = vmatpush1.bf16.msra.mxu0 %v6568_v53  ;;  %3281 = vmatprep.mubr.f32.mxu0 %v5202_v59  ;;  %v6622_v33 = vpack.c.bf16 %v4275_v17, %v4273_v45  ;;  %v3553_v45 = vld [vmem:[%s7040_s5 + $0x98] sm:$0xff]  ;;  %v1787_v17 = vrot.slane %v6394_v12, 5 }
 0x199   :  { %4963 = vmatprep.subr.msk.bf16.mxu0 %vm5900_vm4, %v6573_v60  ;;  %v6681_v18 = vpack.c.bf16 %v3553_v45, %v3552_v10  ;;  %v3540_v10 = vld [vmem:[%s7040_s5 + $0x30] sm:$0xff]  ;;  %v3558_v45 = vld [vmem:[%s7040_s5 + $0xc0] sm:$0xff] }
 0x19a   :  { %4776 = vmatpush1.bf16.msk.msra.mxu1 %vm5900_vm4, %v6089_v23  ;;  %v3208_v23 = vrot.slane %v6313_v36, 6 }
 0x19b   :  { %4788 = vmatprep.subr.bf16.mxu1 %v6095_v27  ;;  %v4277_v27 = vld [vmem:[%s7038_s3 + $0x3e0] sm:$0xff] }
 0x19c   :  { %4966 = vmatpush1.bf16.msk.msra.mxu0 %vm5900_vm4, %v6594_v11  ;;  %v6648_v6 = vpack.c.bf16 %v4279_v52, %v4277_v27  ;;  %v3538_v52 = vld [vmem:[%s7040_s5 + $0x20] sm:$0xff] }
 0x19d   :  { %4132 = vmatmul.mubr.msk.f32.vlgmr.msra.gmra.mrb[16].mxu1 %vm887_vm6, %v1620_v1  ;;  %4978 = vmatprep.subr.bf16.mxu0 %v6600_v15  ;;  %v3537_v1 = vld [vmem:[%s7040_s5 + $0x18] sm:$0xff] }
 0x19e   :  { %4790 = vmatpush1.bf16.msra.mxu1 %v6118_v39  ;;  %1854 = vmatprep.mubr.f32.mxu1 %v5202_v59  ;;  %v6654_v39 = vpack.c.bf16 %v3551_v9, %v3550_v7  ;;  %v3539_v7 = vld [vmem:[%s7040_s5 + $0x28] sm:$0xff]  ;;  %v3557_v9 = vld [vmem:[%s7040_s5 + $0xb8] sm:$0xff] }
 0x19f   :  { %4793 = vmatprep.subr.msk.bf16.mxu1 %vm5900_vm4, %v6122_v42  ;;  %4269 = vmatmul.mubr.msk.f32.vlgmr.msra.gmra.mrb[16].mxu0 %vm887_vm6, %v3208_v23  ;;  %v3535_v42 = vld [vmem:[%s7040_s5 + $0x8] sm:$0xff] }
 0x1a0   :  { %4980 = vmatpush1.bf16.msra.mxu0 %v6622_v33  ;;  %3448 = vmatprep.mubr.f32.mxu0 %v5202_v59  ;;  %v6676_v34 = vpack.c.bf16 %v3535_v42, %v3534_v8  ;;  %v3555_v23 = vld [vmem:[%s7040_s5 + $0xa8] sm:$0xff]  ;;  %v1954_v8 = vrot.slane %v6394_v12, 6  ;;  %v6725_v42 = vpack.c.bf16 %v3539_v7, %v3538_v52  ;;  %v861_v52 = vadd.f32 %v859_v49, %v6250_v56 }
 0x1a1   :  { %4983 = vmatprep.subr.msk.bf16.mxu0 %vm5900_vm4, %v6627_v32  ;;  %v3547_v49 = vld [vmem:[%s7040_s5 + $0x68] sm:$0xff] }
 0x1a2   :  { %4796 = vmatpush1.bf16.msk.msra.mxu1 %vm5900_vm4, %v6140_v50  ;;  %v3375_v50 = vrot.slane %v6313_v36, 7  ;;  %v3554_v36 = vld [vmem:[%s7040_s5 + $0xa0] sm:$0xff]  ;;  %v865_v56 = vmul.f32 0.01, %v861_v52  ;;  %vm863_vm9 = vcmp.ge.f32.partialorder %v861_v52, 0.0 }
 0x1a3   :  { %4808 = vmatprep.subr.bf16.mxu1 %v6148_v63  ;;  %v3536_v63 = vld [vmem:[%s7040_s5 + $0x10] sm:$0xff] }
 0x1a4   :  { %4986 = vmatpush1.bf16.msk.msra.mxu0 %vm5900_vm4, %v6648_v6  ;;  %v6702_v27 = vpack.c.bf16 %v3537_v1, %v3536_v63  ;;  %v3542_v63 = vld [vmem:[%s7040_s5 + $0x40] sm:$0xff]  ;;  %v3543_v1 = vld [vmem:[%s7040_s5 + $0x48] sm:$0xff] }
 0x1a5   :  { %4146 = vmatmul.mubr.msk.f32.vlgmr.msra.gmra.mrb[16].mxu1 %vm887_vm6, %v1787_v17  ;;  %4998 = vmatprep.subr.bf16.mxu0 %v6654_v39  ;;  %v3559_v17 = vld [vmem:[%s7040_s5 + $0xc8] sm:$0xff] }
 0x1a6   :  { %4810 = vmatpush1.bf16.msra.mxu1 %v6167_v2  ;;  %2021 = vmatprep.mubr.f32.mxu1 %v5202_v59  ;;  %v6705_v2 = vpack.c.bf16 %v3555_v23, %v3554_v36  ;;  %v3561_v36 = vld [vmem:[%s7040_s5 + $0xd8] sm:$0xff]  ;;  %v2121_v23 = vrot.slane %v6394_v12, 7 }
 0x1a7   :  { %4813 = vmatprep.subr.msk.bf16.mxu1 %vm5900_vm4, %v6171_v5  ;;  %4283 = vmatmul.mubr.msk.f32.vlgmr.msra.gmra.mrb[16].mxu0 %vm887_vm6, %v3375_v50  ;;  %v3556_v5 = vld [vmem:[%s7040_s5 + $0xb0] sm:$0xff]  ;;  %v3545_v12 = vld [vmem:[%s7040_s5 + $0x58] sm:$0xff] }
 0x1a8   :  { %5000 = vmatpush3.bf16.msra.mxu0 %v6676_v34 }
 0x1a9   :  { %5002 = vmatprep.subr.bf16.mxu0 %v6681_v18 }
 0x1aa   :  { %4816 = vmatpush1.bf16.msk.msra.mxu1 %vm5900_vm4, %v6187_v14  ;;  %v6729_v14 = vpack.c.bf16 %v3557_v9, %v3556_v5  ;;  %v3577_v5 = vld [vmem:[%s7042_s7 + $0x50] sm:$0xff]  ;;  %v3578_v9 = vld [vmem:[%s7042_s7 + $0x58] sm:$0xff] }
 0x1ab   :  { %4828 = vmatprep.subr.bf16.mxu1 %v6193_v16  ;;  %v3541_v16 = vld [vmem:[%s7040_s5 + $0x38] sm:$0xff] }
 0x1ac   :  { %5004 = vmatpush3.bf16.msra.mxu0 %v6702_v27  ;;  %v6749_v50 = vpack.c.bf16 %v3541_v16, %v3540_v10  ;;  %v3585_v10 = vlaneseq }
 0x1ad   :  { %4160 = vmatmul.mubr.msk.f32.vlgmr.msra.gmra.mrb[16].mxu1 %vm887_vm6, %v1954_v8  ;;  %5006 = vmatprep.subr.bf16.mxu0 %v6705_v2  ;;  %v6965_v8 = vpack.c.bf16 %v3578_v9, %v3577_v5 }
 0x1ae   :  { %4830 = vmatpush1.bf16.msra.mxu1 %v6210_v24  ;;  %2188 = vmatprep.mubr.f32.mxu1 %v5202_v59  ;;  %v6752_v24 = vpack.c.bf16 %v3559_v17, %v3558_v45  ;;  %v3586_v16 = vshrl.u32 %v3585_v10, 7  ;;  %v3533_v17 = vld [vmem:[%s7039_s4] sm:$0x3] }
 0x1af   :  { %4833 = vmatprep.subr.msk.bf16.mxu1 %vm5900_vm4, %v6214_v30  ;;  %v3560_v30 = vld [vmem:[%s7040_s5 + $0xd0] sm:$0xff] }
 0x1b0   :  { %5008 = vmatpush3.bf16.msra.mxu0 %v6725_v42  ;;  %v6780_v7 = vpack.c.bf16 %v3561_v36, %v3560_v30  ;;  %v3587_v45 = vsub.s32 0, %v3586_v16 }
 0x1b1   :  { %5010 = vmatprep.subr.bf16.mxu0 %v6729_v14 }
 0x1b2   :  { %4836 = vmatpush1.bf16.msk.msra.mxu1 %vm5900_vm4, %v6230_v43  ;;  %v6776_v43 = vpack.c.bf16 %v3543_v1, %v3542_v63  ;;  %v3591_v63 = vsub.s32 1, %v3586_v16  ;;  %v3588_v1 = vrot.slane %v3533_v17, %v3587_v45 }
 0x1b3   :  { %4848 = vmatprep.subr.bf16.mxu1 %v6236_v44  ;;  %v3544_v44 = vld [vmem:[%s7040_s5 + $0x50] sm:$0xff] }
 0x1b4   :  { %5012 = vmatpush3.bf16.msra.mxu0 %v6749_v50  ;;  %v6794_v41 = vpack.c.bf16 %v3545_v12, %v3544_v44  ;;  %v3592_v30 = vrot.slane %v3533_v17, %v3591_v63 }
 0x1b5   :  { %4174 = vmatmul.mubr.msk.f32.vlgmr.msra.gmra.mrb[16].mxu1 %vm887_vm6, %v2121_v23  ;;  %5014 = vmatprep.subr.bf16.mxu0 %v6752_v24 }
 0x1b6   :  { %4850 = vmatpush1.bf16.msra.mxu1 %v6255_v58  ;;  %2355 = vmatprep.mubr.f32.mxu1 %v5202_v59  ;;  %v867_v58 = vsel %vm863_vm9, %v861_v52, %v865_v56 }
 0x1b7   :  { %4853 = vmatprep.subr.msk.bf16.mxu1 %vm5900_vm4, %v6259_v62  ;;  %v2455_v62 = vrot.slane %v867_v58, 1 }
 0x1b8   :  { %5016 = vmatpush3.bf16.msra.mxu0 %v6776_v43 }
 0x1b9   :  { %5018 = vmatprep.subr.bf16.mxu0 %v6780_v7 }
 0x1ba   :  { %4856 = vmatpush1.bf16.msk.msra.mxu1 %vm5900_vm4, %v6279_v13  ;;  %v2622_v13 = vrot.slane %v867_v58, 2 }
 0x1bb   :  { %4868 = vmatprep.subr.bf16.mxu1 %v6285_v26  ;;  %v2789_v26 = vrot.slane %v867_v58, 3 }
 0x1bc   :  { %5020 = vmatpush3.bf16.msra.mxu0 %v6794_v41 }
 0x1bd   :  { %4188 = vmatmul.mubr.msk.f32.vlgmr.msra.gmra.mrb[16].mxu1 %vm887_vm6, %v867_v58 }
 0x1be   :  { %4870 = vmatpush1.bf16.msra.mxu1 %v6302_v21  ;;  %2522 = vmatprep.mubr.f32.mxu1 %v5202_v59  ;;  %v2956_v21 = vrot.slane %v867_v58, 4 }
 0x1bf   :  { %4873 = vmatprep.subr.msk.bf16.mxu1 %vm5900_vm4, %v6305_v25  ;;  %v3123_v25 = vrot.slane %v867_v58, 5 }
 0x1c2   :  { %4876 = vmatpush1.bf16.msk.msra.mxu1 %vm5900_vm4, %v6324_v48  ;;  %v3290_v48 = vrot.slane %v867_v58, 6 }
 0x1c3   :  { %4888 = vmatprep.subr.bf16.mxu1 %v6330_v55  ;;  %v3457_v55 = vrot.slane %v867_v58, 7 }
 0x1c5   :  { %4202 = vmatmul.mubr.msk.f32.vlgmr.msra.gmra.mrb[16].mxu1 %vm887_vm6, %v2455_v62 }
 0x1c6   :  { %4890 = vmatpush1.bf16.msra.mxu1 %v6350_v19  ;;  %2689 = vmatprep.mubr.f32.mxu1 %v5202_v59  ;;  %v3562_v19 = vld [vmem:[%s7040_s5 + $0xe0] sm:$0xff] }
 0x1c7   :  { %4893 = vmatprep.subr.msk.bf16.mxu1 %vm5900_vm4, %v6354_v35  ;;  %v3563_v35 = vld [vmem:[%s7040_s5 + $0xe8] sm:$0xff] }
 0x1c8   :  { %v6879_v47 = vpack.c.bf16 %v3563_v35, %v3562_v19 }
 0x1ca   :  { %4896 = vmatpush1.bf16.msk.msra.mxu1 %vm5900_vm4, %v6380_v54  ;;  %v6887_v54 = vpack.c.bf16 %v3547_v49, %v3546_v0  ;;  %5022 = vmatprep.subr.bf16.mxu0 %v6879_v47 }
 0x1cb   :  { %4908 = vmatprep.subr.bf16.mxu1 %v6386_v57  ;;  %v3564_v57 = vld [vmem:[%s7040_s5 + $0xf0] sm:$0xff] }
 0x1cc   :  { %5024 = vmatpush3.bf16.msra.mxu0 %v6887_v54 }
 0x1cd   :  { %4216 = vmatmul.mubr.msk.f32.vlgmr.msra.gmra.mrb[16].mxu1 %vm887_vm6, %v2622_v13  ;;  %v3581_v13 = vld [vmem:[%s7042_s7 + $0x70] sm:$0xff] }
 0x1ce   :  { %4910 = vmatpush1.bf16.msra.mxu1 %v6406_v28  ;;  %2856 = vmatprep.mubr.f32.mxu1 %v5202_v59  ;;  %v3565_v28 = vld [vmem:[%s7040_s5 + $0xf8] sm:$0xff] }
 0x1cf   :  { %4913 = vmatprep.subr.msk.bf16.mxu1 %vm5900_vm4, %v6411_v20  ;;  %v3548_v20 = vld [vmem:[%s7040_s5 + $0x70] sm:$0xff] }
 0x1d2   :  { %4916 = vmatpush1.bf16.msk.msra.mxu1 %vm5900_vm4, %v6432_v4  ;;  %v6900_v4 = vpack.c.bf16 %v3565_v28, %v3564_v57 }
 0x1d3   :  { %4928 = vmatprep.subr.bf16.mxu1 %v6438_v38  ;;  %v3549_v38 = vld [vmem:[%s7040_s5 + $0x78] sm:$0xff] }
 0x1d4   :  { %5026 = vmatprep.subr.bf16.mxu0 %v6900_v4 }
 0x1d5   :  { %4230 = vmatmul.mubr.msk.f32.vlgmr.msra.gmra.mrb[16].mxu1 %vm887_vm6, %v2789_v26  ;;  %v3582_v26 = vld [vmem:[%s7042_s7 + $0x78] sm:$0xff] }
 0x1d6   :  { %4930 = vmatpush1.bf16.msra.mxu1 %v6459_v37  ;;  %3023 = vmatprep.mubr.f32.mxu1 %v5202_v59  ;;  %v6905_v37 = vpack.c.bf16 %v3549_v38, %v3548_v20 }
 0x1d7   :  { %4933 = vmatprep.subr.msk.bf16.mxu1 %vm5900_vm4, %v6465_v29  ;;  %v3567_v29 = vld [vmem:[%s7042_s7] sm:$0xff] }
 0x1d8   :  { %5028 = vmatpush3.bf16.msra.mxu0 %v6905_v37 }
 0x1d9   :  { %5054 = vmatprep.subr.bf16.mxu0 %v6654_v39 }
 0x1da   :  { %4936 = vmatpush1.bf16.msk.msra.mxu1 %vm5900_vm4, %v6486_v31  ;;  %v3568_v31 = vld [vmem:[%s7042_s7 + $0x8] sm:$0xff] }
 0x1db   :  { %4948 = vmatprep.subr.bf16.mxu1 %v6492_v51  ;;  %v3569_v51 = vld [vmem:[%s7042_s7 + $0x10] sm:$0xff] }
 0x1dd   :  { %4244 = vmatmul.mubr.msk.f32.vlgmr.msra.gmra.mrb[16].mxu1 %vm887_vm6, %v2956_v21  ;;  %v5051_v21 = vpack.c.bf16 %v3582_v26, %v3581_v13 }
 0x1de   :  { %4950 = vmatpush1.bf16.msra.mxu1 %v6514_v40  ;;  %3190 = vmatprep.mubr.f32.mxu1 %v5202_v59  ;;  %v6919_v40 = vpack.c.bf16 %v3568_v31, %v3567_v29 }
 0x1df   :  { %4953 = vmatprep.subr.msk.bf16.mxu1 %vm5900_vm4, %v6519_v22  ;;  %v3570_v22 = vld [vmem:[%s7042_s7 + $0x18] sm:$0xff] }
 0x1e2   :  { %4956 = vmatpush1.bf16.msk.msra.mxu1 %vm5900_vm4, %v6540_v46  ;;  %v6925_v46 = vpack.c.bf16 %v3570_v22, %v3569_v51 }
 0x1e3   :  { %4968 = vmatprep.subr.bf16.mxu1 %v6546_v61  ;;  %v3571_v61 = vld [vmem:[%s7042_s7 + $0x20] sm:$0xff] }
 0x1e5   :  { %4258 = vmatmul.mubr.msk.f32.vlgmr.msra.gmra.mrb[16].mxu1 %vm887_vm6, %v3123_v25 }
 0x1e6   :  { %4970 = vmatpush1.bf16.msra.mxu1 %v6568_v53  ;;  %3357 = vmatprep.mubr.f32.mxu1 %v5202_v59  ;;  %v3572_v53 = vld [vmem:[%s7042_s7 + $0x28] sm:$0xff] }
 0x1e7   :  { %4973 = vmatprep.subr.msk.bf16.mxu1 %vm5900_vm4, %v6573_v60  ;;  %v6935_v60 = vpack.c.bf16 %v3572_v53, %v3571_v61 }
 0x1ea   :  { %4976 = vmatpush1.bf16.msk.msra.mxu1 %vm5900_vm4, %v6594_v11  ;;  %v3573_v11 = vld [vmem:[%s7042_s7 + $0x30] sm:$0xff] }
 0x1eb   :  { %4988 = vmatprep.subr.bf16.mxu1 %v6600_v15  ;;  %v3574_v15 = vld [vmem:[%s7042_s7 + $0x38] sm:$0xff] }
 0x1ed   :  { %4272 = vmatmul.mubr.msk.f32.vlgmr.msra.gmra.mrb[16].mxu1 %vm887_vm6, %v3290_v48  ;;  %v3566_v48 = vld [vmem:[%s7041_s6] sm:$0x1] }
 0x1ee   :  { %4990 = vmatpush1.bf16.msra.mxu1 %v6622_v33  ;;  %3524 = vmatprep.mubr.f32.mxu1 %v5202_v59  ;;  %v6945_v33 = vpack.c.bf16 %v3574_v15, %v3573_v11 }
 0x1ef   :  { %4993 = vmatprep.subr.msk.bf16.mxu1 %vm5900_vm4, %v6627_v32  ;;  %v3575_v32 = vld [vmem:[%s7042_s7 + $0x40] sm:$0xff] }
 0x1f2   :  { %4996 = vmatpush1.bf16.msk.msra.mxu1 %vm5900_vm4, %v6648_v6  ;;  %v3576_v6 = vld [vmem:[%s7042_s7 + $0x48] sm:$0xff] }
 0x1f3   :  { %5029 = vmatprep.subr.bf16.mxu1 %v5200_v3  ;;  %v6955_v39 = vpack.c.bf16 %v3576_v6, %v3575_v32 }
 0x1f5   :  { %4286 = vmatmul.mubr.msk.f32.vlgmr.msra.gmra.mrb[16].mxu1 %vm887_vm6, %v3457_v55 }
 0x1f6   :  { %5031 = vmatpush3.bf16.msra.mxu1 %v6919_v40  ;;  %4423 = vmatprep.mubr.msk.f32.mxu1 %vm5204_vm14, %v5202_v59 }
 0x1f7   :  { %5032 = vmatprep.subr.bf16.mxu1 %v5200_v3 }
 0x1fa   :  { %5034 = vmatpush3.bf16.msra.mxu1 %v6925_v46 }
 0x1fb   :  { %5035 = vmatprep.subr.bf16.mxu1 %v5200_v3 }
 0x1fe   :  { %5037 = vmatpush3.bf16.msra.mxu1 %v6935_v60 }
 0x1ff   :  { %5038 = vmatprep.subr.bf16.mxu1 %v5200_v3 }
 0x202   :  { %5040 = vmatpush3.bf16.msra.mxu1 %v6945_v33 }
 0x203   :  { %5041 = vmatprep.subr.bf16.mxu1 %v5200_v3 }
 0x206   :  { %5043 = vmatpush3.bf16.msra.mxu1 %v6955_v39 }
 0x207   :  { %5044 = vmatprep.subr.bf16.mxu1 %v5200_v3 }
 0x20a   :  { %5046 = vmatpush3.bf16.msra.mxu1 %v6965_v8 }
 0x20b   :  { %5047 = vmatprep.subr.bf16.mxu1 %v5200_v3 }
 0x27a   :  { %v3450_v36 = vpop.f32.mrb[16].mxu0 }
 0x27b   :  { %v3595_v23 = vadd.f32 %v3588_v1, %v3450_v36  ;;  %v3452_v52 = vpop.f32.mrb[17].mxu0 }
 0x27c   :  { %v3596_v44 = vadd.f32 %v3592_v30, %v3452_v52 }
 0x27d   :  { %v3599_v12 = vmul.f32 0.01, %v3595_v23  ;;  %vm3597_vm10 = vcmp.ge.f32.partialorder %v3595_v23, 0.0 }
 0x27e   :  { %v3600_v56 = vmul.f32 0.01, %v3596_v44  ;;  %vm3598_vm11 = vcmp.ge.f32.partialorder %v3596_v44, 0.0 }
 0x27f   :  { %v3601_v62 = vsel %vm3597_vm10, %v3595_v23, %v3599_v12 }
 0x280   :  { %v3602_v58 = vsel %vm3598_vm11, %v3596_v44, %v3600_v56 }
 0x281   :  { %3667 = vmatprep.mubr.f32.mxu0 %v3602_v58 }
 0x282   :  { %3668 = vmatmul.mubr.f32.vlgmr.msra.gmra.mrb[18].mxu0 %v3601_v62 }
 0x283   :  { %5056 = vmatpush3.bf16.msra.mxu0 %v6676_v34 }
 0x284   :  { %5058 = vmatprep.subr.bf16.mxu0 %v6681_v18 }
 0x287   :  { %5060 = vmatpush3.bf16.msra.mxu0 %v6702_v27 }
 0x288   :  { %5062 = vmatprep.subr.bf16.mxu0 %v6705_v2 }
 0x28b   :  { %5064 = vmatpush3.bf16.msra.mxu0 %v6725_v42 }
 0x28c   :  { %5066 = vmatprep.subr.bf16.mxu0 %v6729_v14 }
 0x28f   :  { %5068 = vmatpush3.bf16.msra.mxu0 %v6749_v50 }
 0x290   :  { %5070 = vmatprep.subr.bf16.mxu0 %v6752_v24 }
 0x293   :  { %5072 = vmatpush3.bf16.msra.mxu0 %v6776_v43  ;;  %v3579_v43 = vld [vmem:[%s7042_s7 + $0x60] sm:$0xff] }
 0x294   :  { %5074 = vmatprep.subr.bf16.mxu0 %v6780_v7  ;;  %v3580_v7 = vld [vmem:[%s7042_s7 + $0x68] sm:$0xff] }
 0x297   :  { %5076 = vmatpush3.bf16.msra.mxu0 %v6794_v41  ;;  %v5048_v41 = vpack.c.bf16 %v3580_v7, %v3579_v43 }
 0x298   :  { %5078 = vmatprep.subr.bf16.mxu0 %v6879_v47 }
 0x299   :  { %5049 = vmatpush3.bf16.msra.mxu1 %v5048_v41 }
 0x29a   :  { %5050 = vmatprep.subr.bf16.mxu1 %v5200_v3 }
 0x29b   :  { %5080 = vmatpush3.bf16.msra.mxu0 %v6887_v54 }
 0x29c   :  { %5082 = vmatprep.subr.bf16.mxu0 %v6900_v4  ;;  %v3583_v4 = vld [vmem:[%s7043_s8] sm:$0x1] }
 0x29d   :  { %5052 = vmatpush3.bf16.msra.mxu1 %v5051_v21 }
 0x29e   :  { %5085 = vmatprep.subr.bf16.mxu1 %v5200_v3 }
 0x29f   :  { %5084 = vmatpush3.bf16.msra.mxu0 %v6905_v37 }
 0x2c8   :  { %v3526_v34 = vpop.f32.mrb[16].mxu1 }
 0x2c9   :  { %v3748_v18 = vadd.f32 %v3588_v1, %v3526_v34  ;;  %v3528_v27 = vpop.f32.mrb[17].mxu1 }
 0x2ca   :  { %v3749_v2 = vadd.f32 %v3592_v30, %v3528_v27 }
 0x2cb   :  { %v3752_v42 = vmul.f32 0.01, %v3748_v18  ;;  %vm3750_vm12 = vcmp.ge.f32.partialorder %v3748_v18, 0.0 }
 0x2cc   :  { %v3753_v14 = vmul.f32 0.01, %v3749_v2  ;;  %vm3751_vm13 = vcmp.ge.f32.partialorder %v3749_v2, 0.0 }
 0x2cd   :  { %v3754_v24 = vsel %vm3750_vm12, %v3748_v18, %v3752_v42 }
 0x2ce   :  { %v3755_v50 = vsel %vm3751_vm13, %v3749_v2, %v3753_v14 }
 0x2cf   :  { %3820 = vmatprep.mubr.f32.mxu0 %v3755_v50 }
 0x2d0   :  { %3821 = vmatmul.mubr.f32.vlgmr.msra.gmra.mrb[20].mxu0 %v3754_v24 }
 0x355   :  { %v4319_v25 = vpop.f32.mrb[18].mxu0 }
 0x356   :  { %v4320_v55 = vpop.f32.mrb[19].mxu0 }
 0x357   :  { %v4321_v19 = vadd.f32 %v4320_v55, %v4319_v25 }
 0x359   :  { %v3670_v35 = vadd.f32 %v4321_v19, %v3566_v48 }
 0x35b   :  { %v3674_v47 = vmul.f32 0.01, %v3670_v35  ;;  %vm3673_vm15 = vcmp.ge.f32.partialorder %v3670_v35, 0.0 }
 0x35d   :  { %v3675_v0 = vsel %vm3673_vm15, %v3670_v35, %v3674_v47 }
 0x35e   :  { %4424 = vmatmul.mubr.f32.vlgmr.msra.gmra.mrb[18].mxu1 %v3675_v0 }
 0x35f   :  { %5087 = vmatpush3.bf16.msra.mxu1 %v6919_v40  ;;  %4458 = vmatprep.mubr.msk.f32.mxu1 %vm5204_vm14, %v5202_v59 }
 0x360   :  { %5088 = vmatprep.subr.bf16.mxu1 %v5200_v3 }
 0x363   :  { %5090 = vmatpush3.bf16.msra.mxu1 %v6925_v46 }
 0x364   :  { %5091 = vmatprep.subr.bf16.mxu1 %v5200_v3 }
 0x367   :  { %5093 = vmatpush3.bf16.msra.mxu1 %v6935_v60 }
 0x368   :  { %5094 = vmatprep.subr.bf16.mxu1 %v5200_v3 }
 0x36b   :  { %5096 = vmatpush3.bf16.msra.mxu1 %v6945_v33 }
 0x36c   :  { %5097 = vmatprep.subr.bf16.mxu1 %v5200_v3 }
 0x36f   :  { %5099 = vmatpush3.bf16.msra.mxu1 %v6955_v39 }
 0x370   :  { %5100 = vmatprep.subr.bf16.mxu1 %v5200_v3 }
 0x373   :  { %5102 = vmatpush3.bf16.msra.mxu1 %v6965_v8 }
 0x374   :  { %5103 = vmatprep.subr.bf16.mxu1 %v5200_v3 }
 0x377   :  { %5105 = vmatpush3.bf16.msra.mxu1 %v5048_v41 }
 0x378   :  { %5106 = vmatprep.subr.bf16.mxu1 %v5200_v3 }
 0x37b   :  { %5108 = vmatpush3.bf16.msra.mxu1 %v5051_v21 }
 0x3a3   :  { %v4371_v59 = vpop.f32.mrb[20].mxu0 }
 0x3a4   :  { %v4372_v49 = vpop.f32.mrb[21].mxu0 }
 0x3a5   :  { %v4373_v54 = vadd.f32 %v4372_v49, %v4371_v59 }
 0x3a7   :  { %v3823_v57 = vadd.f32 %v4373_v54, %v3566_v48 }
 0x3a9   :  { %v3827_v28 = vmul.f32 0.01, %v3823_v57  ;;  %vm3826_vm0 = vcmp.ge.f32.partialorder %v3823_v57, 0.0 }
 0x3ab   :  { %v3828_v20 = vsel %vm3826_vm0, %v3823_v57, %v3827_v28 }
 0x3ac   :  { %4459 = vmatmul.mubr.f32.vlgmr.msra.gmra.mrb[20].mxu1 %v3828_v20 }
 0x431   :  { %v3742_v38 = vpop.f32.mrb[18].mxu1 }
 0x432   :  { %v3743_v37 = vadd.f32 %v3742_v38, %v3583_v4  ;;  %v4425_v29 = vpop.f32.mrb[19].mxu1 }
 0x434   :  { %3747 = vst.msk [vmem:[#allocation2] sm:$0x1] %vm3746_vm1, %v3743_v37 }
 0x47f   :  { %v3895_v3 = vpop.f32.mrb[20].mxu1 }
 0x480   :  { %v3896_v31 = vadd.f32 %v3895_v3, %v3583_v4  ;;  %v4460_v51 = vpop.f32.mrb[21].mxu1 }
 0x482   :  { %3899 = vst.msk [vmem:[#allocation2 + $0x1] sm:$0x1] %vm3746_vm1, %v3896_v31 }
 0x483   :  { %5187 = shalt.err (!%p5184_p4)
}
 0x484   :  { %s5188_s28 = scalar_lea.hbm %s7044_s9, 32 }
 0x485   :  { %p5189_p5 = scmp.ne.s32.totalorder %s7044_s9, %s5188_s28  ;;  %p5192_p6 = scmp.lt.u32.totalorder %s5188_s28, %s7044_s9 }
 0x487   :  { %p5194_p7 = pnand %p5192_p6, %p5189_p5 }
 0x489   :  { %5197 = shalt.err (!%p5194_p7)
}
 0x48a   :  { %3909 = dma.vmem_to_hbm [thread:$0]  %s3907_s25, 32, %s7044_s9, [#allocation3]  }
 0x48b   :  { %5198 = dma.done.wait [#allocation3], 32  }
 0x48c   :  { %5199 = vsyncadd [#allocation3], 4294967264 }
 0x48d   :  { %3913 = vsyncpa [#allocation3], 1 }

</bundles_post_ra>
